<compile_context>
chip_gen: v5e
topology: v5e:2x2
jax: 0.10.0
libtpu: 0.0.40
codegen_flags: <defaults>
</compile_context>

<pallas_src>
import jax
import jax.numpy as jnp
from jax.experimental import pallas as pl
from jax.experimental.pallas import tpu as pltpu

GW = 128  # lane width of every padded highway branch / LSTM gate block


def make_encoder_kernel(S, Bp, H, n_hw1, n_hw2):
    """Build the kernel with all sizes closed over as Python constants."""

    def kernel(x_ref, w384_ref, w512_ref, bias_ref, out_ref, gin_ref):
        # ------------------------- Highway 1 ---------------------------------
        # branch layout per layer: [nonlinear | linear | gate], each 128 lanes
        h = x_ref[...]                                        # bf16 [S*Bp, 128]
        for l in range(n_hw1):
            w = w384_ref[l * GW:(l + 1) * GW, :]              # bf16 [128, 384]
            b = bias_ref[l:l + 1, :][:, 0:3 * GW]             # f32  [1, 384]
            z = jnp.dot(h, w, preferred_element_type=jnp.float32) + b
            nonl = jax.nn.relu(z[:, 0:GW])
            lin = z[:, GW:2 * GW]
            gate = jax.nn.sigmoid(z[:, 2 * GW:3 * GW])
            h = (gate * nonl + (1.0 - gate) * lin).astype(jnp.bfloat16)

        # ---------- hoisted LSTM input projection (both directions) ----------
        # gate column layout: [i | f | o | g], each 128 lanes; inside each block
        # forward dir occupies lanes 0:H, backward dir lanes H:2H, rest zero.
        wih = w512_ref[0:GW, :]                               # bf16 [128, 512]
        whh = w512_ref[GW:2 * GW, :]                          # bf16 [128, 512]
        bih = bias_ref[n_hw1:n_hw1 + 1, :]                    # f32  [1, 512]
        xproj = jnp.dot(h, wih, preferred_element_type=jnp.float32) + bih

        # hoisted fwd/bwd time select -> VMEM scratch (off the critical path)
        lane = jax.lax.broadcasted_iota(jnp.int32, (Bp, 4 * GW), 1)
        is_fwd = (lane % GW) < H
        for t in range(S):
            g_fwd = xproj[t * Bp:(t + 1) * Bp, :]
            g_bwd = xproj[(S - 1 - t) * Bp:(S - t) * Bp, :]
            gin_ref[t * Bp:(t + 1) * Bp, :] = jnp.where(is_fwd, g_fwd, g_bwd)

        # --------- bidirectional recurrence (one MXU dot per step) -----------
        # t = 0: h = c = 0 -> skip the recurrent dot, the cast and the f*c term.
        gin0 = gin_ref[0:Bp, :]                               # f32 [Bp, 512]
        sg = jax.nn.sigmoid(gin0[:, 0:3 * GW])                # i | f | o
        g = jnp.tanh(gin0[:, 3 * GW:4 * GW])
        c_cat = sg[:, 0:GW] * g                               # c = i * g
        h_cat = sg[:, 2 * GW:3 * GW] * jnp.tanh(c_cat)        # h = o * tanh(c)

        for t in range(1, S):                                 # S small: unrolled
            gin = gin_ref[t * Bp:(t + 1) * Bp, :]
            recur = jnp.dot(h_cat.astype(jnp.bfloat16), whh,
                            preferred_element_type=jnp.float32)
            gates = gin + recur                               # f32 [Bp, 512]
            sg = jax.nn.sigmoid(gates[:, 0:3 * GW])           # one contiguous slab
            g = jnp.tanh(gates[:, 3 * GW:4 * GW])
            c_cat = sg[:, GW:2 * GW] * c_cat + sg[:, 0:GW] * g
            h_cat = sg[:, 2 * GW:3 * GW] * jnp.tanh(c_cat)

        # h_cat lanes 0:H = forward final state, H:2H = backward final state,
        # lanes 2H:128 stay exactly zero  ==  torch.cat([h_1, h_2], 1) (padded).

        # ------------------------- Highway 2 ---------------------------------
        hh = h_cat                                            # f32 [Bp, 128]
        for l in range(n_hw2):
            w = w384_ref[(n_hw1 + l) * GW:(n_hw1 + l + 1) * GW, :]
            b = bias_ref[n_hw1 + 1 + l:n_hw1 + 2 + l, :][:, 0:3 * GW]
            z = jnp.dot(hh.astype(jnp.bfloat16), w,
                        preferred_element_type=jnp.float32) + b
            nonl = jax.nn.relu(z[:, 0:GW])
            lin = z[:, GW:2 * GW]
            gate = jax.nn.sigmoid(z[:, 2 * GW:3 * GW])
            hh = gate * nonl + (1.0 - gate) * lin

        # padded lanes are exactly zero -> single unmasked full-vreg store
        out_ref[...] = hh.astype(out_ref.dtype)

    return kernel


# ------------------------------ wrapper helpers ----------------------------------

def _pack_params(hw1_w, hw1_b, wih, whh, lstm_b, hw2_w, hw2_b, E, H):
    """Pack all parameters into three arrays with 128-lane-padded blocks.

    Returns:
      w384 [(n_hw1+n_hw2)*128, 384] bf16  - highway weights, branches padded to 128
      w512 [256, 512]               bf16  - rows 0:128 = W_ih, rows 128:256 = W_hh
      bias [n_hw1+1+n_hw2, 512]     f32   - hw1 biases, LSTM bias, hw2 biases
    """
    n_hw1, n_hw2 = hw1_w.shape[0], hw2_w.shape[0]

    def pad_highway_layer(Wl, bl):
        # Wl: [3, D, D] (nonlinear, linear, gate); bl: [3, 1, D]
        D = Wl.shape[-1]
        w = jnp.zeros((GW, 3 * GW), jnp.float32)
        b = jnp.zeros((1, 4 * GW), jnp.float32)
        for k in range(3):
            w = w.at[0:D, k * GW:k * GW + D].set(Wl[k])
            b = b.at[:, k * GW:k * GW + D].set(bl[k])
        return w, b

    w_rows, b_rows = [], []
    for l in range(n_hw1):
        w, b = pad_highway_layer(hw1_w[l], hw1_b[l])
        w_rows.append(w)
        b_rows.append(b)

    # LSTM: reorder torch gates (i, f, g, o) -> blocks [i | f | o | g]; per block
    # fwd direction in cols 0:H, bwd in cols H:2H; rows/cols beyond stay zero.
    gate_order = (0, 1, 3, 2)
    wih_f = jnp.zeros((GW, 4 * GW), jnp.float32)
    whh_f = jnp.zeros((GW, 4 * GW), jnp.float32)
    b_lstm = jnp.zeros((1, 4 * GW), jnp.float32)
    for kb, g in enumerate(gate_order):
        for d in range(2):
            c0 = kb * GW + d * H
            wih_f = wih_f.at[0:E, c0:c0 + H].set(wih[d, :, g * H:(g + 1) * H])
            whh_f = whh_f.at[d * H:(d + 1) * H, c0:c0 + H].set(
                whh[d, :, g * H:(g + 1) * H])
            b_lstm = b_lstm.at[:, c0:c0 + H].set(lstm_b[d, :, g * H:(g + 1) * H])
    b_rows.append(b_lstm)

    for l in range(n_hw2):
        w, b = pad_highway_layer(hw2_w[l], hw2_b[l])
        w_rows.append(w)
        b_rows.append(b)

    w384 = jnp.concatenate(w_rows, axis=0).astype(jnp.bfloat16)
    w512 = jnp.concatenate([wih_f, whh_f], axis=0).astype(jnp.bfloat16)
    bias = jnp.concatenate(b_rows, axis=0)            # stays f32
    return w384, w512, bias


def encoder_forward(x, hw1_w, hw1_b, wih, whh, lstm_b, hw2_w, hw2_b):
    B, S, E = x.shape
    H = whh.shape[1]
    H2 = 2 * H
    n_hw1, n_hw2 = hw1_w.shape[0], hw2_w.shape[0]
    assert E <= GW and H2 <= GW, "shapes must fit in one 128-lane block"

    # pad batch to a sublane-aligned row count; pad feature dim to 128 lanes;
    # time-major flatten done wrapper-side (no in-kernel reshapes).
    Bp = max(8, -(-B // 8) * 8)
    xp = jnp.zeros((Bp, S, GW), jnp.float32).at[:B, :, :E].set(x)
    x_tm = jnp.transpose(xp, (1, 0, 2)).reshape(S * Bp, GW).astype(jnp.bfloat16)

    w384, w512, bias = _pack_params(hw1_w, hw1_b, wih, whh, lstm_b,
                                    hw2_w, hw2_b, E, H)

    kernel = make_encoder_kernel(S, Bp, H, n_hw1, n_hw2)
    vmem = pl.BlockSpec(memory_space=pltpu.MemorySpace.VMEM)
    out = pl.pallas_call(
        kernel,
        out_shape=jax.ShapeDtypeStruct((Bp, GW), jnp.float32),
        in_specs=[vmem, vmem, vmem, vmem],
        out_specs=vmem,
        scratch_shapes=[pltpu.VMEM((S * Bp, 4 * GW), jnp.float32)],
    )(x_tm, w384, w512, bias)
    return out[:B, :H2]


# ------------------------------ pure-JAX reference -------------------------------

def _reference(x, hw1_w, hw1_b, wih, whh, lstm_b, hw2_w, hw2_b):
    B, S, E = x.shape
    H = whh.shape[1]

    def highway(h, W, b):
        for l in range(W.shape[0]):
            g = jax.nn.sigmoid(h @ W[l, 2] + b[l, 2])
            n = jax.nn.relu(h @ W[l, 0] + b[l, 0])
            li = h @ W[l, 1] + b[l, 1]
            h = g * n + (1.0 - g) * li
        return h

    h = highway(x.reshape(B * S, E), hw1_w, hw1_b).reshape(B, S, E)

    def step(x_t, hh, cc, d):
        gates = x_t @ wih[d] + hh @ whh[d] + lstm_b[d]
        i = jax.nn.sigmoid(gates[:, 0:H]); f = jax.nn.sigmoid(gates[:, H:2 * H])
        g = jnp.tanh(gates[:, 2 * H:3 * H]); o = jax.nn.sigmoid(gates[:, 3 * H:4 * H])
        cc = f * cc + i * g
        return o * jnp.tanh(cc), cc

    hf = jnp.zeros((B, H)); cf = jnp.zeros((B, H))
    hb = jnp.zeros((B, H)); cb = jnp.zeros((B, H))
    for t in range(S):
        hf, cf = step(h[:, t, :], hf, cf, 0)
        hb, cb = step(h[:, S - 1 - t, :], hb, cb, 1)
    out = jnp.concatenate([hf, hb], axis=1)
    return highway(out, hw2_w, hw2_b)


if __name__ == "__main__":
    # params: word_embed_size=24, sum_depth=8 -> E=32; encoder_rnn_size H=32;
    # encoder_num_layers=1 (inter-layer dropout inactive).
    B, S, E, H = 2, 8, 32, 32

    key = jax.random.PRNGKey(0)
    ks = jax.random.split(key, 9)
    scale = 0.1

    x = jax.random.normal(ks[0], (B, S, E), jnp.float32)

    # Highway 1: 2 layers x (nonlinear, linear, gate) weights [E,E], biases [1,E]
    hw1_w = scale * jax.random.normal(ks[1], (2, 3, E, E), jnp.float32)
    hw1_b = scale * jax.random.normal(ks[2], (2, 3, 1, E), jnp.float32)

    # LSTM: per direction, W_ih^T [E,4H], W_hh^T [H,4H], combined bias [1,4H]
    wih = scale * jax.random.normal(ks[3], (2, E, 4 * H), jnp.float32)
    whh = scale * jax.random.normal(ks[4], (2, H, 4 * H), jnp.float32)
    lstm_b = scale * jax.random.normal(ks[5], (2, 1, 4 * H), jnp.float32)

    # Highway 2: 3 layers over size 2H
    hw2_w = scale * jax.random.normal(ks[6], (3, 3, 2 * H, 2 * H), jnp.float32)
    hw2_b = scale * jax.random.normal(ks[7], (3, 3, 1, 2 * H), jnp.float32)

    out = encoder_forward(x, hw1_w, hw1_b, wih, whh, lstm_b, hw2_w, hw2_b)
    out = jax.block_until_ready(out)

    ref = _reference(x, hw1_w, hw1_b, wih, whh, lstm_b, hw2_w, hw2_b)
    assert out.shape == (B, 2 * H)
    # bf16 matmul operands -> relaxed tolerance vs the f32 reference
    assert jnp.allclose(out, ref, atol=3e-2, rtol=3e-2), "mismatch vs JAX reference"

    print("KERNEL_OK")
</pallas_src>

<mosaic_0001>
module attributes {stable_mosaic.version = 11 : i64} {
  func.func @kernel(%arg0: memref<64x128xbf16, #tpu.memory_space<vmem>>, %arg1: memref<640x384xbf16, #tpu.memory_space<vmem>>, %arg2: memref<256x512xbf16, #tpu.memory_space<vmem>>, %arg3: memref<6x512xf32, #tpu.memory_space<vmem>>, %arg4: memref<8x128xf32, #tpu.memory_space<vmem>>, %arg5: memref<64x512xf32, #tpu.memory_space<vmem>>) attributes {dimension_semantics = [], scalar_prefetch = 0 : i64, scratch_operands = 1 : i64, tpu.core_type = #tpu.core_type<tc>} {
    %c0 = arith.constant 0 : index
    %c0_0 = arith.constant 0 : index
    %0 = vector.load %arg0[%c0, %c0_0] : memref<64x128xbf16, #tpu.memory_space<vmem>>, vector<64x128xbf16>
    %c0_1 = arith.constant 0 : index
    %c0_2 = arith.constant 0 : index
    %1 = vector.load %arg1[%c0_1, %c0_2] : memref<640x384xbf16, #tpu.memory_space<vmem>>, vector<128x384xbf16>
    %c0_3 = arith.constant 0 : index
    %c0_4 = arith.constant 0 : index
    %2 = vector.load %arg3[%c0_3, %c0_4] : memref<6x512xf32, #tpu.memory_space<vmem>>, vector<1x512xf32>
    %3 = vector.extract_strided_slice %2 {offsets = [0, 0], sizes = [1, 384], strides = [1, 1]} : vector<1x512xf32> to vector<1x384xf32>
    %cst = arith.constant dense<0.000000e+00> : vector<64x384xf32>
    %4 = tpu.matmul %0, %1, %cst {dimension_numbers = #tpu.dot_dimension_numbers<[1], [0], [0], [1], [0, 0, 1, 1], [], []>} : vector<64x128xbf16>, vector<128x384xbf16>, vector<64x384xf32> -> vector<64x384xf32>
    %5 = vector.broadcast %3 : vector<1x384xf32> to vector<64x384xf32>
    %6 = arith.addf %4, %5 : vector<64x384xf32>
    %7 = vector.extract_strided_slice %6 {offsets = [0, 0], sizes = [64, 128], strides = [1, 1]} : vector<64x384xf32> to vector<64x128xf32>
    %cst_5 = arith.constant 0.000000e+00 : f32
    %8 = vector.broadcast %cst_5 : f32 to vector<64x128xf32>
    %9 = arith.maximumf %7, %8 : vector<64x128xf32>
    %10 = vector.extract_strided_slice %6 {offsets = [0, 128], sizes = [64, 128], strides = [1, 1]} : vector<64x384xf32> to vector<64x128xf32>
    %11 = vector.extract_strided_slice %6 {offsets = [0, 256], sizes = [64, 128], strides = [1, 1]} : vector<64x384xf32> to vector<64x128xf32>
    %12 = arith.negf %11 : vector<64x128xf32>
    %13 = math.exp %12 : vector<64x128xf32>
    %cst_6 = arith.constant 1.000000e+00 : f32
    %14 = vector.broadcast %cst_6 : f32 to vector<64x128xf32>
    %15 = arith.addf %14, %13 : vector<64x128xf32>
    %16 = arith.divf %14, %15 : vector<64x128xf32>
    %17 = arith.mulf %16, %9 : vector<64x128xf32>
    %cst_7 = arith.constant 1.000000e+00 : f32
    %18 = vector.broadcast %cst_7 : f32 to vector<64x128xf32>
    %19 = arith.subf %18, %16 : vector<64x128xf32>
    %20 = arith.mulf %19, %10 : vector<64x128xf32>
    %21 = arith.addf %17, %20 : vector<64x128xf32>
    %22 = arith.truncf %21 : vector<64x128xf32> to vector<64x128xbf16>
    %c128 = arith.constant 128 : index
    %c0_8 = arith.constant 0 : index
    %23 = vector.load %arg1[%c128, %c0_8] : memref<640x384xbf16, #tpu.memory_space<vmem>>, vector<128x384xbf16>
    %c1 = arith.constant 1 : index
    %c0_9 = arith.constant 0 : index
    %24 = vector.load %arg3[%c1, %c0_9] : memref<6x512xf32, #tpu.memory_space<vmem>>, vector<1x512xf32>
    %25 = vector.extract_strided_slice %24 {offsets = [0, 0], sizes = [1, 384], strides = [1, 1]} : vector<1x512xf32> to vector<1x384xf32>
    %cst_10 = arith.constant dense<0.000000e+00> : vector<64x384xf32>
    %26 = tpu.matmul %22, %23, %cst_10 {dimension_numbers = #tpu.dot_dimension_numbers<[1], [0], [0], [1], [0, 0, 1, 1], [], []>} : vector<64x128xbf16>, vector<128x384xbf16>, vector<64x384xf32> -> vector<64x384xf32>
    %27 = vector.broadcast %25 : vector<1x384xf32> to vector<64x384xf32>
    %28 = arith.addf %26, %27 : vector<64x384xf32>
    %29 = vector.extract_strided_slice %28 {offsets = [0, 0], sizes = [64, 128], strides = [1, 1]} : vector<64x384xf32> to vector<64x128xf32>
    %cst_11 = arith.constant 0.000000e+00 : f32
    %30 = vector.broadcast %cst_11 : f32 to vector<64x128xf32>
    %31 = arith.maximumf %29, %30 : vector<64x128xf32>
    %32 = vector.extract_strided_slice %28 {offsets = [0, 128], sizes = [64, 128], strides = [1, 1]} : vector<64x384xf32> to vector<64x128xf32>
    %33 = vector.extract_strided_slice %28 {offsets = [0, 256], sizes = [64, 128], strides = [1, 1]} : vector<64x384xf32> to vector<64x128xf32>
    %34 = arith.negf %33 : vector<64x128xf32>
    %35 = math.exp %34 : vector<64x128xf32>
    %cst_12 = arith.constant 1.000000e+00 : f32
    %36 = vector.broadcast %cst_12 : f32 to vector<64x128xf32>
    %37 = arith.addf %36, %35 : vector<64x128xf32>
    %38 = arith.divf %36, %37 : vector<64x128xf32>
    %39 = arith.mulf %38, %31 : vector<64x128xf32>
    %cst_13 = arith.constant 1.000000e+00 : f32
    %40 = vector.broadcast %cst_13 : f32 to vector<64x128xf32>
    %41 = arith.subf %40, %38 : vector<64x128xf32>
    %42 = arith.mulf %41, %32 : vector<64x128xf32>
    %43 = arith.addf %39, %42 : vector<64x128xf32>
    %44 = arith.truncf %43 : vector<64x128xf32> to vector<64x128xbf16>
    %c0_14 = arith.constant 0 : index
    %c0_15 = arith.constant 0 : index
    %45 = vector.load %arg2[%c0_14, %c0_15] : memref<256x512xbf16, #tpu.memory_space<vmem>>, vector<128x512xbf16>
    %c128_16 = arith.constant 128 : index
    %c0_17 = arith.constant 0 : index
    %46 = vector.load %arg2[%c128_16, %c0_17] : memref<256x512xbf16, #tpu.memory_space<vmem>>, vector<128x512xbf16>
    %c2 = arith.constant 2 : index
    %c0_18 = arith.constant 0 : index
    %47 = vector.load %arg3[%c2, %c0_18] : memref<6x512xf32, #tpu.memory_space<vmem>>, vector<1x512xf32>
    %cst_19 = arith.constant dense<0.000000e+00> : vector<64x512xf32>
    %48 = tpu.matmul %44, %45, %cst_19 {dimension_numbers = #tpu.dot_dimension_numbers<[1], [0], [0], [1], [0, 0, 1, 1], [], []>} : vector<64x128xbf16>, vector<128x512xbf16>, vector<64x512xf32> -> vector<64x512xf32>
    %49 = vector.broadcast %47 : vector<1x512xf32> to vector<64x512xf32>
    %50 = arith.addf %48, %49 : vector<64x512xf32>
    %51 = tpu.iota {dimensions = array<i32: 1>} : vector<8x512xi32>
    %c128_i32 = arith.constant 128 : i32
    %c0_i32 = arith.constant 0 : i32
    %52 = arith.cmpi eq, %c128_i32, %c0_i32 : i32
    %c1_i32 = arith.constant 1 : i32
    %53 = arith.select %52, %c1_i32, %c128_i32 : i32
    %54 = vector.broadcast %53 : i32 to vector<8x512xi32>
    %55 = arith.remsi %51, %54 : vector<8x512xi32>
    %c0_i32_20 = arith.constant 0 : i32
    %56 = vector.broadcast %c0_i32_20 : i32 to vector<8x512xi32>
    %57 = arith.cmpi ne, %55, %56 : vector<8x512xi32>
    %c0_i32_21 = arith.constant 0 : i32
    %58 = vector.broadcast %c0_i32_21 : i32 to vector<8x512xi32>
    %59 = arith.cmpi slt, %55, %58 : vector<8x512xi32>
    %c0_i32_22 = arith.constant 0 : i32
    %60 = arith.cmpi slt, %53, %c0_i32_22 : i32
    %61 = vector.broadcast %60 : i1 to vector<8x512xi1>
    %62 = vector.broadcast %61 : vector<8x512xi1> to vector<8x512xi1>
    %63 = arith.xori %59, %62 : vector<8x512xi1>
    %64 = arith.andi %63, %57 : vector<8x512xi1>
    %65 = vector.broadcast %53 : i32 to vector<8x512xi32>
    %66 = arith.addi %55, %65 : vector<8x512xi32>
    %67 = arith.select %64, %66, %55 : vector<8x512xi1>, vector<8x512xi32>
    %c32_i32 = arith.constant 32 : i32
    %68 = vector.broadcast %c32_i32 : i32 to vector<8x512xi32>
    %69 = arith.cmpi slt, %67, %68 : vector<8x512xi32>
    %70 = vector.extract_strided_slice %50 {offsets = [0, 0], sizes = [8, 512], strides = [1, 1]} : vector<64x512xf32> to vector<8x512xf32>
    %71 = vector.extract_strided_slice %50 {offsets = [56, 0], sizes = [8, 512], strides = [1, 1]} : vector<64x512xf32> to vector<8x512xf32>
    %72 = arith.select %69, %70, %71 : vector<8x512xi1>, vector<8x512xf32>
    %c0_23 = arith.constant 0 : index
    %c0_24 = arith.constant 0 : index
    %73 = vector.load %arg5[%c0_23, %c0_24] : memref<64x512xf32, #tpu.memory_space<vmem>>, vector<8x512xf32>
    tpu.vector_store %arg5[%c0_23, %c0_24], %72 {strides = array<i32>} : memref<64x512xf32, #tpu.memory_space<vmem>>, vector<8x512xf32>,
    %74 = vector.extract_strided_slice %50 {offsets = [8, 0], sizes = [8, 512], strides = [1, 1]} : vector<64x512xf32> to vector<8x512xf32>
    %75 = vector.extract_strided_slice %50 {offsets = [48, 0], sizes = [8, 512], strides = [1, 1]} : vector<64x512xf32> to vector<8x512xf32>
    %76 = arith.select %69, %74, %75 : vector<8x512xi1>, vector<8x512xf32>
    %c8 = arith.constant 8 : index
    %c0_25 = arith.constant 0 : index
    %77 = vector.load %arg5[%c8, %c0_25] : memref<64x512xf32, #tpu.memory_space<vmem>>, vector<8x512xf32>
    tpu.vector_store %arg5[%c8, %c0_25], %76 {strides = array<i32>} : memref<64x512xf32, #tpu.memory_space<vmem>>, vector<8x512xf32>,
    %78 = vector.extract_strided_slice %50 {offsets = [16, 0], sizes = [8, 512], strides = [1, 1]} : vector<64x512xf32> to vector<8x512xf32>
    %79 = vector.extract_strided_slice %50 {offsets = [40, 0], sizes = [8, 512], strides = [1, 1]} : vector<64x512xf32> to vector<8x512xf32>
    %80 = arith.select %69, %78, %79 : vector<8x512xi1>, vector<8x512xf32>
    %c16 = arith.constant 16 : index
    %c0_26 = arith.constant 0 : index
    %81 = vector.load %arg5[%c16, %c0_26] : memref<64x512xf32, #tpu.memory_space<vmem>>, vector<8x512xf32>
    tpu.vector_store %arg5[%c16, %c0_26], %80 {strides = array<i32>} : memref<64x512xf32, #tpu.memory_space<vmem>>, vector<8x512xf32>,
    %82 = vector.extract_strided_slice %50 {offsets = [24, 0], sizes = [8, 512], strides = [1, 1]} : vector<64x512xf32> to vector<8x512xf32>
    %83 = vector.extract_strided_slice %50 {offsets = [32, 0], sizes = [8, 512], strides = [1, 1]} : vector<64x512xf32> to vector<8x512xf32>
    %84 = arith.select %69, %82, %83 : vector<8x512xi1>, vector<8x512xf32>
    %c24 = arith.constant 24 : index
    %c0_27 = arith.constant 0 : index
    %85 = vector.load %arg5[%c24, %c0_27] : memref<64x512xf32, #tpu.memory_space<vmem>>, vector<8x512xf32>
    tpu.vector_store %arg5[%c24, %c0_27], %84 {strides = array<i32>} : memref<64x512xf32, #tpu.memory_space<vmem>>, vector<8x512xf32>,
    %86 = vector.extract_strided_slice %50 {offsets = [32, 0], sizes = [8, 512], strides = [1, 1]} : vector<64x512xf32> to vector<8x512xf32>
    %87 = vector.extract_strided_slice %50 {offsets = [24, 0], sizes = [8, 512], strides = [1, 1]} : vector<64x512xf32> to vector<8x512xf32>
    %88 = arith.select %69, %86, %87 : vector<8x512xi1>, vector<8x512xf32>
    %c32 = arith.constant 32 : index
    %c0_28 = arith.constant 0 : index
    %89 = vector.load %arg5[%c32, %c0_28] : memref<64x512xf32, #tpu.memory_space<vmem>>, vector<8x512xf32>
    tpu.vector_store %arg5[%c32, %c0_28], %88 {strides = array<i32>} : memref<64x512xf32, #tpu.memory_space<vmem>>, vector<8x512xf32>,
    %90 = vector.extract_strided_slice %50 {offsets = [40, 0], sizes = [8, 512], strides = [1, 1]} : vector<64x512xf32> to vector<8x512xf32>
    %91 = vector.extract_strided_slice %50 {offsets = [16, 0], sizes = [8, 512], strides = [1, 1]} : vector<64x512xf32> to vector<8x512xf32>
    %92 = arith.select %69, %90, %91 : vector<8x512xi1>, vector<8x512xf32>
    %c40 = arith.constant 40 : index
    %c0_29 = arith.constant 0 : index
    %93 = vector.load %arg5[%c40, %c0_29] : memref<64x512xf32, #tpu.memory_space<vmem>>, vector<8x512xf32>
    tpu.vector_store %arg5[%c40, %c0_29], %92 {strides = array<i32>} : memref<64x512xf32, #tpu.memory_space<vmem>>, vector<8x512xf32>,
    %94 = vector.extract_strided_slice %50 {offsets = [48, 0], sizes = [8, 512], strides = [1, 1]} : vector<64x512xf32> to vector<8x512xf32>
    %95 = vector.extract_strided_slice %50 {offsets = [8, 0], sizes = [8, 512], strides = [1, 1]} : vector<64x512xf32> to vector<8x512xf32>
    %96 = arith.select %69, %94, %95 : vector<8x512xi1>, vector<8x512xf32>
    %c48 = arith.constant 48 : index
    %c0_30 = arith.constant 0 : index
    %97 = vector.load %arg5[%c48, %c0_30] : memref<64x512xf32, #tpu.memory_space<vmem>>, vector<8x512xf32>
    tpu.vector_store %arg5[%c48, %c0_30], %96 {strides = array<i32>} : memref<64x512xf32, #tpu.memory_space<vmem>>, vector<8x512xf32>,
    %98 = vector.extract_strided_slice %50 {offsets = [56, 0], sizes = [8, 512], strides = [1, 1]} : vector<64x512xf32> to vector<8x512xf32>
    %99 = vector.extract_strided_slice %50 {offsets = [0, 0], sizes = [8, 512], strides = [1, 1]} : vector<64x512xf32> to vector<8x512xf32>
    %100 = arith.select %69, %98, %99 : vector<8x512xi1>, vector<8x512xf32>
    %c56 = arith.constant 56 : index
    %c0_31 = arith.constant 0 : index
    %101 = vector.load %arg5[%c56, %c0_31] : memref<64x512xf32, #tpu.memory_space<vmem>>, vector<8x512xf32>
    tpu.vector_store %arg5[%c56, %c0_31], %100 {strides = array<i32>} : memref<64x512xf32, #tpu.memory_space<vmem>>, vector<8x512xf32>,
    %c0_32 = arith.constant 0 : index
    %c0_33 = arith.constant 0 : index
    %102 = vector.load %arg5[%c0_32, %c0_33] : memref<64x512xf32, #tpu.memory_space<vmem>>, vector<8x512xf32>
    %103 = vector.extract_strided_slice %102 {offsets = [0, 0], sizes = [8, 384], strides = [1, 1]} : vector<8x512xf32> to vector<8x384xf32>
    %104 = arith.negf %103 : vector<8x384xf32>
    %105 = math.exp %104 : vector<8x384xf32>
    %cst_34 = arith.constant 1.000000e+00 : f32
    %106 = vector.broadcast %cst_34 : f32 to vector<8x384xf32>
    %107 = arith.addf %106, %105 : vector<8x384xf32>
    %108 = arith.divf %106, %107 : vector<8x384xf32>
    %109 = vector.extract_strided_slice %102 {offsets = [0, 384], sizes = [8, 128], strides = [1, 1]} : vector<8x512xf32> to vector<8x128xf32>
    %110 = math.tanh %109 : vector<8x128xf32>
    %111 = vector.extract_strided_slice %108 {offsets = [0, 0], sizes = [8, 128], strides = [1, 1]} : vector<8x384xf32> to vector<8x128xf32>
    %112 = arith.mulf %111, %110 : vector<8x128xf32>
    %113 = vector.extract_strided_slice %108 {offsets = [0, 256], sizes = [8, 128], strides = [1, 1]} : vector<8x384xf32> to vector<8x128xf32>
    %114 = math.tanh %112 : vector<8x128xf32>
    %115 = arith.mulf %113, %114 : vector<8x128xf32>
    %c8_35 = arith.constant 8 : index
    %c0_36 = arith.constant 0 : index
    %116 = vector.load %arg5[%c8_35, %c0_36] : memref<64x512xf32, #tpu.memory_space<vmem>>, vector<8x512xf32>
    %117 = arith.truncf %115 : vector<8x128xf32> to vector<8x128xbf16>
    %cst_37 = arith.constant dense<0.000000e+00> : vector<8x512xf32>
    %118 = tpu.matmul %117, %46, %cst_37 {dimension_numbers = #tpu.dot_dimension_numbers<[1], [0], [0], [1], [0, 0, 1, 1], [], []>} : vector<8x128xbf16>, vector<128x512xbf16>, vector<8x512xf32> -> vector<8x512xf32>
    %119 = arith.addf %116, %118 : vector<8x512xf32>
    %120 = vector.extract_strided_slice %119 {offsets = [0, 0], sizes = [8, 384], strides = [1, 1]} : vector<8x512xf32> to vector<8x384xf32>
    %121 = arith.negf %120 : vector<8x384xf32>
    %122 = math.exp %121 : vector<8x384xf32>
    %cst_38 = arith.constant 1.000000e+00 : f32
    %123 = vector.broadcast %cst_38 : f32 to vector<8x384xf32>
    %124 = arith.addf %123, %122 : vector<8x384xf32>
    %125 = arith.divf %123, %124 : vector<8x384xf32>
    %126 = vector.extract_strided_slice %119 {offsets = [0, 384], sizes = [8, 128], strides = [1, 1]} : vector<8x512xf32> to vector<8x128xf32>
    %127 = math.tanh %126 : vector<8x128xf32>
    %128 = vector.extract_strided_slice %125 {offsets = [0, 128], sizes = [8, 128], strides = [1, 1]} : vector<8x384xf32> to vector<8x128xf32>
    %129 = arith.mulf %128, %112 : vector<8x128xf32>
    %130 = vector.extract_strided_slice %125 {offsets = [0, 0], sizes = [8, 128], strides = [1, 1]} : vector<8x384xf32> to vector<8x128xf32>
    %131 = arith.mulf %130, %127 : vector<8x128xf32>
    %132 = arith.addf %129, %131 : vector<8x128xf32>
    %133 = vector.extract_strided_slice %125 {offsets = [0, 256], sizes = [8, 128], strides = [1, 1]} : vector<8x384xf32> to vector<8x128xf32>
    %134 = math.tanh %132 : vector<8x128xf32>
    %135 = arith.mulf %133, %134 : vector<8x128xf32>
    %c16_39 = arith.constant 16 : index
    %c0_40 = arith.constant 0 : index
    %136 = vector.load %arg5[%c16_39, %c0_40] : memref<64x512xf32, #tpu.memory_space<vmem>>, vector<8x512xf32>
    %137 = arith.truncf %135 : vector<8x128xf32> to vector<8x128xbf16>
    %cst_41 = arith.constant dense<0.000000e+00> : vector<8x512xf32>
    %138 = tpu.matmul %137, %46, %cst_41 {dimension_numbers = #tpu.dot_dimension_numbers<[1], [0], [0], [1], [0, 0, 1, 1], [], []>} : vector<8x128xbf16>, vector<128x512xbf16>, vector<8x512xf32> -> vector<8x512xf32>
    %139 = arith.addf %136, %138 : vector<8x512xf32>
    %140 = vector.extract_strided_slice %139 {offsets = [0, 0], sizes = [8, 384], strides = [1, 1]} : vector<8x512xf32> to vector<8x384xf32>
    %141 = arith.negf %140 : vector<8x384xf32>
    %142 = math.exp %141 : vector<8x384xf32>
    %cst_42 = arith.constant 1.000000e+00 : f32
    %143 = vector.broadcast %cst_42 : f32 to vector<8x384xf32>
    %144 = arith.addf %143, %142 : vector<8x384xf32>
    %145 = arith.divf %143, %144 : vector<8x384xf32>
    %146 = vector.extract_strided_slice %139 {offsets = [0, 384], sizes = [8, 128], strides = [1, 1]} : vector<8x512xf32> to vector<8x128xf32>
    %147 = math.tanh %146 : vector<8x128xf32>
    %148 = vector.extract_strided_slice %145 {offsets = [0, 128], sizes = [8, 128], strides = [1, 1]} : vector<8x384xf32> to vector<8x128xf32>
    %149 = arith.mulf %148, %132 : vector<8x128xf32>
    %150 = vector.extract_strided_slice %145 {offsets = [0, 0], sizes = [8, 128], strides = [1, 1]} : vector<8x384xf32> to vector<8x128xf32>
    %151 = arith.mulf %150, %147 : vector<8x128xf32>
    %152 = arith.addf %149, %151 : vector<8x128xf32>
    %153 = vector.extract_strided_slice %145 {offsets = [0, 256], sizes = [8, 128], strides = [1, 1]} : vector<8x384xf32> to vector<8x128xf32>
    %154 = math.tanh %152 : vector<8x128xf32>
    %155 = arith.mulf %153, %154 : vector<8x128xf32>
    %c24_43 = arith.constant 24 : index
    %c0_44 = arith.constant 0 : index
    %156 = vector.load %arg5[%c24_43, %c0_44] : memref<64x512xf32, #tpu.memory_space<vmem>>, vector<8x512xf32>
    %157 = arith.truncf %155 : vector<8x128xf32> to vector<8x128xbf16>
    %cst_45 = arith.constant dense<0.000000e+00> : vector<8x512xf32>
    %158 = tpu.matmul %157, %46, %cst_45 {dimension_numbers = #tpu.dot_dimension_numbers<[1], [0], [0], [1], [0, 0, 1, 1], [], []>} : vector<8x128xbf16>, vector<128x512xbf16>, vector<8x512xf32> -> vector<8x512xf32>
    %159 = arith.addf %156, %158 : vector<8x512xf32>
    %160 = vector.extract_strided_slice %159 {offsets = [0, 0], sizes = [8, 384], strides = [1, 1]} : vector<8x512xf32> to vector<8x384xf32>
    %161 = arith.negf %160 : vector<8x384xf32>
    %162 = math.exp %161 : vector<8x384xf32>
    %cst_46 = arith.constant 1.000000e+00 : f32
    %163 = vector.broadcast %cst_46 : f32 to vector<8x384xf32>
    %164 = arith.addf %163, %162 : vector<8x384xf32>
    %165 = arith.divf %163, %164 : vector<8x384xf32>
    %166 = vector.extract_strided_slice %159 {offsets = [0, 384], sizes = [8, 128], strides = [1, 1]} : vector<8x512xf32> to vector<8x128xf32>
    %167 = math.tanh %166 : vector<8x128xf32>
    %168 = vector.extract_strided_slice %165 {offsets = [0, 128], sizes = [8, 128], strides = [1, 1]} : vector<8x384xf32> to vector<8x128xf32>
    %169 = arith.mulf %168, %152 : vector<8x128xf32>
    %170 = vector.extract_strided_slice %165 {offsets = [0, 0], sizes = [8, 128], strides = [1, 1]} : vector<8x384xf32> to vector<8x128xf32>
    %171 = arith.mulf %170, %167 : vector<8x128xf32>
    %172 = arith.addf %169, %171 : vector<8x128xf32>
    %173 = vector.extract_strided_slice %165 {offsets = [0, 256], sizes = [8, 128], strides = [1, 1]} : vector<8x384xf32> to vector<8x128xf32>
    %174 = math.tanh %172 : vector<8x128xf32>
    %175 = arith.mulf %173, %174 : vector<8x128xf32>
    %c32_47 = arith.constant 32 : index
    %c0_48 = arith.constant 0 : index
    %176 = vector.load %arg5[%c32_47, %c0_48] : memref<64x512xf32, #tpu.memory_space<vmem>>, vector<8x512xf32>
    %177 = arith.truncf %175 : vector<8x128xf32> to vector<8x128xbf16>
    %cst_49 = arith.constant dense<0.000000e+00> : vector<8x512xf32>
    %178 = tpu.matmul %177, %46, %cst_49 {dimension_numbers = #tpu.dot_dimension_numbers<[1], [0], [0], [1], [0, 0, 1, 1], [], []>} : vector<8x128xbf16>, vector<128x512xbf16>, vector<8x512xf32> -> vector<8x512xf32>
    %179 = arith.addf %176, %178 : vector<8x512xf32>
    %180 = vector.extract_strided_slice %179 {offsets = [0, 0], sizes = [8, 384], strides = [1, 1]} : vector<8x512xf32> to vector<8x384xf32>
    %181 = arith.negf %180 : vector<8x384xf32>
    %182 = math.exp %181 : vector<8x384xf32>
    %cst_50 = arith.constant 1.000000e+00 : f32
    %183 = vector.broadcast %cst_50 : f32 to vector<8x384xf32>
    %184 = arith.addf %183, %182 : vector<8x384xf32>
    %185 = arith.divf %183, %184 : vector<8x384xf32>
    %186 = vector.extract_strided_slice %179 {offsets = [0, 384], sizes = [8, 128], strides = [1, 1]} : vector<8x512xf32> to vector<8x128xf32>
    %187 = math.tanh %186 : vector<8x128xf32>
    %188 = vector.extract_strided_slice %185 {offsets = [0, 128], sizes = [8, 128], strides = [1, 1]} : vector<8x384xf32> to vector<8x128xf32>
    %189 = arith.mulf %188, %172 : vector<8x128xf32>
    %190 = vector.extract_strided_slice %185 {offsets = [0, 0], sizes = [8, 128], strides = [1, 1]} : vector<8x384xf32> to vector<8x128xf32>
    %191 = arith.mulf %190, %187 : vector<8x128xf32>
    %192 = arith.addf %189, %191 : vector<8x128xf32>
    %193 = vector.extract_strided_slice %185 {offsets = [0, 256], sizes = [8, 128], strides = [1, 1]} : vector<8x384xf32> to vector<8x128xf32>
    %194 = math.tanh %192 : vector<8x128xf32>
    %195 = arith.mulf %193, %194 : vector<8x128xf32>
    %c40_51 = arith.constant 40 : index
    %c0_52 = arith.constant 0 : index
    %196 = vector.load %arg5[%c40_51, %c0_52] : memref<64x512xf32, #tpu.memory_space<vmem>>, vector<8x512xf32>
    %197 = arith.truncf %195 : vector<8x128xf32> to vector<8x128xbf16>
    %cst_53 = arith.constant dense<0.000000e+00> : vector<8x512xf32>
    %198 = tpu.matmul %197, %46, %cst_53 {dimension_numbers = #tpu.dot_dimension_numbers<[1], [0], [0], [1], [0, 0, 1, 1], [], []>} : vector<8x128xbf16>, vector<128x512xbf16>, vector<8x512xf32> -> vector<8x512xf32>
    %199 = arith.addf %196, %198 : vector<8x512xf32>
    %200 = vector.extract_strided_slice %199 {offsets = [0, 0], sizes = [8, 384], strides = [1, 1]} : vector<8x512xf32> to vector<8x384xf32>
    %201 = arith.negf %200 : vector<8x384xf32>
    %202 = math.exp %201 : vector<8x384xf32>
    %cst_54 = arith.constant 1.000000e+00 : f32
    %203 = vector.broadcast %cst_54 : f32 to vector<8x384xf32>
    %204 = arith.addf %203, %202 : vector<8x384xf32>
    %205 = arith.divf %203, %204 : vector<8x384xf32>
    %206 = vector.extract_strided_slice %199 {offsets = [0, 384], sizes = [8, 128], strides = [1, 1]} : vector<8x512xf32> to vector<8x128xf32>
    %207 = math.tanh %206 : vector<8x128xf32>
    %208 = vector.extract_strided_slice %205 {offsets = [0, 128], sizes = [8, 128], strides = [1, 1]} : vector<8x384xf32> to vector<8x128xf32>
    %209 = arith.mulf %208, %192 : vector<8x128xf32>
    %210 = vector.extract_strided_slice %205 {offsets = [0, 0], sizes = [8, 128], strides = [1, 1]} : vector<8x384xf32> to vector<8x128xf32>
    %211 = arith.mulf %210, %207 : vector<8x128xf32>
    %212 = arith.addf %209, %211 : vector<8x128xf32>
    %213 = vector.extract_strided_slice %205 {offsets = [0, 256], sizes = [8, 128], strides = [1, 1]} : vector<8x384xf32> to vector<8x128xf32>
    %214 = math.tanh %212 : vector<8x128xf32>
    %215 = arith.mulf %213, %214 : vector<8x128xf32>
    %c48_55 = arith.constant 48 : index
    %c0_56 = arith.constant 0 : index
    %216 = vector.load %arg5[%c48_55, %c0_56] : memref<64x512xf32, #tpu.memory_space<vmem>>, vector<8x512xf32>
    %217 = arith.truncf %215 : vector<8x128xf32> to vector<8x128xbf16>
    %cst_57 = arith.constant dense<0.000000e+00> : vector<8x512xf32>
    %218 = tpu.matmul %217, %46, %cst_57 {dimension_numbers = #tpu.dot_dimension_numbers<[1], [0], [0], [1], [0, 0, 1, 1], [], []>} : vector<8x128xbf16>, vector<128x512xbf16>, vector<8x512xf32> -> vector<8x512xf32>
    %219 = arith.addf %216, %218 : vector<8x512xf32>
    %220 = vector.extract_strided_slice %219 {offsets = [0, 0], sizes = [8, 384], strides = [1, 1]} : vector<8x512xf32> to vector<8x384xf32>
    %221 = arith.negf %220 : vector<8x384xf32>
    %222 = math.exp %221 : vector<8x384xf32>
    %cst_58 = arith.constant 1.000000e+00 : f32
    %223 = vector.broadcast %cst_58 : f32 to vector<8x384xf32>
    %224 = arith.addf %223, %222 : vector<8x384xf32>
    %225 = arith.divf %223, %224 : vector<8x384xf32>
    %226 = vector.extract_strided_slice %219 {offsets = [0, 384], sizes = [8, 128], strides = [1, 1]} : vector<8x512xf32> to vector<8x128xf32>
    %227 = math.tanh %226 : vector<8x128xf32>
    %228 = vector.extract_strided_slice %225 {offsets = [0, 128], sizes = [8, 128], strides = [1, 1]} : vector<8x384xf32> to vector<8x128xf32>
    %229 = arith.mulf %228, %212 : vector<8x128xf32>
    %230 = vector.extract_strided_slice %225 {offsets = [0, 0], sizes = [8, 128], strides = [1, 1]} : vector<8x384xf32> to vector<8x128xf32>
    %231 = arith.mulf %230, %227 : vector<8x128xf32>
    %232 = arith.addf %229, %231 : vector<8x128xf32>
    %233 = vector.extract_strided_slice %225 {offsets = [0, 256], sizes = [8, 128], strides = [1, 1]} : vector<8x384xf32> to vector<8x128xf32>
    %234 = math.tanh %232 : vector<8x128xf32>
    %235 = arith.mulf %233, %234 : vector<8x128xf32>
    %c56_59 = arith.constant 56 : index
    %c0_60 = arith.constant 0 : index
    %236 = vector.load %arg5[%c56_59, %c0_60] : memref<64x512xf32, #tpu.memory_space<vmem>>, vector<8x512xf32>
    %237 = arith.truncf %235 : vector<8x128xf32> to vector<8x128xbf16>
    %cst_61 = arith.constant dense<0.000000e+00> : vector<8x512xf32>
    %238 = tpu.matmul %237, %46, %cst_61 {dimension_numbers = #tpu.dot_dimension_numbers<[1], [0], [0], [1], [0, 0, 1, 1], [], []>} : vector<8x128xbf16>, vector<128x512xbf16>, vector<8x512xf32> -> vector<8x512xf32>
    %239 = arith.addf %236, %238 : vector<8x512xf32>
    %240 = vector.extract_strided_slice %239 {offsets = [0, 0], sizes = [8, 384], strides = [1, 1]} : vector<8x512xf32> to vector<8x384xf32>
    %241 = arith.negf %240 : vector<8x384xf32>
    %242 = math.exp %241 : vector<8x384xf32>
    %cst_62 = arith.constant 1.000000e+00 : f32
    %243 = vector.broadcast %cst_62 : f32 to vector<8x384xf32>
    %244 = arith.addf %243, %242 : vector<8x384xf32>
    %245 = arith.divf %243, %244 : vector<8x384xf32>
    %246 = vector.extract_strided_slice %239 {offsets = [0, 384], sizes = [8, 128], strides = [1, 1]} : vector<8x512xf32> to vector<8x128xf32>
    %247 = math.tanh %246 : vector<8x128xf32>
    %248 = vector.extract_strided_slice %245 {offsets = [0, 128], sizes = [8, 128], strides = [1, 1]} : vector<8x384xf32> to vector<8x128xf32>
    %249 = arith.mulf %248, %232 : vector<8x128xf32>
    %250 = vector.extract_strided_slice %245 {offsets = [0, 0], sizes = [8, 128], strides = [1, 1]} : vector<8x384xf32> to vector<8x128xf32>
    %251 = arith.mulf %250, %247 : vector<8x128xf32>
    %252 = arith.addf %249, %251 : vector<8x128xf32>
    %253 = vector.extract_strided_slice %245 {offsets = [0, 256], sizes = [8, 128], strides = [1, 1]} : vector<8x384xf32> to vector<8x128xf32>
    %254 = math.tanh %252 : vector<8x128xf32>
    %255 = arith.mulf %253, %254 : vector<8x128xf32>
    %c256 = arith.constant 256 : index
    %c0_63 = arith.constant 0 : index
    %256 = vector.load %arg1[%c256, %c0_63] : memref<640x384xbf16, #tpu.memory_space<vmem>>, vector<128x384xbf16>
    %c3 = arith.constant 3 : index
    %c0_64 = arith.constant 0 : index
    %257 = vector.load %arg3[%c3, %c0_64] : memref<6x512xf32, #tpu.memory_space<vmem>>, vector<1x512xf32>
    %258 = vector.extract_strided_slice %257 {offsets = [0, 0], sizes = [1, 384], strides = [1, 1]} : vector<1x512xf32> to vector<1x384xf32>
    %259 = arith.truncf %255 : vector<8x128xf32> to vector<8x128xbf16>
    %cst_65 = arith.constant dense<0.000000e+00> : vector<8x384xf32>
    %260 = tpu.matmul %259, %256, %cst_65 {dimension_numbers = #tpu.dot_dimension_numbers<[1], [0], [0], [1], [0, 0, 1, 1], [], []>} : vector<8x128xbf16>, vector<128x384xbf16>, vector<8x384xf32> -> vector<8x384xf32>
    %261 = vector.broadcast %258 : vector<1x384xf32> to vector<8x384xf32>
    %262 = arith.addf %260, %261 : vector<8x384xf32>
    %263 = vector.extract_strided_slice %262 {offsets = [0, 0], sizes = [8, 128], strides = [1, 1]} : vector<8x384xf32> to vector<8x128xf32>
    %cst_66 = arith.constant 0.000000e+00 : f32
    %264 = vector.broadcast %cst_66 : f32 to vector<8x128xf32>
    %265 = arith.maximumf %263, %264 : vector<8x128xf32>
    %266 = vector.extract_strided_slice %262 {offsets = [0, 128], sizes = [8, 128], strides = [1, 1]} : vector<8x384xf32> to vector<8x128xf32>
    %267 = vector.extract_strided_slice %262 {offsets = [0, 256], sizes = [8, 128], strides = [1, 1]} : vector<8x384xf32> to vector<8x128xf32>
    %268 = arith.negf %267 : vector<8x128xf32>
    %269 = math.exp %268 : vector<8x128xf32>
    %cst_67 = arith.constant 1.000000e+00 : f32
    %270 = vector.broadcast %cst_67 : f32 to vector<8x128xf32>
    %271 = arith.addf %270, %269 : vector<8x128xf32>
    %272 = arith.divf %270, %271 : vector<8x128xf32>
    %273 = arith.mulf %272, %265 : vector<8x128xf32>
    %cst_68 = arith.constant 1.000000e+00 : f32
    %274 = vector.broadcast %cst_68 : f32 to vector<8x128xf32>
    %275 = arith.subf %274, %272 : vector<8x128xf32>
    %276 = arith.mulf %275, %266 : vector<8x128xf32>
    %277 = arith.addf %273, %276 : vector<8x128xf32>
    %c384 = arith.constant 384 : index
    %c0_69 = arith.constant 0 : index
    %278 = vector.load %arg1[%c384, %c0_69] : memref<640x384xbf16, #tpu.memory_space<vmem>>, vector<128x384xbf16>
    %c4 = arith.constant 4 : index
    %c0_70 = arith.constant 0 : index
    %279 = vector.load %arg3[%c4, %c0_70] : memref<6x512xf32, #tpu.memory_space<vmem>>, vector<1x512xf32>
    %280 = vector.extract_strided_slice %279 {offsets = [0, 0], sizes = [1, 384], strides = [1, 1]} : vector<1x512xf32> to vector<1x384xf32>
    %281 = arith.truncf %277 : vector<8x128xf32> to vector<8x128xbf16>
    %cst_71 = arith.constant dense<0.000000e+00> : vector<8x384xf32>
    %282 = tpu.matmul %281, %278, %cst_71 {dimension_numbers = #tpu.dot_dimension_numbers<[1], [0], [0], [1], [0, 0, 1, 1], [], []>} : vector<8x128xbf16>, vector<128x384xbf16>, vector<8x384xf32> -> vector<8x384xf32>
    %283 = vector.broadcast %280 : vector<1x384xf32> to vector<8x384xf32>
    %284 = arith.addf %282, %283 : vector<8x384xf32>
    %285 = vector.extract_strided_slice %284 {offsets = [0, 0], sizes = [8, 128], strides = [1, 1]} : vector<8x384xf32> to vector<8x128xf32>
    %cst_72 = arith.constant 0.000000e+00 : f32
    %286 = vector.broadcast %cst_72 : f32 to vector<8x128xf32>
    %287 = arith.maximumf %285, %286 : vector<8x128xf32>
    %288 = vector.extract_strided_slice %284 {offsets = [0, 128], sizes = [8, 128], strides = [1, 1]} : vector<8x384xf32> to vector<8x128xf32>
    %289 = vector.extract_strided_slice %284 {offsets = [0, 256], sizes = [8, 128], strides = [1, 1]} : vector<8x384xf32> to vector<8x128xf32>
    %290 = arith.negf %289 : vector<8x128xf32>
    %291 = math.exp %290 : vector<8x128xf32>
    %cst_73 = arith.constant 1.000000e+00 : f32
    %292 = vector.broadcast %cst_73 : f32 to vector<8x128xf32>
    %293 = arith.addf %292, %291 : vector<8x128xf32>
    %294 = arith.divf %292, %293 : vector<8x128xf32>
    %295 = arith.mulf %294, %287 : vector<8x128xf32>
    %cst_74 = arith.constant 1.000000e+00 : f32
    %296 = vector.broadcast %cst_74 : f32 to vector<8x128xf32>
    %297 = arith.subf %296, %294 : vector<8x128xf32>
    %298 = arith.mulf %297, %288 : vector<8x128xf32>
    %299 = arith.addf %295, %298 : vector<8x128xf32>
    %c512 = arith.constant 512 : index
    %c0_75 = arith.constant 0 : index
    %300 = vector.load %arg1[%c512, %c0_75] : memref<640x384xbf16, #tpu.memory_space<vmem>>, vector<128x384xbf16>
    %c5 = arith.constant 5 : index
    %c0_76 = arith.constant 0 : index
    %301 = vector.load %arg3[%c5, %c0_76] : memref<6x512xf32, #tpu.memory_space<vmem>>, vector<1x512xf32>
    %302 = vector.extract_strided_slice %301 {offsets = [0, 0], sizes = [1, 384], strides = [1, 1]} : vector<1x512xf32> to vector<1x384xf32>
    %303 = arith.truncf %299 : vector<8x128xf32> to vector<8x128xbf16>
    %cst_77 = arith.constant dense<0.000000e+00> : vector<8x384xf32>
    %304 = tpu.matmul %303, %300, %cst_77 {dimension_numbers = #tpu.dot_dimension_numbers<[1], [0], [0], [1], [0, 0, 1, 1], [], []>} : vector<8x128xbf16>, vector<128x384xbf16>, vector<8x384xf32> -> vector<8x384xf32>
    %305 = vector.broadcast %302 : vector<1x384xf32> to vector<8x384xf32>
    %306 = arith.addf %304, %305 : vector<8x384xf32>
    %307 = vector.extract_strided_slice %306 {offsets = [0, 0], sizes = [8, 128], strides = [1, 1]} : vector<8x384xf32> to vector<8x128xf32>
    %cst_78 = arith.constant 0.000000e+00 : f32
    %308 = vector.broadcast %cst_78 : f32 to vector<8x128xf32>
    %309 = arith.maximumf %307, %308 : vector<8x128xf32>
    %310 = vector.extract_strided_slice %306 {offsets = [0, 128], sizes = [8, 128], strides = [1, 1]} : vector<8x384xf32> to vector<8x128xf32>
    %311 = vector.extract_strided_slice %306 {offsets = [0, 256], sizes = [8, 128], strides = [1, 1]} : vector<8x384xf32> to vector<8x128xf32>
    %312 = arith.negf %311 : vector<8x128xf32>
    %313 = math.exp %312 : vector<8x128xf32>
    %cst_79 = arith.constant 1.000000e+00 : f32
    %314 = vector.broadcast %cst_79 : f32 to vector<8x128xf32>
    %315 = arith.addf %314, %313 : vector<8x128xf32>
    %316 = arith.divf %314, %315 : vector<8x128xf32>
    %317 = arith.mulf %316, %309 : vector<8x128xf32>
    %cst_80 = arith.constant 1.000000e+00 : f32
    %318 = vector.broadcast %cst_80 : f32 to vector<8x128xf32>
    %319 = arith.subf %318, %316 : vector<8x128xf32>
    %320 = arith.mulf %319, %310 : vector<8x128xf32>
    %321 = arith.addf %317, %320 : vector<8x128xf32>
    %c0_81 = arith.constant 0 : index
    %c0_82 = arith.constant 0 : index
    %322 = vector.load %arg4[%c0_81, %c0_82] : memref<8x128xf32, #tpu.memory_space<vmem>>, vector<8x128xf32>
    tpu.vector_store %arg4[%c0_81, %c0_82], %321 {strides = array<i32>} : memref<8x128xf32, #tpu.memory_space<vmem>>, vector<8x128xf32>,
    return
  }
}

</mosaic_0001>

<bundles_post_ra>
// kernel: tpu_custom_call.1
= control target key start
LH: loop header
LB: loop body
LE: loop exit
PB: predicated region body
PF: predicated region fallthrough
CT: control target
= control target key end

     0   :  { %9 = vsyncpa [#allocation4], 0  ;;  %s5526_s0 = inlined_call_operand.hbm [shape: bf16[64,128], index: 0, kind: input, shape index: {}]   ;;  %s5527_s1 = inlined_call_operand.hbm [shape: bf16[640,384], index: 1, kind: input, shape index: {}]   ;;  %s5528_s2 = inlined_call_operand.hbm [shape: bf16[256,512], index: 2, kind: input, shape index: {}]   ;;  %s5529_s3 = inlined_call_operand.hbm [shape: f32[6,512], index: 3, kind: input, shape index: {}]   ;;  %s5530_s4 = inlined_call_operand.hbm [shape: f32[8,128], index: 4, kind: output, shape index: {}]  }
   0x1   :  { %10 = vsyncpa [#allocation7], 0 }
   0x2   :  { %11 = vsyncpa [#allocation10], 0  ;;  %s30_s17 = sshll.u32 %s5527_s1, 4  ;;  %s31_s17 = int_to_ptr.hbm [resolvable:$true] %s30_s17 }
   0x3   :  { %12 = vsyncpa [#allocation5], 0  ;;  %s4599_s18 = smov [#allocation6]   ;;  %s17_s22 = sshll.u32 %s5526_s0, 4  ;;  %s18_s22 = int_to_ptr.hbm [resolvable:$true] %s17_s22 }
   0x4   :  { %s32_s19 = sshll.u32 %s4599_s18, 4  ;;  %s4600_s23 = smov 192   ;;  %s33_s19 = int_to_ptr.vmem [resolvable:$true] %s32_s19 }
   0x5   :  { %s4601_s24 = smov 12   ;;  %s4602_s25 = smov [#allocation3]  }
   0x6   :  { %38 = dma.hbm_to_vmem [thread:$0]  %s31_s17, 15360, %s33_s19, [#allocation7], %s4600_s23, %s4600_s23, %s4601_s24  }
   0x7   :  { %s19_s26 = sshll.u32 %s4602_s25, 4  ;;  %s4603_s27 = smov 64   ;;  %s20_s26 = int_to_ptr.vmem [resolvable:$true] %s19_s26 }
   0x8   :  { %s4604_s28 = smov 4   ;;  %s43_s30 = sshll.u32 %s5528_s2, 4  ;;  %s44_s30 = int_to_ptr.hbm [resolvable:$true] %s43_s30 }
   0x9   :  { %25 = dma.hbm_to_vmem [thread:$0]  %s18_s22, 512, %s20_s26, [#allocation4], %s4603_s27, %s4603_s27, %s4604_s28  }
   0xa   :  { %s4605_s5 = smov [#allocation8]   ;;  %s57_s8 = sshll.u32 %s5529_s3, 4  ;;  %s58_s8 = int_to_ptr.hbm [resolvable:$true] %s57_s8 }
   0xb   :  { %s45_s6 = sshll.u32 %s4605_s5, 4  ;;  %s4606_s9 = smov 256   ;;  %s46_s6 = int_to_ptr.vmem [resolvable:$true] %s45_s6 }
   0xc   :  { %s4607_s10 = smov 16   ;;  %s4608_s11 = smov [#allocation9]  }
   0xd   :  { %51 = dma.hbm_to_vmem [thread:$0]  %s44_s30, 8192, %s46_s6, [#allocation7], %s4606_s9, %s4606_s9, %s4607_s10  }
   0xe   :  { %s59_s12 = sshll.u32 %s4608_s11, 4  ;;  %s60_s12 = int_to_ptr.vmem [resolvable:$true] %s59_s12 }
   0xf   :  { %62 = dma.hbm_to_vmem [thread:$0]  %s58_s8, 512, %s60_s12, [#allocation10]  }
  0x10   :  { %4591 = dma.done.wait [#allocation4], 512  }
  0x11   :  { %4592 = vsyncadd [#allocation4], 4294966784 }
  0x12   :  { %4593 = dma.done.wait [#allocation7], 23552  }
  0x13   :  { %4594 = vsyncadd [#allocation7], 4294943744 }
  0x14   :  { %4595 = dma.done.wait [#allocation10], 512  }
  0x15   :  { %4596 = vsyncadd [#allocation10], 4294966784  ;;  %v3388_v0 = vld [vmem:[#allocation6 + $0xb0] sm:$0xf]  ;;  %v4099_v1 = vld [vmem:[#allocation6 + $0xb8] sm:$0xf0] }
  0x16   :  { %v3376_v2 = vld [vmem:[#allocation6 + $0x98] sm:$0xf]  ;;  %v3389_v3 = vor.u32 %v4099_v1, %v3388_v0  ;;  %v4096_v4 = vld [vmem:[#allocation6 + $0xa0] sm:$0xf0]  ;;  %v3364_v6 = vld [vmem:[#allocation6 + $0x80] sm:$0xf] }
  0x17   :  { %v3377_v5 = vor.u32 %v4096_v4, %v3376_v2  ;;  %v4093_v7 = vld [vmem:[#allocation6 + $0x88] sm:$0xf0]  ;;  %v3380_v8 = vld [vmem:[#allocation6 + $0xa8] sm:$0xf]  ;;  %v4098_v9 = vld [vmem:[#allocation6 + $0xb0] sm:$0xf0] }
  0x18   :  { %337 = vmatpush.bf16.msra.mxu2 %v3389_v3  ;;  %v4097_v10 = vld [vmem:[#allocation6 + $0xac] sm:$0xf]  ;;  %v3382_v11 = vld [vmem:[#allocation6 + $0xb4] sm:$0xf0]  ;;  %v3381_v12 = vor.u32 %v4098_v9, %v3380_v8  ;;  %v3368_v14 = vld [vmem:[#allocation6 + $0x90] sm:$0xf]  ;;  %v3365_v15 = vor.u32 %v4093_v7, %v3364_v6 }
  0x19   :  { %v3385_v13 = vor.u32 %v4097_v10, %v3382_v11  ;;  %v3352_v16 = vld [vmem:[#allocation6 + $0x68] sm:$0xf]  ;;  %v4095_v17 = vld [vmem:[#allocation6 + $0x98] sm:$0xf0]  ;;  %v4094_v18 = vld [vmem:[#allocation6 + $0x94] sm:$0xf] }
  0x1a   :  { %v4090_v19 = vld [vmem:[#allocation6 + $0x70] sm:$0xf0]  ;;  %279 = vmatpush.bf16.msra.mxu0 %v3381_v12  ;;  %v3369_v20 = vor.u32 %v4095_v17, %v3368_v14  ;;  %v3370_v21 = vld [vmem:[#allocation6 + $0x9c] sm:$0xf0]  ;;  %v3356_v22 = vld [vmem:[#allocation6 + $0x78] sm:$0xf] }
  0x1b   :  { %308 = vmatpush.bf16.msra.mxu1 %v3385_v13  ;;  %v3373_v23 = vor.u32 %v4094_v18, %v3370_v21  ;;  %v4092_v24 = vld [vmem:[#allocation6 + $0x80] sm:$0xf0]  ;;  %v4091_v25 = vld [vmem:[#allocation6 + $0x7c] sm:$0xf]  ;;  %v3358_v26 = vld [vmem:[#allocation6 + $0x84] sm:$0xf0]  ;;  %v3353_v27 = vor.u32 %v4090_v19, %v3352_v16 }
  0x1c   :  { %338 = vmatpush.bf16.msra.mxu2 %v3377_v5  ;;  %v3340_v28 = vld [vmem:[#allocation6 + $0x50] sm:$0xf]  ;;  %v4087_v29 = vld [vmem:[#allocation6 + $0x58] sm:$0xf0]  ;;  %v3357_v30 = vor.u32 %v4092_v24, %v3356_v22  ;;  %v3361_v31 = vor.u32 %v4091_v25, %v3358_v26  ;;  %v3344_v32 = vld [vmem:[#allocation6 + $0x60] sm:$0xf] }
  0x1d   :  { %v4089_v33 = vld [vmem:[#allocation6 + $0x68] sm:$0xf0]  ;;  %v4088_v34 = vld [vmem:[#allocation6 + $0x64] sm:$0xf]  ;;  %v3346_v35 = vld [vmem:[#allocation6 + $0x6c] sm:$0xf0]  ;;  %v3341_v36 = vor.u32 %v4087_v29, %v3340_v28 }
  0x1e   :  { %280 = vmatpush.bf16.msra.mxu0 %v3369_v20  ;;  %v3328_v37 = vld [vmem:[#allocation6 + $0x38] sm:$0xf]  ;;  %v4084_v38 = vld [vmem:[#allocation6 + $0x40] sm:$0xf0]  ;;  %v3345_v39 = vor.u32 %v4089_v33, %v3344_v32  ;;  %v3349_v40 = vor.u32 %v4088_v34, %v3346_v35  ;;  %v3332_v41 = vld [vmem:[#allocation6 + $0x48] sm:$0xf] }
  0x1f   :  { %309 = vmatpush.bf16.msra.mxu1 %v3373_v23  ;;  %v4086_v42 = vld [vmem:[#allocation6 + $0x50] sm:$0xf0]  ;;  %v4085_v43 = vld [vmem:[#allocation6 + $0x4c] sm:$0xf]  ;;  %v3334_v44 = vld [vmem:[#allocation6 + $0x54] sm:$0xf0]  ;;  %v3329_v45 = vor.u32 %v4084_v38, %v3328_v37 }
  0x20   :  { %339 = vmatpush.bf16.msra.mxu2 %v3365_v15  ;;  %v3316_v46 = vld [vmem:[#allocation6 + $0x20] sm:$0xf]  ;;  %v4081_v47 = vld [vmem:[#allocation6 + $0x28] sm:$0xf0]  ;;  %v3333_v48 = vor.u32 %v4086_v42, %v3332_v41  ;;  %v3337_v49 = vor.u32 %v4085_v43, %v3334_v44  ;;  %v3320_v50 = vld [vmem:[#allocation6 + $0x30] sm:$0xf] }
  0x21   :  { %v4083_v51 = vld [vmem:[#allocation6 + $0x38] sm:$0xf0]  ;;  %v4082_v52 = vld [vmem:[#allocation6 + $0x34] sm:$0xf]  ;;  %v3322_v53 = vld [vmem:[#allocation6 + $0x3c] sm:$0xf0]  ;;  %v3317_v54 = vor.u32 %v4081_v47, %v3316_v46 }
  0x22   :  { %281 = vmatpush.bf16.msra.mxu0 %v3357_v30  ;;  %v3304_v55 = vld [vmem:[#allocation6 + $0x8] sm:$0xf]  ;;  %v4078_v56 = vld [vmem:[#allocation6 + $0x10] sm:$0xf0]  ;;  %v3321_v57 = vor.u32 %v4083_v51, %v3320_v50  ;;  %v3325_v58 = vor.u32 %v4082_v52, %v3322_v53  ;;  %v3308_v59 = vld [vmem:[#allocation6 + $0x18] sm:$0xf] }
  0x23   :  { %310 = vmatpush.bf16.msra.mxu1 %v3361_v31  ;;  %v4080_v60 = vld [vmem:[#allocation6 + $0x20] sm:$0xf0]  ;;  %v4079_v61 = vld [vmem:[#allocation6 + $0x1c] sm:$0xf]  ;;  %v3310_v62 = vld [vmem:[#allocation6 + $0x24] sm:$0xf0]  ;;  %v3305_v63 = vor.u32 %v4078_v56, %v3304_v55 }
  0x24   :  { %340 = vmatpush.bf16.msra.mxu2 %v3353_v27  ;;  %v3309_v0 = vor.u32 %v4080_v60, %v3308_v59  ;;  %v3313_v1 = vor.u32 %v4079_v61, %v3310_v62  ;;  %v3296_v2 = vld [vmem:[#allocation6] sm:$0xf]  ;;  %v4077_v3 = vld [vmem:[#allocation6 + $0x8] sm:$0xf0]  ;;  %v4076_v4 = vld [vmem:[#allocation6 + $0x4] sm:$0xf] }
  0x25   :  { %v3298_v5 = vld [vmem:[#allocation6 + $0xc] sm:$0xf0]  ;;  %v4072_v6 = vld [vmem:[#allocation3] sm:$0xff]  ;;  %v3297_v7 = vor.u32 %v4077_v3, %v3296_v2  ;;  %v4073_v9 = vld [vmem:[#allocation3 + $0x8] sm:$0xff]  ;;  %s4609_s2 = smov [#allocation11]   ;;  %s3266_s15 = sshll.u32 %s5530_s4, 4  ;;  %s3267_s15 = int_to_ptr.hbm [resolvable:$true] %s3266_s15 }
  0x26   :  { %282 = vmatpush.bf16.msra.mxu0 %v3345_v39  ;;  %v3301_v8 = vor.u32 %v4076_v4, %v3298_v5  ;;  %v3492_v10 = vld [vmem:[#allocation6 + $0x170] sm:$0xf]  ;;  %v4123_v11 = vld [vmem:[#allocation6 + $0x178] sm:$0xf0]  ;;  %v3480_v12 = vld [vmem:[#allocation6 + $0x158] sm:$0xf] }
  0x27   :  { %311 = vmatpush.bf16.msra.mxu1 %v3349_v40  ;;  %v3493_v13 = vor.u32 %v4123_v11, %v3492_v10  ;;  %v4120_v14 = vld [vmem:[#allocation6 + $0x160] sm:$0xf0]  ;;  %v3468_v16 = vld [vmem:[#allocation6 + $0x140] sm:$0xf]  ;;  %v4117_v17 = vld [vmem:[#allocation6 + $0x148] sm:$0xf0] }
  0x28   :  { %341 = vmatpush.bf16.msra.mxu2 %v3341_v36  ;;  %v3481_v15 = vor.u32 %v4120_v14, %v3480_v12  ;;  %v4074_v18 = vld [vmem:[#allocation3 + $0x10] sm:$0xff]  ;;  %v3469_v19 = vor.u32 %v4117_v17, %v3468_v16  ;;  %v4075_v20 = vld [vmem:[#allocation3 + $0x18] sm:$0xff]  ;;  %v4121_v21 = vld [vmem:[#allocation6 + $0x16c] sm:$0xf]  ;;  %s3264_s3 = sshll.u32 %s4609_s2, 4  ;;  %s3265_s3 = int_to_ptr.vmem [resolvable:$true] %s3264_s3 }
  0x29   :  { %v3486_v22 = vld [vmem:[#allocation6 + $0x174] sm:$0xf0]  ;;  %v3484_v23 = vld [vmem:[#allocation6 + $0x168] sm:$0xf]  ;;  %v4114_v25 = vld [vmem:[#allocation6 + $0x130] sm:$0xf0] }
  0x2a   :  { %283 = vmatpush.bf16.msra.mxu0 %v3333_v48  ;;  %v3456_v24 = vld [vmem:[#allocation6 + $0x128] sm:$0xf]  ;;  %v3489_v26 = vor.u32 %v4121_v21, %v3486_v22  ;;  %v4122_v27 = vld [vmem:[#allocation6 + $0x170] sm:$0xf0]  ;;  %v3472_v30 = vld [vmem:[#allocation6 + $0x150] sm:$0xf] }
  0x2b   :  { %312 = vmatpush.bf16.msra.mxu1 %v3337_v49  ;;  %v3457_v28 = vor.u32 %v4114_v25, %v3456_v24  ;;  %v3485_v29 = vor.u32 %v4122_v27, %v3484_v23  ;;  %v4119_v31 = vld [vmem:[#allocation6 + $0x158] sm:$0xf0]  ;;  %v4118_v32 = vld [vmem:[#allocation6 + $0x154] sm:$0xf]  ;;  %v3474_v34 = vld [vmem:[#allocation6 + $0x15c] sm:$0xf0] }
  0x2c   :  { %342 = vmatpush.bf16.msra.mxu2 %v3329_v45  ;;  %v3473_v33 = vor.u32 %v4119_v31, %v3472_v30  ;;  %v3477_v35 = vor.u32 %v4118_v32, %v3474_v34  ;;  %v3460_v36 = vld [vmem:[#allocation6 + $0x138] sm:$0xf]  ;;  %v4116_v37 = vld [vmem:[#allocation6 + $0x140] sm:$0xf0]  ;;  %v4115_v38 = vld [vmem:[#allocation6 + $0x13c] sm:$0xf] }
  0x2d   :  { %731 = vmatpush.bf16.msra.mxu3 %v3485_v29  ;;  %v3444_v39 = vld [vmem:[#allocation6 + $0x110] sm:$0xf]  ;;  %v4111_v40 = vld [vmem:[#allocation6 + $0x118] sm:$0xf0]  ;;  %v3461_v41 = vor.u32 %v4116_v37, %v3460_v36  ;;  %v3462_v42 = vld [vmem:[#allocation6 + $0x144] sm:$0xf0] }
  0x2e   :  { %284 = vmatpush.bf16.msra.mxu0 %v3321_v57  ;;  %v3445_v43 = vor.u32 %v4111_v40, %v3444_v39  ;;  %v3465_v44 = vor.u32 %v4115_v38, %v3462_v42  ;;  %v4647_v45 = vld [vmem:[#allocation9] ss:$8 sm:$0xf]  ;;  %v4113_v47 = vld [vmem:[#allocation6 + $0x128] sm:$0xf0] }
  0x2f   :  { %313 = vmatpush.bf16.msra.mxu1 %v3325_v58  ;;  %v3448_v46 = vld [vmem:[#allocation6 + $0x120] sm:$0xf]  ;;  %v4112_v49 = vld [vmem:[#allocation6 + $0x124] sm:$0xf]  ;;  %v3450_v50 = vld [vmem:[#allocation6 + $0x12c] sm:$0xf0] }
  0x30   :  { %343 = vmatpush.bf16.msra.mxu2 %v3317_v54  ;;  %v3449_v48 = vor.u32 %v4113_v47, %v3448_v46  ;;  %v3453_v51 = vor.u32 %v4112_v49, %v3450_v50  ;;  %v4650_v52 = vperm.slane %v4647_v45, 2  ;;  %v3436_v53 = vld [vmem:[#allocation6 + $0x108] sm:$0xf]  ;;  %v4110_v54 = vld [vmem:[#allocation6 + $0x110] sm:$0xf0] }
  0x31   :  { %732 = vmatpush.bf16.msra.mxu3 %v3473_v33  ;;  %v3437_v55 = vor.u32 %v4110_v54, %v3436_v53  ;;  %v4109_v56 = vld [vmem:[#allocation6 + $0x10c] sm:$0xf]  ;;  %v3438_v57 = vld [vmem:[#allocation6 + $0x114] sm:$0xf0]  ;;  %v4108_v62 = vld [vmem:[#allocation6 + $0x100] sm:$0xf0] }
  0x32   :  { %285 = vmatpush.bf16.msra.mxu0 %v3309_v0  ;;  %v3441_v58 = vor.u32 %v4109_v56, %v3438_v57  ;;  %v3432_v61 = vld [vmem:[#allocation6 + $0xf8] sm:$0xf]  ;;  %v3424_v0 = vld [vmem:[#allocation6 + $0xf0] sm:$0xf]  ;;  %v4106_v4 = vld [vmem:[#allocation6 + $0xf4] sm:$0xf] }
  0x33   :  { %314 = vmatpush.bf16.msra.mxu1 %v3313_v1  ;;  %v4107_v1 = vld [vmem:[#allocation6 + $0xf8] sm:$0xf0]  ;;  %v3426_v5 = vld [vmem:[#allocation6 + $0xfc] sm:$0xf0]  ;;  %v3412_v10 = vld [vmem:[#allocation6 + $0xd8] sm:$0xf] }
  0x34   :  { %344 = vmatpush.bf16.msra.mxu2 %v3305_v63  ;;  %v3433_v63 = vor.u32 %v4108_v62, %v3432_v61  ;;  %v3425_v3 = vor.u32 %v4107_v1, %v3424_v0  ;;  %v4104_v11 = vld [vmem:[#allocation6 + $0xe0] sm:$0xf0]  ;;  %v4103_v12 = vld [vmem:[#allocation6 + $0xdc] sm:$0xf]  ;;  %v3414_v14 = vld [vmem:[#allocation6 + $0xe4] sm:$0xf0] }
  0x35   :  { %733 = vmatpush.bf16.msra.mxu3 %v3461_v41  ;;  %v3417_v16 = vor.u32 %v4103_v12, %v3414_v14  ;;  %v3400_v24 = vld [vmem:[#allocation6 + $0xc0] sm:$0xf]  ;;  %v4101_v25 = vld [vmem:[#allocation6 + $0xc8] sm:$0xf0]  ;;  %v3402_v29 = vld [vmem:[#allocation6 + $0xcc] sm:$0xf0] }
  0x36   :  { %286 = vmatpush.bf16.msra.mxu0 %v3297_v7  ;;  %v3420_v7 = vld [vmem:[#allocation6 + $0xe0] sm:$0xf]  ;;  %v3401_v27 = vor.u32 %v4101_v25, %v3400_v24 }
  0x37   :  { %345 = vmatmul.bf16.vlgmr.msra.gmra.mxu2 %v4072_v6  ;;  %315 = vmatpush.bf16.msra.mxu1 %v3301_v8  ;;  %v4105_v8 = vld [vmem:[#allocation6 + $0xe8] sm:$0xf0] }
  0x39   :  { %287 = vmatmul.bf16.vlgmr.msra.gmra.mxu0 %v4072_v6  ;;  %734 = vmatpush.bf16.msra.mxu3 %v3449_v48 }
  0x3a   :  { %316 = vmatmul.bf16.vlgmr.msra.gmra.mxu1 %v4072_v6  ;;  %760 = vmatpush.bf16.msrb.mxu0 %v3489_v26  ;;  %v3429_v6 = vor.u32 %v4106_v4, %v3426_v5 }
  0x3b   :  { %789 = vmatpush.bf16.msrb.mxu1 %v3493_v13  ;;  %v3413_v13 = vor.u32 %v4104_v11, %v3412_v10 }
  0x3d   :  { %735 = vmatpush.bf16.msra.mxu3 %v3437_v55  ;;  %v4660_v55 = vperm.slane %v4647_v45, 0 }
  0x3e   :  { %761 = vmatpush.bf16.msrb.mxu0 %v3477_v35 }
  0x3f   :  { %790 = vmatpush.bf16.msrb.mxu1 %v3481_v15 }
  0x41   :  { %736 = vmatpush.bf16.msra.mxu3 %v3425_v3 }
  0x42   :  { %762 = vmatpush.bf16.msrb.mxu0 %v3465_v44 }
  0x43   :  { %791 = vmatpush.bf16.msrb.mxu1 %v3469_v19  ;;  %v3408_v19 = vld [vmem:[#allocation6 + $0xc8] sm:$0xf] }
  0x45   :  { %737 = vmatpush.bf16.msra.mxu3 %v3413_v13 }
  0x46   :  { %763 = vmatpush.bf16.msrb.mxu0 %v3453_v51 }
  0x47   :  { %350 = vmatmul.bf16.gmra.mxu2 %v4073_v9  ;;  %792 = vmatpush.bf16.msrb.mxu1 %v3457_v28  ;;  %v4100_v28 = vld [vmem:[#allocation6 + $0xc4] sm:$0xf] }
  0x48   :  { %v3405_v30 = vor.u32 %v4100_v28, %v3402_v29 }
  0x49   :  { %292 = vmatmul.bf16.gmra.mxu0 %v4073_v9  ;;  %738 = vmatpush.bf16.msra.mxu3 %v3401_v27 }
  0x4a   :  { %321 = vmatmul.bf16.gmra.mxu1 %v4073_v9  ;;  %764 = vmatpush.bf16.msrb.mxu0 %v3441_v58  ;;  %v3421_v9 = vor.u32 %v4105_v8, %v3420_v7 }
  0x4b   :  { %793 = vmatpush.bf16.msrb.mxu1 %v3445_v43 }
  0x4e   :  { %765 = vmatpush.bf16.msrb.mxu0 %v3429_v6 }
  0x4f   :  { %794 = vmatpush.bf16.msrb.mxu1 %v3433_v63 }
  0x52   :  { %766 = vmatpush.bf16.msrb.mxu0 %v3417_v16 }
  0x53   :  { %795 = vmatpush.bf16.msrb.mxu1 %v3421_v9 }
  0x56   :  { %767 = vmatpush.bf16.msrb.mxu0 %v3405_v30 }
  0x57   :  { %355 = vmatmul.bf16.gmra.mxu2 %v4074_v18 }
  0x59   :  { %297 = vmatmul.bf16.gmra.mxu0 %v4074_v18 }
  0x5a   :  { %326 = vmatmul.bf16.gmra.mxu1 %v4074_v18 }
  0x67   :  { %360 = vmatmul.bf16.gmra.mxu2 %v4075_v20 }
  0x69   :  { %302 = vmatmul.bf16.gmra.mxu0 %v4075_v20 }
  0x6a   :  { %331 = vmatmul.bf16.gmra.mxu1 %v4075_v20  ;;  %v4102_v20 = vld [vmem:[#allocation6 + $0xd0] sm:$0xf0] }
  0x6b   :  { %v3409_v23 = vor.u32 %v4102_v20, %v3408_v19 }
  0x6d   :  { %796 = vmatpush.bf16.msrb.mxu1 %v3409_v23 }
  0xb6   :  { %v288_v18 = vpop.f32.mrf.mxu0 }
  0xb7   :  { %v317_v31 = vpop.f32.mrf.mxu1  ;;  %v289_v3 = vadd.f32 %v288_v18, %v4660_v55 }
  0xba   :  { %v346_v59 = vpop.f32.mrf.mxu2 }
  0xbb   :  { %v347_v60 = vadd.f32 %v346_v59, %v4650_v52 }
  0xbd   :  { %v3390_v2 = vmul.f32 -1.442695, %v347_v60  ;;  %v4665_v60 = vperm.slane %v4647_v45, 1 }
  0xbe   :  { %v290_v38 = vpop.f32.mrf.mxu0 }
  0xbf   :  { %4271 = vpow2.f32 %v3390_v2  ;;  %v319_v42 = vpop.f32.mrf.mxu1  ;;  %v291_v6 = vadd.f32 %v290_v38, %v4660_v55  ;;  %v318_v9 = vadd.f32 %v317_v31, %v4665_v60 }
  0xc0   :  { %v320_v18 = vadd.f32 %v319_v42, %v4665_v60 }
  0xc2   :  { %v348_v15 = vpop.f32.mrf.mxu2 }
  0xc3   :  { %v349_v17 = vadd.f32 %v348_v15, %v4650_v52  ;;  %v366_v15 = vmax.f32 %v289_v3, 0.0 }
  0xc5   :  { %v4272_v21 = vpop.eup %4271  ;;  %v3391_v22 = vmul.f32 -1.442695, %v349_v17  ;;  %v367_v17 = vmax.f32 %v291_v6, 0.0 }
  0xc6   :  { %v398_v26 = vadd.f32 1.0, %v4272_v21  ;;  %v4662_v57 = vpop.f32.mrf.mxu0 }
  0xc7   :  { %4273 = vpow2.f32 %v3391_v22  ;;  %v4669_v4 = vpop.f32.mrf.mxu1 }
  0xc8   :  { %4275 = vrcp.f32 %v398_v26  ;;  %v417_v48 = vand.u32 2147483648, %v398_v26  ;;  %vm411_vm1 = vweird.f32 %v398_v26  ;;  %v415_v53 = vand.u32 2147483647, %v398_v26 }
  0xca   :  { %v351_v32 = vpop.f32.mrf.mxu2  ;;  %v418_v58 = vor.u32 1.1754944e-38, %v417_v48  ;;  %vm416_vm3 = vcmp.eq.f32.partialorder %v415_v53, 8.507059e+37 }
  0xcb   :  { %v352_v33 = vadd.f32 %v351_v32, %v4650_v52 }
  0xcd   :  { %v4274_v34 = vpop.eup %4273  ;;  %v3392_v35 = vmul.f32 -1.442695, %v352_v33 }
  0xce   :  { %v4276_v36 = vpop.eup %4275  ;;  %v399_v37 = vadd.f32 1.0, %v4274_v34  ;;  %v295_v23 = vpop.f32.mrf.mxu0 }
  0xcf   :  { %4277 = vpow2.f32 %v3392_v35  ;;  %v407_v39 = vmul.f32 %v4276_v36, %v398_v26  ;;  %vm412_vm0 = vweird.f32 %v4276_v36  ;;  %v324_v38 = vpop.f32.mrf.mxu1 }
  0xd0   :  { %4279 = vrcp.f32 %v399_v37  ;;  %vm413_vm2 = vmor %vm411_vm1, %vm412_vm0  ;;  %v430_v61 = vand.u32 2147483647, %v399_v37  ;;  %v432_v62 = vand.u32 2147483648, %v399_v37  ;;  %vm426_vm5 = vweird.f32 %v399_v37 }
  0xd1   :  { %v408_v40 = vsub.f32 1.0, %v407_v39 }
  0xd2   :  { %v353_v41 = vpop.f32.mrf.mxu2  ;;  %v433_v12 = vor.u32 1.1754944e-38, %v432_v62  ;;  %vm431_vm7 = vcmp.eq.f32.partialorder %v430_v61, 8.507059e+37  ;;  %v323_v62 = vadd.f32 %v4669_v4, %v4665_v60 }
  0xd3   :  { %v409_v43 = vmul.f32 %v4276_v36, %v408_v40  ;;  %v354_v44 = vadd.f32 %v353_v41, %v4650_v52 }
  0xd5   :  { %v4278_v46 = vpop.eup %4277  ;;  %v410_v47 = vadd.f32 %v4276_v36, %v409_v43  ;;  %v3393_v49 = vmul.f32 -1.442695, %v354_v44 }
  0xd6   :  { %v4280_v50 = vpop.eup %4279  ;;  %v4656_v51 = vadd.f32 1.0, %v4278_v46  ;;  %v298_v53 = vpop.f32.mrf.mxu0 }
  0xd7   :  { %4281 = vpow2.f32 %v3393_v49  ;;  %v422_v54 = vmul.f32 %v4280_v50, %v399_v37  ;;  %v414_v56 = vsel %vm413_vm2, %v4276_v36, %v410_v47  ;;  %vm427_vm4 = vweird.f32 %v4280_v50  ;;  %v327_v6 = vpop.f32.mrf.mxu1 }
  0xd8   :  { %4283 = vrcp.f32 %v4656_v51  ;;  %v419_v0 = vsel %vm416_vm3, %v418_v58, %v414_v56  ;;  %vm428_vm6 = vmor %vm426_vm5, %vm427_vm4  ;;  %v447_v32 = vand.u32 2147483648, %v4656_v51  ;;  %vm441_vm9 = vweird.f32 %v4656_v51 }
  0xd9   :  { %v423_v59 = vsub.f32 1.0, %v422_v54  ;;  %v534_v10 = vsub.f32 1.0, %v419_v0  ;;  %v526_v28 = vmul.f32 %v419_v0, %v366_v15  ;;  %v445_v37 = vand.u32 2147483647, %v4656_v51 }
  0xda   :  { %v356_v63 = vpop.f32.mrf.mxu2  ;;  %v448_v42 = vor.u32 1.1754944e-38, %v447_v32  ;;  %v296_v56 = vadd.f32 %v295_v23, %v4660_v55 }
  0xdb   :  { %v424_v1 = vmul.f32 %v4280_v50, %v423_v59  ;;  %v357_v2 = vadd.f32 %v356_v63, %v4650_v52  ;;  %v542_v21 = vmul.f32 %v534_v10, %v318_v9  ;;  %vm446_vm11 = vcmp.eq.f32.partialorder %v445_v37, 8.507059e+37  ;;  %v4154_v37 = vld [vmem:[#allocation8 + $0xec] sm:$0xf0] }
  0xdd   :  { %v4282_v5 = vpop.eup %4281  ;;  %v425_v7 = vadd.f32 %v4280_v50, %v424_v1  ;;  %v3394_v8 = vmul.f32 -1.442695, %v357_v2  ;;  %v550_v35 = vadd.f32 %v542_v21, %v526_v28 }
  0xde   :  { %v4284_v45 = vpop.eup %4283  ;;  %v4673_v11 = vadd.f32 1.0, %v4282_v5 }
  0xdf   :  { %v429_v13 = vsel %vm428_vm6, %v4280_v50, %v425_v7  ;;  %4285 = vpow2.f32 %v3394_v8  ;;  %v437_v14 = vmul.f32 %v4284_v45, %v4656_v51  ;;  %vm442_vm8 = vweird.f32 %v4284_v45 }
  0xe0   :  { %4287 = vrcp.f32 %v4673_v11  ;;  %v434_v16 = vsel %vm431_vm7, %v433_v12, %v429_v13  ;;  %vm443_vm10 = vmor %vm441_vm9, %vm442_vm8  ;;  %v460_v44 = vand.u32 2147483647, %v4673_v11  ;;  %v462_v46 = vand.u32 2147483648, %v4673_v11 }
  0xe1   :  { %v535_v19 = vsub.f32 1.0, %v434_v16  ;;  %v438_v20 = vsub.f32 1.0, %v437_v14  ;;  %v527_v24 = vmul.f32 %v434_v16, %v367_v17  ;;  %v294_v51 = vadd.f32 %v4662_v57, %v4660_v55 }
  0xe2   :  { %v358_v22 = vpop.f32.mrf.mxu2  ;;  %vm456_vm13 = vweird.f32 %v4673_v11  ;;  %v463_v1 = vor.u32 1.1754944e-38, %v462_v46  ;;  %vm461_vm15 = vcmp.eq.f32.partialorder %v460_v44, 8.507059e+37  ;;  %v369_v7 = vmax.f32 %v296_v56, 0.0 }
  0xe3   :  { %v543_v25 = vmul.f32 %v535_v19, %v320_v18  ;;  %v439_v26 = vmul.f32 %v4284_v45, %v438_v20  ;;  %v359_v27 = vadd.f32 %v358_v22, %v4650_v52  ;;  %v368_v3 = vmax.f32 %v294_v51, 0.0 }
  0xe4   :  { %v325_v8 = vadd.f32 %v324_v38, %v4665_v60 }
  0xe5   :  { %v4286_v29 = vpop.eup %4285  ;;  %v551_v30 = vadd.f32 %v543_v25, %v527_v24  ;;  %v440_v31 = vadd.f32 %v4284_v45, %v439_v26  ;;  %v3395_v33 = vmul.f32 -1.442695, %v359_v27  ;;  %v300_v25 = vpop.f32.mrf.mxu0  ;;  %v299_v27 = vadd.f32 %v298_v53, %v4660_v55 }
  0xe6   :  { %v4288_v34 = vpop.eup %4287  ;;  %v4680_v36 = vadd.f32 1.0, %v4286_v29  ;;  %v301_v46 = vadd.f32 %v300_v25, %v4660_v55 }
  0xe7   :  { %4289 = vpow2.f32 %v3395_v33  ;;  %v452_v39 = vmul.f32 %v4288_v34, %v4673_v11  ;;  %v444_v40 = vsel %vm443_vm10, %v4284_v45, %v440_v31  ;;  %v558_v41 = vpack.c.bf16 %v551_v30, %v550_v35  ;;  %v329_v33 = vpop.f32.mrf.mxu1 }
  0xe8   :  { %4291 = vrcp.f32 %v4680_v36  ;;  %v449_v48 = vsel %vm446_vm11, %v448_v42, %v444_v40  ;;  %vm457_vm12 = vweird.f32 %v4288_v34  ;;  %vm471_vm1 = vweird.f32 %v4680_v36  ;;  %v4150_v42 = vld [vmem:[#allocation8 + $0xcc] sm:$0xf0] }
  0xe9   :  { %v453_v43 = vsub.f32 1.0, %v452_v39  ;;  %739 = vmatmul.bf16.vlgmr.msra.gmra.mxu3 %v558_v41  ;;  %768 = vmatmul.bf16.vlgmr.msrb.gmra.mxu0 %v558_v41  ;;  %v536_v63 = vsub.f32 1.0, %v449_v48  ;;  %vm458_vm14 = vmor %vm456_vm13, %vm457_vm12  ;;  %v528_v15 = vmul.f32 %v449_v48, %v368_v3  ;;  %v477_v16 = vand.u32 2147483648, %v4680_v36  ;;  %v3624_v48 = vld [vmem:[#allocation8 + $0xe8] sm:$0xf] }
  0xea   :  { %v361_v47 = vpop.f32.mrf.mxu2  ;;  %797 = vmatmul.bf16.vlgmr.msrb.gmra.mxu1 %v558_v41  ;;  %v475_v20 = vand.u32 2147483647, %v4680_v36  ;;  %v370_v38 = vmax.f32 %v299_v27, 0.0  ;;  %v328_v39 = vadd.f32 %v327_v6, %v4665_v60  ;;  %v3600_v41 = vld [vmem:[#allocation8 + $0xc0] sm:$0xf] }
  0xeb   :  { %v454_v49 = vmul.f32 %v4288_v34, %v453_v43  ;;  %v362_v50 = vadd.f32 %v361_v47, %v4650_v52  ;;  %v544_v9 = vmul.f32 %v536_v63, %v323_v62  ;;  %v478_v28 = vor.u32 1.1754944e-38, %v477_v16  ;;  %v4146_v62 = vld [vmem:[#allocation8 + $0xac] sm:$0xf0] }
  0xec   :  { %vm476_vm3 = vcmp.eq.f32.partialorder %v475_v20, 8.507059e+37 }
  0xed   :  { %v4290_v54 = vpop.eup %4289  ;;  %v455_v58 = vadd.f32 %v4288_v34, %v454_v49  ;;  %v3396_v59 = vmul.f32 -1.442695, %v362_v50  ;;  %v552_v23 = vadd.f32 %v544_v9, %v528_v15  ;;  %v4155_v49 = vld [vmem:[#allocation8 + $0xf4] sm:$0xf0] }
  0xee   :  { %v4292_v61 = vpop.eup %4291  ;;  %v4695_v0 = vadd.f32 1.0, %v4290_v54  ;;  %v3601_v54 = vor.u32 %v4150_v42, %v3600_v41  ;;  %v3625_v56 = vor.u32 %v4155_v49, %v3624_v48  ;;  %v3618_v49 = vld [vmem:[#allocation8 + $0xf0] sm:$0xf0] }
  0xef   :  { %v459_v2 = vsel %vm458_vm14, %v4288_v34, %v455_v58  ;;  %4293 = vpow2.f32 %v3396_v59  ;;  %v467_v57 = vmul.f32 %v4292_v61, %v4680_v36  ;;  %vm472_vm0 = vweird.f32 %v4292_v61  ;;  %v3616_v36 = vld [vmem:[#allocation8 + $0xe0] sm:$0xf] }
  0xf0   :  { %4295 = vrcp.f32 %v4695_v0  ;;  %v464_v5 = vsel %vm461_vm15, %v463_v1, %v459_v2  ;;  %vm473_vm2 = vmor %vm471_vm1, %vm472_vm0  ;;  %v492_v32 = vand.u32 2147483648, %v4695_v0  ;;  %v490_v35 = vand.u32 2147483647, %v4695_v0  ;;  %v303_v1 = vpop.f32.mrf.mxu0  ;;  %1307 = vmatpush.bf16.msra.mxu0 %v3625_v56  ;;  %v3610_v56 = vld [vmem:[#allocation8 + $0xd8] sm:$0xf0] }
  0xf1   :  { %v537_v45 = vsub.f32 1.0, %v464_v5  ;;  %v468_v4 = vsub.f32 1.0, %v467_v57  ;;  %v529_v11 = vmul.f32 %v464_v5, %v369_v7  ;;  %v3617_v40 = vor.u32 %v4154_v37, %v3616_v36 }
  0xf2   :  { %v363_v10 = vpop.f32.mrf.mxu2  ;;  %vm486_vm5 = vweird.f32 %v4695_v0  ;;  %v493_v53 = vor.u32 1.1754944e-38, %v492_v32  ;;  %vm491_vm7 = vcmp.eq.f32.partialorder %v490_v35, 8.507059e+37  ;;  %v371_v57 = vmax.f32 %v301_v46, 0.0  ;;  %v3626_v46 = vld [vmem:[#allocation8 + $0xf8] sm:$0xf0] }
  0xf3   :  { %v545_v12 = vmul.f32 %v537_v45, %v325_v8  ;;  %v469_v13 = vmul.f32 %v4292_v61, %v468_v4  ;;  %v364_v14 = vadd.f32 %v363_v10, %v4650_v52  ;;  %1249 = vmatpush.bf16.msrb.mxu2 %v3617_v40  ;;  %v332_v10 = vpop.f32.mrf.mxu1  ;;  %v304_v25 = vadd.f32 %v303_v1, %v4660_v55 }
  0xf5   :  { %v4294_v17 = vpop.eup %4293  ;;  %v553_v18 = vadd.f32 %v545_v12, %v529_v11  ;;  %v470_v19 = vadd.f32 %v4292_v61, %v469_v13  ;;  %v3397_v21 = vmul.f32 -1.442695, %v364_v14  ;;  %v372_v32 = vmax.f32 %v304_v25, 0.0  ;;  %v4139_v25 = vld [vmem:[#allocation8 + $0x74] sm:$0xf0] }
  0xf6   :  { %v4296_v22 = vpop.eup %4295  ;;  %v4704_v24 = vadd.f32 1.0, %v4294_v17 }
  0xf7   :  { %v474_v26 = vsel %vm473_vm2, %v4292_v61, %v470_v19  ;;  %4297 = vpow2.f32 %v3397_v21  ;;  %v482_v52 = vmul.f32 %v4296_v22, %v4695_v0  ;;  %v559_v29 = vpack.c.bf16 %v553_v18, %v552_v23  ;;  %v3584_v61 = vld [vmem:[#allocation8 + $0xa0] sm:$0xf]  ;;  %1250 = vmatpush.bf16.msrb.mxu2 %v3601_v54 }
  0xf8   :  { %4299 = vrcp.f32 %v4704_v24  ;;  %v479_v31 = vsel %vm476_vm3, %v478_v28, %v474_v26  ;;  %vm487_vm4 = vweird.f32 %v4296_v22  ;;  %v330_v0 = vadd.f32 %v329_v33, %v4665_v60 }
  0xf9   :  { %v483_v30 = vsub.f32 1.0, %v482_v52  ;;  %744 = vmatmul.bf16.gmra.mxu3 %v559_v29  ;;  %773 = vmatmul.bf16.gmra.mxu0 %v559_v29  ;;  %v538_v44 = vsub.f32 1.0, %v479_v31  ;;  %vm488_vm6 = vmor %vm486_vm5, %vm487_vm4  ;;  %v530_v6 = vmul.f32 %v479_v31, %v370_v38  ;;  %v3585_v7 = vor.u32 %v4146_v62, %v3584_v61 }
  0xfa   :  { %802 = vmatmul.bf16.gmra.mxu1 %v559_v29  ;;  %vm501_vm9 = vweird.f32 %v4704_v24  ;;  %v507_v9 = vand.u32 2147483648, %v4704_v24  ;;  %v505_v14 = vand.u32 2147483647, %v4704_v24  ;;  %v333_v52 = vadd.f32 %v332_v10, %v4665_v60  ;;  %v3576_v10 = vld [vmem:[#allocation8 + $0x88] sm:$0xf] }
  0xfb   :  { %v484_v34 = vmul.f32 %v4296_v22, %v483_v30  ;;  %v546_v2 = vmul.f32 %v538_v44, %v328_v39  ;;  %1251 = vmatpush.bf16.msrb.mxu2 %v3585_v7  ;;  %v334_v31 = vpop.f32.mrf.mxu1  ;;  %v4153_v44 = vld [vmem:[#allocation8 + $0xec] sm:$0xf]  ;;  %v4732_v7 = vld [vmem:[#allocation9 + $0x1] ss:$8 sm:$0xf] }
  0xfc   :  { %v508_v19 = vor.u32 1.1754944e-38, %v507_v9  ;;  %vm506_vm11 = vcmp.eq.f32.partialorder %v505_v14, 8.507059e+37  ;;  %v335_v37 = vadd.f32 %v334_v31, %v4665_v60  ;;  %v3629_v48 = vor.u32 %v4153_v44, %v3626_v46  ;;  %v4149_v60 = vld [vmem:[#allocation8 + $0xcc] sm:$0xf]  ;;  %v3570_v14 = vld [vmem:[#allocation8 + $0x90] sm:$0xf0] }
  0xfd   :  { %v4298_v43 = vpop.eup %4297  ;;  %v485_v47 = vadd.f32 %v4296_v22, %v484_v34  ;;  %v554_v11 = vadd.f32 %v546_v2, %v530_v6  ;;  %v3613_v61 = vor.u32 %v4149_v60, %v3610_v56  ;;  %v4144_v2 = vld [vmem:[#allocation8 + $0xa4] sm:$0xf]  ;;  %v3594_v6 = vld [vmem:[#allocation8 + $0xb8] sm:$0xf0]  ;;  %v3520_v46 = vld [vmem:[#allocation8 + $0x20] sm:$0xf] }
  0xfe   :  { %v4300_v50 = vpop.eup %4299  ;;  %v4715_v51 = vadd.f32 1.0, %v4298_v43  ;;  %1336 = vmatpush.bf16.msra.mxu1 %v3629_v48  ;;  %v4128_v48 = vld [vmem:[#allocation8 + $0x24] sm:$0xf] }
  0xff   :  { %v489_v58 = vsel %vm488_vm6, %v4296_v22, %v485_v47  ;;  %v497_v59 = vmul.f32 %v4300_v50, %v4704_v24  ;;  %vm502_vm8 = vweird.f32 %v4300_v50  ;;  %v305_v22 = vpop.f32.mrf.mxu0  ;;  %v4152_v47 = vld [vmem:[#allocation8 + $0xe4] sm:$0xf] }
 0x100   :  { %4301 = vrcp.f32 %v4715_v51  ;;  %v494_v63 = vsel %vm491_vm7, %v493_v53, %v489_v58  ;;  %vm503_vm10 = vmor %vm501_vm9, %vm502_vm8  ;;  %v522_v23 = vand.u32 2147483648, %v4715_v51  ;;  %v520_v24 = vand.u32 2147483647, %v4715_v51  ;;  %v4151_v53 = vld [vmem:[#allocation8 + $0xd4] sm:$0xf0] }
 0x101   :  { %v539_v3 = vsub.f32 1.0, %v494_v63  ;;  %v498_v5 = vsub.f32 1.0, %v497_v59  ;;  %v531_v8 = vmul.f32 %v494_v63, %v371_v57  ;;  %v306_v28 = vadd.f32 %v305_v22, %v4660_v55  ;;  %v4148_v58 = vld [vmem:[#allocation8 + $0xc4] sm:$0xf]  ;;  %v3602_v59 = vld [vmem:[#allocation8 + $0xd0] sm:$0xf0] }
 0x102   :  { %vm516_vm13 = vweird.f32 %v4715_v51  ;;  %v523_v30 = vor.u32 1.1754944e-38, %v522_v23  ;;  %vm521_vm15 = vcmp.eq.f32.partialorder %v520_v24, 8.507059e+37  ;;  %v3605_v62 = vor.u32 %v4148_v58, %v3602_v59  ;;  %v3592_v63 = vld [vmem:[#allocation8 + $0xa8] sm:$0xf]  ;;  %1337 = vmatpush.bf16.msra.mxu1 %v3613_v61  ;;  %v3586_v57 = vld [vmem:[#allocation8 + $0xb0] sm:$0xf0] }
 0x103   :  { %v547_v45 = vmul.f32 %v539_v3, %v330_v0  ;;  %v499_v4 = vmul.f32 %v4300_v50, %v498_v5  ;;  %v373_v36 = vmax.f32 %v306_v28, 0.0  ;;  %v4147_v0 = vld [vmem:[#allocation8 + $0xb4] sm:$0xf0]  ;;  %v4145_v3 = vld [vmem:[#allocation8 + $0xac] sm:$0xf]  ;;  %v3589_v5 = vor.u32 %v4144_v2, %v3586_v57 }
 0x104   :  { %v3593_v1 = vor.u32 %v4147_v0, %v3592_v63  ;;  %v3560_v23 = vld [vmem:[#allocation8 + $0x68] sm:$0xf]  ;;  %v3562_v28 = vld [vmem:[#allocation8 + $0x78] sm:$0xf0]  ;;  %v4129_v58 = vld [vmem:[#allocation8 + $0x2c] sm:$0xf] }
 0x105   :  { %v555_v12 = vadd.f32 %v547_v45, %v531_v8  ;;  %v500_v13 = vadd.f32 %v4300_v50, %v499_v4  ;;  %v3597_v8 = vor.u32 %v4145_v3, %v3594_v6  ;;  %v3568_v45 = vld [vmem:[#allocation8 + $0x80] sm:$0xf]  ;;  %v4142_v4 = vld [vmem:[#allocation8 + $0x8c] sm:$0xf0]  ;;  %v3561_v24 = vor.u32 %v4139_v25, %v3560_v23  ;;  %v3530_v59 = vld [vmem:[#allocation8 + $0x38] sm:$0xf0] }
 0x106   :  { %v4302_v15 = vpop.eup %4301  ;;  %v3569_v9 = vor.u32 %v4142_v4, %v3568_v45  ;;  %v3504_v0 = vld [vmem:[#allocation8] sm:$0xf]  ;;  %v4124_v2 = vld [vmem:[#allocation8 + $0x4] sm:$0xf]  ;;  %v3506_v6 = vld [vmem:[#allocation8 + $0x10] sm:$0xf0] }
 0x107   :  { %v504_v16 = vsel %vm503_vm10, %v4300_v50, %v500_v13  ;;  %v512_v17 = vmul.f32 %v4302_v15, %v4715_v51  ;;  %v560_v18 = vpack.c.bf16 %v555_v12, %v554_v11  ;;  %vm517_vm12 = vweird.f32 %v4302_v15  ;;  %v3608_v51 = vld [vmem:[#allocation8 + $0xc8] sm:$0xf]  ;;  %v4143_v11 = vld [vmem:[#allocation8 + $0x94] sm:$0xf0]  ;;  %1338 = vmatpush.bf16.msra.mxu1 %v3597_v8  ;;  %v4140_v12 = vld [vmem:[#allocation8 + $0x84] sm:$0xf] }
 0x108   :  { %v509_v21 = vsel %vm506_vm11, %v508_v19, %v504_v16  ;;  %vm518_vm14 = vmor %vm516_vm13, %vm517_vm12  ;;  %v3621_v50 = vor.u32 %v4152_v47, %v3618_v49  ;;  %v3609_v54 = vor.u32 %v4151_v53, %v3608_v51  ;;  %v3577_v13 = vor.u32 %v4143_v11, %v3576_v10  ;;  %v3578_v16 = vld [vmem:[#allocation8 + $0x98] sm:$0xf0]  ;;  %1252 = vmatpush.bf16.msrb.mxu2 %v3569_v9  ;;  %v4130_v47 = vld [vmem:[#allocation8 + $0x2c] sm:$0xf0] }
 0x109   :  { %v513_v20 = vsub.f32 1.0, %v512_v17  ;;  %749 = vmatmul.bf16.gmra.mxu3 %v560_v18  ;;  %778 = vmatmul.bf16.gmra.mxu0 %v560_v18  ;;  %v540_v27 = vsub.f32 1.0, %v509_v21  ;;  %v532_v39 = vmul.f32 %v509_v21, %v372_v32  ;;  %v3573_v17 = vor.u32 %v4140_v12, %v3570_v14  ;;  %v4138_v21 = vld [vmem:[#allocation8 + $0x6c] sm:$0xf0]  ;;  %v3528_v51 = vld [vmem:[#allocation8 + $0x28] sm:$0xf] }
 0x10a   :  { %807 = vmatmul.bf16.gmra.mxu1 %v560_v18  ;;  %1278 = vmatpush.bf16.msrb.mxu3 %v3621_v50  ;;  %v4735_v19 = vperm.slane %v4732_v7, 2  ;;  %v3521_v49 = vor.u32 %v4130_v47, %v3520_v46  ;;  %v3522_v50 = vld [vmem:[#allocation8 + $0x30] sm:$0xf0]  ;;  %v4131_v53 = vld [vmem:[#allocation8 + $0x34] sm:$0xf0]  ;;  %v3509_v4 = vor.u32 %v4124_v2, %v3506_v6  ;;  %v4761_v47 = vperm.slane %v4732_v7, 1 }
 0x10b   :  { %v514_v26 = vmul.f32 %v4302_v15, %v513_v20  ;;  %v548_v35 = vmul.f32 %v540_v27, %v333_v52  ;;  %1308 = vmatpush.bf16.msra.mxu0 %v3609_v54  ;;  %v3552_v20 = vld [vmem:[#allocation8 + $0x60] sm:$0xf]  ;;  %v3554_v52 = vld [vmem:[#allocation8 + $0x70] sm:$0xf0]  ;;  %v4137_v27 = vld [vmem:[#allocation8 + $0x6c] sm:$0xf]  ;;  %v3525_v54 = vor.u32 %v4128_v48, %v3522_v50  ;;  %v3529_v56 = vor.u32 %v4131_v53, %v3528_v51 }
 0x10c   :  { %v3553_v22 = vor.u32 %v4138_v21, %v3552_v20  ;;  %v3565_v31 = vor.u32 %v4137_v27, %v3562_v28  ;;  %v3512_v8 = vld [vmem:[#allocation8 + $0x8] sm:$0xf]  ;;  %v4127_v9 = vld [vmem:[#allocation8 + $0x14] sm:$0xf0]  ;;  %v4125_v10 = vld [vmem:[#allocation8 + $0xc] sm:$0xf] }
 0x10d   :  { %v515_v29 = vadd.f32 %v4302_v15, %v514_v26  ;;  %v556_v42 = vadd.f32 %v548_v35, %v532_v39  ;;  %v4136_v26 = vld [vmem:[#allocation8 + $0x64] sm:$0xf]  ;;  %v3544_v39 = vld [vmem:[#allocation8 + $0x48] sm:$0xf]  ;;  %v3513_v11 = vor.u32 %v4127_v9, %v3512_v8  ;;  %v3514_v12 = vld [vmem:[#allocation8 + $0x18] sm:$0xf0] }
 0x10e   :  { %1279 = vmatpush.bf16.msrb.mxu3 %v3605_v62  ;;  %1253 = vmatpush.bf16.msrb.mxu2 %v3553_v22  ;;  %v4132_v35 = vld [vmem:[#allocation8 + $0x44] sm:$0xf]  ;;  %v3533_v62 = vor.u32 %v4129_v58, %v3530_v59  ;;  %v3517_v14 = vor.u32 %v4125_v10, %v3514_v12 }
 0x10f   :  { %v519_v33 = vsel %vm518_vm14, %v4302_v15, %v515_v29  ;;  %1309 = vmatpush.bf16.msra.mxu0 %v3593_v1  ;;  %v4141_v15 = vld [vmem:[#allocation8 + $0x8c] sm:$0xf]  ;;  %v4126_v1 = vld [vmem:[#allocation8 + $0xc] sm:$0xf0] }
 0x110   :  { %v524_v34 = vsel %vm521_vm15, %v523_v30, %v519_v33  ;;  %v3581_v18 = vor.u32 %v4141_v15, %v3578_v16  ;;  %v3557_v30 = vor.u32 %v4136_v26, %v3554_v52  ;;  %v3536_v33 = vld [vmem:[#allocation8 + $0x40] sm:$0xf] }
 0x111   :  { %v541_v38 = vsub.f32 1.0, %v524_v34  ;;  %v533_v40 = vmul.f32 %v524_v34, %v373_v36  ;;  %v4134_v34 = vld [vmem:[#allocation8 + $0x4c] sm:$0xf0] }
 0x112   :  { %1280 = vmatpush.bf16.msrb.mxu3 %v3589_v5  ;;  %1339 = vmatpush.bf16.msra.mxu1 %v3581_v18  ;;  %v3505_v5 = vor.u32 %v4126_v1, %v3504_v0 }
 0x113   :  { %v549_v41 = vmul.f32 %v541_v38, %v335_v37  ;;  %1310 = vmatpush.bf16.msra.mxu0 %v3577_v13  ;;  %v3537_v37 = vor.u32 %v4134_v34, %v3536_v33  ;;  %v3538_v38 = vld [vmem:[#allocation8 + $0x50] sm:$0xf0] }
 0x115   :  { %v557_v55 = vadd.f32 %v549_v41, %v533_v40  ;;  %v3541_v40 = vor.u32 %v4132_v35, %v3538_v38  ;;  %v4135_v41 = vld [vmem:[#allocation8 + $0x54] sm:$0xf0]  ;;  %1254 = vmatpush.bf16.msrb.mxu2 %v3537_v37 }
 0x116   :  { %1281 = vmatpush.bf16.msrb.mxu3 %v3573_v17  ;;  %1340 = vmatpush.bf16.msra.mxu1 %v3565_v31 }
 0x117   :  { %v561_v43 = vpack.c.bf16 %v557_v55, %v556_v42  ;;  %1311 = vmatpush.bf16.msra.mxu0 %v3561_v24  ;;  %v4133_v42 = vld [vmem:[#allocation8 + $0x4c] sm:$0xf]  ;;  %v3546_v55 = vld [vmem:[#allocation8 + $0x58] sm:$0xf0] }
 0x118   :  { %v3549_v44 = vor.u32 %v4133_v42, %v3546_v55 }
 0x119   :  { %754 = vmatmul.bf16.gmra.mxu3 %v561_v43  ;;  %783 = vmatmul.bf16.gmra.mxu0 %v561_v43 }
 0x11a   :  { %812 = vmatmul.bf16.gmra.mxu1 %v561_v43  ;;  %1282 = vmatpush.bf16.msrb.mxu3 %v3557_v30  ;;  %v3545_v43 = vor.u32 %v4135_v41, %v3544_v39  ;;  %v4755_v39 = vperm.slane %v4732_v7, 0 }
 0x11b   :  { %1341 = vmatpush.bf16.msra.mxu1 %v3549_v44  ;;  %1255 = vmatpush.bf16.msrb.mxu2 %v3521_v49 }
 0x11c   :  { %1312 = vmatpush.bf16.msra.mxu0 %v3545_v43 }
 0x11e   :  { %1283 = vmatpush.bf16.msrb.mxu3 %v3541_v40 }
 0x11f   :  { %1342 = vmatpush.bf16.msra.mxu1 %v3533_v62  ;;  %1256 = vmatpush.bf16.msrb.mxu2 %v3505_v5 }
 0x120   :  { %1313 = vmatpush.bf16.msra.mxu0 %v3529_v56 }
 0x122   :  { %1284 = vmatpush.bf16.msrb.mxu3 %v3525_v54 }
 0x123   :  { %1343 = vmatpush.bf16.msra.mxu1 %v3517_v14 }
 0x124   :  { %1314 = vmatpush.bf16.msra.mxu0 %v3513_v11 }
 0x126   :  { %1285 = vmatpush.bf16.msrb.mxu3 %v3509_v4 }
 0x166   :  { %v4741_v13 = vpop.f32.mrf.mxu0 }
 0x167   :  { %v798_v29 = vpop.f32.mrf.mxu1 }
 0x168   :  { %v799_v32 = vadd.f32 %v798_v29, %v4735_v19 }
 0x16a   :  { %v3494_v36 = vmul.f32 -1.442695, %v799_v32 }
 0x16c   :  { %4303 = vpow2.f32 %v3494_v36  ;;  %v4739_v63 = vpop.f32.mrf.mxu3 }
 0x16d   :  { %v741_v54 = vadd.f32 %v4739_v63, %v4755_v39  ;;  %v770_v63 = vadd.f32 %v4741_v13, %v4761_v47 }
 0x16e   :  { %v771_v26 = vpop.f32.mrf.mxu0 }
 0x16f   :  { %v800_v60 = vpop.f32.mrf.mxu1  ;;  %v772_v1 = vadd.f32 %v771_v26, %v4761_v47  ;;  %v818_v8 = vmax.f32 %v741_v54, 0.0 }
 0x170   :  { %v801_v61 = vadd.f32 %v800_v60, %v4735_v19 }
 0x172   :  { %v4304_v57 = vpop.eup %4303  ;;  %v3495_v3 = vmul.f32 -1.442695, %v801_v61 }
 0x173   :  { %v850_v45 = vadd.f32 1.0, %v4304_v57 }
 0x174   :  { %4305 = vpow2.f32 %v3495_v3  ;;  %v742_v22 = vpop.f32.mrf.mxu3 }
 0x175   :  { %4307 = vrcp.f32 %v850_v45  ;;  %v869_v32 = vand.u32 2147483648, %v850_v45  ;;  %vm863_vm1 = vweird.f32 %v850_v45  ;;  %v867_v35 = vand.u32 2147483647, %v850_v45 }
 0x176   :  { %v4763_v48 = vpop.f32.mrf.mxu0  ;;  %v743_v56 = vadd.f32 %v742_v22, %v4755_v39 }
 0x177   :  { %v803_v15 = vpop.f32.mrf.mxu1  ;;  %v870_v41 = vor.u32 1.1754944e-38, %v869_v32  ;;  %vm868_vm4 = vcmp.eq.f32.partialorder %v867_v35, 8.507059e+37 }
 0x178   :  { %v804_v16 = vadd.f32 %v803_v15, %v4735_v19  ;;  %v819_v3 = vmax.f32 %v743_v56, 0.0 }
 0x17a   :  { %v4306_v17 = vpop.eup %4305  ;;  %v3496_v18 = vmul.f32 -1.442695, %v804_v16 }
 0x17b   :  { %v4308_v20 = vpop.eup %4307  ;;  %v851_v21 = vadd.f32 1.0, %v4306_v17 }
 0x17c   :  { %v859_v23 = vmul.f32 %v4308_v20, %v850_v45  ;;  %4309 = vpow2.f32 %v3496_v18  ;;  %vm864_vm0 = vweird.f32 %v4308_v20  ;;  %v4748_v36 = vpop.f32.mrf.mxu3 }
 0x17d   :  { %4311 = vrcp.f32 %v851_v21  ;;  %vm4750_vm2 = vmor %vm863_vm1, %vm864_vm0  ;;  %v884_v42 = vand.u32 2147483648, %v851_v21  ;;  %v882_v44 = vand.u32 2147483647, %v851_v21  ;;  %vm878_vm5 = vweird.f32 %v851_v21 }
 0x17e   :  { %v860_v25 = vsub.f32 1.0, %v859_v23  ;;  %v776_v13 = vpop.f32.mrf.mxu0 }
 0x17f   :  { %v805_v24 = vpop.f32.mrf.mxu1  ;;  %v885_v58 = vor.u32 1.1754944e-38, %v884_v42  ;;  %vm883_vm7 = vcmp.eq.f32.partialorder %v882_v44, 8.507059e+37 }
 0x180   :  { %v861_v52 = vmul.f32 %v4308_v20, %v860_v25  ;;  %v806_v27 = vadd.f32 %v805_v24, %v4735_v19 }
 0x182   :  { %v4310_v28 = vpop.eup %4309  ;;  %v3497_v29 = vmul.f32 -1.442695, %v806_v27  ;;  %v862_v31 = vadd.f32 %v4308_v20, %v861_v52 }
 0x183   :  { %v4312_v30 = vpop.eup %4311  ;;  %v4745_v33 = vadd.f32 1.0, %v4310_v28 }
 0x184   :  { %v874_v34 = vmul.f32 %v4312_v30, %v851_v21  ;;  %4313 = vpow2.f32 %v3497_v29  ;;  %v866_v40 = vsel %vm4750_vm2, %v4308_v20, %v862_v31  ;;  %vm879_vm3 = vweird.f32 %v4312_v30  ;;  %v747_v5 = vpop.f32.mrf.mxu3 }
 0x185   :  { %4315 = vrcp.f32 %v4745_v33  ;;  %v871_v50 = vsel %vm868_vm4, %v870_v41, %v866_v40  ;;  %vm880_vm6 = vmor %vm878_vm5, %vm879_vm3  ;;  %v899_v15 = vand.u32 2147483648, %v4745_v33  ;;  %vm893_vm9 = vweird.f32 %v4745_v33 }
 0x186   :  { %v875_v38 = vsub.f32 1.0, %v874_v34  ;;  %v986_v62 = vsub.f32 1.0, %v871_v50  ;;  %v978_v14 = vmul.f32 %v871_v50, %v818_v8  ;;  %v897_v25 = vand.u32 2147483647, %v4745_v33 }
 0x187   :  { %v808_v55 = vpop.f32.mrf.mxu1  ;;  %v900_v27 = vor.u32 1.1754944e-38, %v899_v15  ;;  %v748_v42 = vadd.f32 %v747_v5, %v4755_v39 }
 0x188   :  { %v876_v43 = vmul.f32 %v4312_v30, %v875_v38  ;;  %v809_v46 = vadd.f32 %v808_v55, %v4735_v19  ;;  %v994_v10 = vmul.f32 %v986_v62, %v770_v63  ;;  %vm898_vm12 = vcmp.eq.f32.partialorder %v897_v25, 8.507059e+37 }
 0x18a   :  { %v4314_v49 = vpop.eup %4313  ;;  %v877_v51 = vadd.f32 %v4312_v30, %v876_v43  ;;  %v3498_v53 = vmul.f32 -1.442695, %v809_v46  ;;  %v1002_v23 = vadd.f32 %v994_v10, %v978_v14 }
 0x18b   :  { %v4316_v60 = vpop.eup %4315  ;;  %v4768_v59 = vadd.f32 1.0, %v4314_v49  ;;  %v746_v49 = vadd.f32 %v4748_v36, %v4755_v39 }
 0x18c   :  { %v881_v7 = vsel %vm880_vm6, %v4312_v30, %v877_v51  ;;  %v889_v61 = vmul.f32 %v4316_v60, %v4745_v33  ;;  %4317 = vpow2.f32 %v3498_v53  ;;  %vm894_vm8 = vweird.f32 %v4316_v60  ;;  %v4792_v34 = vpop.f32.mrf.mxu3  ;;  %v779_v53 = vpop.f32.mrf.mxu0 }
 0x18d   :  { %v886_v0 = vsel %vm883_vm7, %v885_v58, %v881_v7  ;;  %4319 = vrcp.f32 %v4768_v59  ;;  %vm4783_vm10 = vmor %vm893_vm9, %vm894_vm8  ;;  %v914_v28 = vand.u32 2147483648, %v4768_v59  ;;  %v912_v32 = vand.u32 2147483647, %v4768_v59 }
 0x18e   :  { %v987_v2 = vsub.f32 1.0, %v886_v0  ;;  %v890_v57 = vsub.f32 1.0, %v889_v61  ;;  %v979_v11 = vmul.f32 %v886_v0, %v819_v3  ;;  %vm908_vm13 = vweird.f32 %v4768_v59 }
 0x18f   :  { %v810_v6 = vpop.f32.mrf.mxu1  ;;  %v915_v55 = vor.u32 1.1754944e-38, %v914_v28  ;;  %vm913_vm15 = vcmp.eq.f32.partialorder %v912_v32, 8.507059e+37  ;;  %v775_v58 = vadd.f32 %v4763_v48, %v4761_v47  ;;  %v751_v26 = vadd.f32 %v4792_v34, %v4755_v39 }
 0x190   :  { %v995_v45 = vmul.f32 %v987_v2, %v772_v1  ;;  %v891_v4 = vmul.f32 %v4316_v60, %v890_v57  ;;  %v811_v9 = vadd.f32 %v810_v6, %v4735_v19  ;;  %v820_v1 = vmax.f32 %v746_v49, 0.0 }
 0x192   :  { %v4318_v12 = vpop.eup %4317  ;;  %v3499_v16 = vmul.f32 -1.442695, %v811_v9  ;;  %v1003_v18 = vadd.f32 %v995_v45, %v979_v11  ;;  %v892_v20 = vadd.f32 %v4316_v60, %v891_v4 }
 0x193   :  { %v4320_v17 = vpop.eup %4319  ;;  %v4777_v21 = vadd.f32 1.0, %v4318_v12 }
 0x194   :  { %v904_v22 = vmul.f32 %v4320_v17, %v4768_v59  ;;  %4321 = vpow2.f32 %v3499_v16  ;;  %v896_v52 = vsel %vm4783_vm10, %v4316_v60, %v892_v20  ;;  %v1010_v29 = vpack.c.bf16 %v1003_v18, %v1002_v23  ;;  %v752_v4 = vpop.f32.mrf.mxu3  ;;  %v781_v15 = vpop.f32.mrf.mxu0 }
 0x195   :  { %4323 = vrcp.f32 %v4777_v21  ;;  %vm909_vm11 = vweird.f32 %v4320_v17  ;;  %v901_v37 = vsel %vm898_vm12, %v900_v27, %v896_v52  ;;  %v777_v60 = vadd.f32 %v776_v13, %v4761_v47 }
 0x196   :  { %v905_v24 = vsub.f32 1.0, %v904_v22  ;;  %1257 = vmatmul.bf16.vlgmr.msrb.gmra.mxu2 %v1010_v29  ;;  %1286 = vmatmul.bf16.vlgmr.msrb.gmra.mxu3 %v1010_v29  ;;  %vm910_vm14 = vmor %vm908_vm13, %vm909_vm11  ;;  %v988_v50 = vsub.f32 1.0, %v901_v37  ;;  %v821_v59 = vmax.f32 %v748_v42, 0.0  ;;  %vm923_vm1 = vweird.f32 %v4777_v21 }
 0x197   :  { %v813_v30 = vpop.f32.mrf.mxu1  ;;  %1315 = vmatmul.bf16.vlgmr.msra.gmra.mxu0 %v1010_v29  ;;  %1344 = vmatmul.bf16.vlgmr.msra.gmra.mxu1 %v1010_v29  ;;  %v929_v3 = vand.u32 2147483648, %v4777_v21  ;;  %v980_v8 = vmul.f32 %v901_v37, %v820_v1  ;;  %v927_v45 = vand.u32 2147483647, %v4777_v21  ;;  %v753_v22 = vadd.f32 %v752_v4, %v4755_v39 }
 0x198   :  { %v906_v31 = vmul.f32 %v4320_v17, %v905_v24  ;;  %v814_v33 = vadd.f32 %v813_v30, %v4735_v19  ;;  %v996_v36 = vmul.f32 %v988_v50, %v775_v58  ;;  %v780_v30 = vadd.f32 %v779_v53, %v4761_v47 }
 0x199   :  { %v930_v12 = vor.u32 1.1754944e-38, %v929_v3  ;;  %vm928_vm3 = vcmp.eq.f32.partialorder %v927_v45, 8.507059e+37 }
 0x19a   :  { %v4322_v35 = vpop.eup %4321  ;;  %v907_v38 = vadd.f32 %v4320_v17, %v906_v31  ;;  %v3500_v40 = vmul.f32 -1.442695, %v814_v33  ;;  %v1004_v10 = vadd.f32 %v996_v36, %v980_v8  ;;  %v782_v33 = vadd.f32 %v781_v15, %v4761_v47 }
 0x19b   :  { %v4324_v41 = vpop.eup %4323  ;;  %v4797_v43 = vadd.f32 1.0, %v4322_v35  ;;  %v823_v35 = vmax.f32 %v753_v22, 0.0 }
 0x19c   :  { %v911_v44 = vsel %vm910_vm14, %v4320_v17, %v907_v38  ;;  %v919_v46 = vmul.f32 %v4324_v41, %v4777_v21  ;;  %4325 = vpow2.f32 %v3500_v40  ;;  %vm924_vm0 = vweird.f32 %v4324_v41  ;;  %v755_v32 = vpop.f32.mrf.mxu3 }
 0x19d   :  { %v916_v51 = vsel %vm913_vm15, %v915_v55, %v911_v44  ;;  %4327 = vrcp.f32 %v4797_v43  ;;  %vm925_vm2 = vmor %vm923_vm1, %vm924_vm0  ;;  %v944_v16 = vand.u32 2147483648, %v4797_v43  ;;  %v942_v13 = vand.u32 2147483647, %v4797_v43  ;;  %v784_v44 = vpop.f32.mrf.mxu0 }
 0x19e   :  { %v989_v54 = vsub.f32 1.0, %v916_v51  ;;  %v920_v56 = vsub.f32 1.0, %v919_v46  ;;  %v981_v2 = vmul.f32 %v916_v51, %v821_v59  ;;  %vm938_vm5 = vweird.f32 %v4797_v43 }
 0x19f   :  { %v815_v7 = vpop.f32.mrf.mxu1  ;;  %v945_v52 = vor.u32 1.1754944e-38, %v944_v16  ;;  %vm943_vm7 = vcmp.eq.f32.partialorder %v942_v13, 8.507059e+37  ;;  %v822_v40 = vmax.f32 %v751_v26, 0.0  ;;  %v1079_v13 = vld [vmem:[#allocation9 + $0x2] ss:$8 sm:$0xf] }
 0x1a0   :  { %v997_v61 = vmul.f32 %v989_v54, %v777_v60  ;;  %v921_v62 = vmul.f32 %v4324_v41, %v920_v56  ;;  %v816_v0 = vadd.f32 %v815_v7, %v4735_v19 }
 0x1a2   :  { %v4326_v57 = vpop.eup %4325  ;;  %v922_v63 = vadd.f32 %v4324_v41, %v921_v62  ;;  %v3501_v5 = vmul.f32 -1.442695, %v816_v0  ;;  %v1005_v48 = vadd.f32 %v997_v61, %v981_v2 }
 0x1a3   :  { %v4328_v6 = vpop.eup %4327  ;;  %v4810_v9 = vadd.f32 1.0, %v4326_v57 }
 0x1a4   :  { %v934_v19 = vmul.f32 %v4328_v6, %v4797_v43  ;;  %4329 = vpow2.f32 %v3501_v5  ;;  %v926_v11 = vsel %vm925_vm2, %v4324_v41, %v922_v63  ;;  %v1011_v17 = vpack.c.bf16 %v1005_v48, %v1004_v10  ;;  %v757_v61 = vpop.f32.mrf.mxu3 }
 0x1a5   :  { %4331 = vrcp.f32 %v4810_v9  ;;  %v931_v18 = vsel %vm928_vm3, %v930_v12, %v926_v11  ;;  %vm939_vm4 = vweird.f32 %v4328_v6  ;;  %v959_v50 = vand.u32 2147483648, %v4810_v9  ;;  %v786_v5 = vpop.f32.mrf.mxu0 }
 0x1a6   :  { %v935_v14 = vsub.f32 1.0, %v934_v19  ;;  %1262 = vmatmul.bf16.gmra.mxu2 %v1011_v17  ;;  %1291 = vmatmul.bf16.gmra.mxu3 %v1011_v17  ;;  %v990_v24 = vsub.f32 1.0, %v931_v18  ;;  %vm940_vm6 = vmor %vm938_vm5, %vm939_vm4  ;;  %v982_v43 = vmul.f32 %v931_v18, %v822_v40  ;;  %vm953_vm9 = vweird.f32 %v4810_v9 }
 0x1a7   :  { %1320 = vmatmul.bf16.gmra.mxu0 %v1011_v17  ;;  %1349 = vmatmul.bf16.gmra.mxu1 %v1011_v17  ;;  %v957_v60 = vand.u32 2147483647, %v4810_v9  ;;  %v960_v59 = vor.u32 1.1754944e-38, %v959_v50  ;;  %v758_v2 = vadd.f32 %v757_v61, %v4755_v39  ;;  %v756_v63 = vadd.f32 %v755_v32, %v4755_v39 }
 0x1a8   :  { %v936_v20 = vmul.f32 %v4328_v6, %v935_v14  ;;  %v998_v34 = vmul.f32 %v990_v24, %v780_v30  ;;  %v785_v48 = vadd.f32 %v784_v44, %v4761_v47  ;;  %v787_v4 = vadd.f32 %v786_v5, %v4761_v47 }
 0x1a9   :  { %vm958_vm11 = vcmp.eq.f32.partialorder %v957_v60, 8.507059e+37  ;;  %v824_v10 = vmax.f32 %v756_v63, 0.0  ;;  %v4834_v47 = vperm.slane %v1079_v13, 1  ;;  %v4856_v32 = vperm.slane %v1079_v13, 2 }
 0x1aa   :  { %v4330_v21 = vpop.eup %4329  ;;  %v937_v23 = vadd.f32 %v4328_v6, %v936_v20  ;;  %v1006_v53 = vadd.f32 %v998_v34, %v982_v43  ;;  %v4184_v34 = vld [vmem:[#allocation8 + $0x1e4] sm:$0xf]  ;;  %v4182_v43 = vld [vmem:[#allocation8 + $0x1cc] sm:$0xf0]  ;;  %v5579_v5 = vmov 0 }
 0x1ab   :  { %v4332_v25 = vpop.eup %4331  ;;  %v857_v27 = vadd.f32 1.0, %v4330_v21 }
 0x1ac   :  { %v941_v28 = vsel %vm940_vm6, %v4328_v6, %v937_v23  ;;  %v949_v29 = vmul.f32 %v4332_v25, %v4810_v9  ;;  %vm954_vm8 = vweird.f32 %v4332_v25  ;;  %v825_v9 = vmax.f32 %v758_v2, 0.0 }
 0x1ad   :  { %v946_v31 = vsel %vm943_vm7, %v945_v52, %v941_v28  ;;  %4333 = vrcp.f32 %v857_v27  ;;  %vm955_vm10 = vmor %vm953_vm9, %vm954_vm8  ;;  %v974_v62 = vand.u32 2147483648, %v857_v27  ;;  %v972_v36 = vand.u32 2147483647, %v857_v27  ;;  %v4186_v28 = vld [vmem:[#allocation8 + $0x1ec] sm:$0xf0] }
 0x1ae   :  { %v991_v37 = vsub.f32 1.0, %v946_v31  ;;  %v950_v38 = vsub.f32 1.0, %v949_v29  ;;  %v983_v41 = vmul.f32 %v946_v31, %v823_v35  ;;  %vm968_vm13 = vweird.f32 %v857_v27 }
 0x1af   :  { %v975_v6 = vor.u32 1.1754944e-38, %v974_v62  ;;  %vm973_vm15 = vcmp.eq.f32.partialorder %v972_v36, 8.507059e+37 }
 0x1b0   :  { %v999_v42 = vmul.f32 %v991_v37, %v782_v33  ;;  %v951_v55 = vmul.f32 %v4332_v25, %v950_v38  ;;  %v1365_v37 = vlaneseq }
 0x1b2   :  { %v1007_v46 = vadd.f32 %v999_v42, %v983_v41  ;;  %v952_v49 = vadd.f32 %v4332_v25, %v951_v55  ;;  %v3748_v41 = vld [vmem:[#allocation8 + $0x1f0] sm:$0xf0]  ;;  %v3730_v42 = vld [vmem:[#allocation8 + $0x1c0] sm:$0xf] }
 0x1b3   :  { %v4334_v51 = vpop.eup %4333  ;;  %v4864_v55 = vor.u32 %v4184_v34, %v3748_v41  ;;  %v4866_v44 = vor.u32 %v4182_v43, %v3730_v42  ;;  %v3698_v42 = vld [vmem:[#allocation8 + $0x180] sm:$0xf]  ;;  %v4174_v43 = vld [vmem:[#allocation8 + $0x18c] sm:$0xf0] }
 0x1b4   :  { %v964_v54 = vmul.f32 %v4334_v51, %v857_v27  ;;  %v956_v56 = vsel %vm955_vm10, %v4332_v25, %v952_v49  ;;  %v1012_v58 = vpack.c.bf16 %v1007_v46, %v1006_v53  ;;  %vm969_vm12 = vweird.f32 %v4334_v51  ;;  %v3746_v27 = vld [vmem:[#allocation8 + $0x1e0] sm:$0xf] }
 0x1b5   :  { %v961_v0 = vsel %vm958_vm11, %v960_v59, %v956_v56  ;;  %vm970_vm14 = vmor %vm968_vm13, %vm969_vm12  ;;  %v4841_v25 = vperm.slane %v1079_v13, 3  ;;  %v4848_v29 = vor.u32 %v4186_v28, %v3746_v27  ;;  %v4868_v46 = vperm.slane %v1079_v13, 0  ;;  %1709 = vmatpush.bf16.msra.mxu3 %v4864_v55  ;;  %1833 = vmatpush.bf16.msrb.mxu1 %v4864_v55 }
 0x1b6   :  { %v965_v7 = vsub.f32 1.0, %v964_v54  ;;  %1267 = vmatmul.bf16.gmra.mxu2 %v1012_v58  ;;  %1296 = vmatmul.bf16.gmra.mxu3 %v1012_v58  ;;  %v992_v3 = vsub.f32 1.0, %v961_v0  ;;  %v984_v15 = vmul.f32 %v961_v0, %v824_v10  ;;  %v4871_v49 = vand.u32 127, %v1365_v37 }
 0x1b7   :  { %1325 = vmatmul.bf16.gmra.mxu0 %v1012_v58  ;;  %1354 = vmatmul.bf16.gmra.mxu1 %v1012_v58 }
 0x1b8   :  { %v966_v1 = vmul.f32 %v4334_v51, %v965_v7  ;;  %v1000_v11 = vmul.f32 %v992_v3, %v785_v48  ;;  %1696 = vmatpush.bf16.msra.mxu2 %v4848_v29  ;;  %1820 = vmatpush.bf16.msrb.mxu0 %v4848_v29  ;;  %v1368_v58 = vadd.s32 256, %v4871_v49  ;;  %v1369_v59 = vadd.s32 384, %v4871_v49 }
 0x1b9   :  { %v1367_v2 = vadd.s32 128, %v4871_v49  ;;  %vm1418_vm2 = vcmp.lt.s32.totalorder %v4871_v49, 32 }
 0x1ba   :  { %v967_v57 = vadd.f32 %v4334_v51, %v966_v1  ;;  %v1008_v39 = vadd.f32 %v1000_v11, %v984_v15  ;;  %v1388_v62 = vand.u32 127, %v1368_v58  ;;  %v1395_v0 = vand.u32 127, %v1369_v59  ;;  %v4176_v15 = vld [vmem:[#allocation8 + $0x1a4] sm:$0xf]  ;;  %v3652_v11 = vld [vmem:[#allocation8 + $0x130] sm:$0xf0] }
 0x1bc   :  { %v971_v8 = vsel %vm970_vm14, %v4334_v51, %v967_v57  ;;  %1697 = vmatpush.bf16.msra.mxu2 %v4866_v44  ;;  %1821 = vmatpush.bf16.msrb.mxu0 %v4866_v44  ;;  %vm4891_vm0 = vcmp.lt.s32.totalorder %v1388_v62, 32  ;;  %vm4895_vm1 = vcmp.lt.s32.totalorder %v1395_v0, 32  ;;  %v4964_v62 = vor.u32 %v4174_v43, %v3698_v42  ;;  %v3700_v0 = vld [vmem:[#allocation8 + $0x190] sm:$0xf0]  ;;  %v3666_v43 = vld [vmem:[#allocation8 + $0x140] sm:$0xf] }
 0x1bd   :  { %v976_v45 = vsel %vm973_vm15, %v975_v6, %v971_v8  ;;  %v5580_v5 = vsel %vm4895_vm1, 4294967295, %v5579_v5  ;;  %v4180_v6 = vld [vmem:[#allocation8 + $0x1c4] sm:$0xf]  ;;  %v3732_v8 = vld [vmem:[#allocation8 + $0x1d0] sm:$0xf0] }
 0x1be   :  { %v993_v19 = vsub.f32 1.0, %v976_v45  ;;  %v985_v12 = vmul.f32 %v976_v45, %v825_v9  ;;  %5581 = vst [vmem:[#allocation23_spill] sm:$0xff] %v5580_v5  ;;  %v1381_v9 = vand.u32 127, %v1367_v2  ;;  %v3636_v2 = vld [vmem:[#allocation8 + $0x110] sm:$0xf0] }
 0x1c0   :  { %v1001_v14 = vmul.f32 %v993_v19, %v787_v4  ;;  %v4905_v4 = vor.u32 %v4180_v6, %v3732_v8  ;;  %vm4929_vm3 = vcmp.lt.s32.totalorder %v1381_v9, 32  ;;  %v3682_v6 = vld [vmem:[#allocation8 + $0x160] sm:$0xf]  ;;  %v4170_v8 = vld [vmem:[#allocation8 + $0x16c] sm:$0xf0] }
 0x1c1   :  { %v4168_v9 = vld [vmem:[#allocation8 + $0x164] sm:$0xf] }
 0x1c2   :  { %v1009_v16 = vadd.f32 %v1001_v14, %v985_v12  ;;  %1710 = vmatpush.bf16.msra.mxu3 %v4905_v4  ;;  %1834 = vmatpush.bf16.msrb.mxu1 %v4905_v4  ;;  %v3714_v12 = vld [vmem:[#allocation8 + $0x1a0] sm:$0xf]  ;;  %v4178_v14 = vld [vmem:[#allocation8 + $0x1ac] sm:$0xf0] }
 0x1c4   :  { %v1013_v17 = vpack.c.bf16 %v1009_v16, %v1008_v39 }
 0x1c6   :  { %1272 = vmatmul.bf16.gmra.mxu2 %v1013_v17  ;;  %1301 = vmatmul.bf16.gmra.mxu3 %v1013_v17 }
 0x1c7   :  { %1330 = vmatmul.bf16.gmra.mxu0 %v1013_v17  ;;  %1359 = vmatmul.bf16.gmra.mxu1 %v1013_v17 }
 0x214   :  { %v4830_v18 = vpop.f32.mrf.mxu0  ;;  %v4832_v20 = vpop.f32.mrf.mxu1 }
 0x219   :  { %v4836_v21 = vpop.f32.mrf.mxu2  ;;  %v1287_v22 = vpop.f32.mrf.mxu3 }
 0x21a   :  { %v4839_v23 = vadd.f32 %v1287_v22, %v4834_v47  ;;  %v4926_v22 = vor.u32 %v4178_v14, %v3714_v12 }
 0x21c   :  { %5570 = vst [vmem:[#allocation16_spill] sm:$0xff] %v4839_v23  ;;  %v4843_v26 = vpop.f32.mrf.mxu0  ;;  %v1347_v24 = vpop.f32.mrf.mxu1  ;;  %1698 = vmatpush.bf16.msra.mxu2 %v4926_v22  ;;  %1822 = vmatpush.bf16.msrb.mxu0 %v4926_v22  ;;  %v3676_v23 = vld [vmem:[#allocation8 + $0x158] sm:$0xf0] }
 0x21d   :  { %v4846_v52 = vadd.f32 %v1347_v24, %v4841_v25  ;;  %v3716_v24 = vld [vmem:[#allocation8 + $0x1b0] sm:$0xf0] }
 0x21e   :  { %v4940_v37 = vor.u32 %v4176_v15, %v3716_v24 }
 0x21f   :  { %5571 = vst [vmem:[#allocation17_spill] sm:$0xff] %v4846_v52 }
 0x220   :  { %1711 = vmatpush.bf16.msra.mxu3 %v4940_v37  ;;  %1835 = vmatpush.bf16.msrb.mxu1 %v4940_v37 }
 0x221   :  { %v4852_v30 = vpop.f32.mrf.mxu2  ;;  %v4854_v31 = vpop.f32.mrf.mxu3  ;;  %1699 = vmatpush.bf16.msra.mxu2 %v4964_v62  ;;  %1823 = vmatpush.bf16.msrb.mxu0 %v4964_v62 }
 0x224   :  { %v1321_v33 = vpop.f32.mrf.mxu0  ;;  %v1350_v35 = vpop.f32.mrf.mxu1 }
 0x225   :  { %v4859_v38 = vadd.f32 %v1321_v33, %v4856_v32  ;;  %v4862_v40 = vadd.f32 %v1350_v35, %v4841_v25 }
 0x227   :  { %5572 = vst [vmem:[#allocation18_spill] sm:$0xff] %v4859_v38 }
 0x228   :  { %5573 = vst [vmem:[#allocation19_spill] sm:$0xff] %v4862_v40 }
 0x229   :  { %v1263_v50 = vpop.f32.mrf.mxu2  ;;  %v1292_v51 = vpop.f32.mrf.mxu3 }
 0x22a   :  { %v4877_v53 = vadd.f32 %v1263_v50, %v4868_v46  ;;  %v4880_v60 = vadd.f32 %v1292_v51, %v4834_v47  ;;  %v4172_v50 = vld [vmem:[#allocation8 + $0x184] sm:$0xf] }
 0x22c   :  { %5574 = vst [vmem:[#allocation20_spill] sm:$0xff] %v4880_v60  ;;  %v1323_v54 = vpop.f32.mrf.mxu0  ;;  %v1352_v56 = vpop.f32.mrf.mxu1 }
 0x22d   :  { %v4885_v7 = vadd.f32 %v1323_v54, %v4856_v32  ;;  %v4888_v61 = vadd.f32 %v1352_v56, %v4841_v25  ;;  %v5068_v54 = vadd.f32 %v4854_v31, %v4834_v47 }
 0x22f   :  { %5575 = vst [vmem:[#allocation21_spill] sm:$0xff] %v4885_v7  ;;  %v4157_v7 = vld [vmem:[#allocation8 + $0x10c] sm:$0xf] }
 0x230   :  { %5576 = vst [vmem:[#allocation22_spill] sm:$0xff] %v4888_v61  ;;  %v3660_v61 = vld [vmem:[#allocation8 + $0x138] sm:$0xf0] }
 0x231   :  { %v1265_v1 = vpop.f32.mrf.mxu2  ;;  %v1294_v36 = vpop.f32.mrf.mxu3  ;;  %5598 = vst [vmem:[#allocation38_spill] sm:$0xff] %v5068_v54 }
 0x232   :  { %v1266_v39 = vadd.f32 %v1265_v1, %v4868_v46  ;;  %v4934_v28 = vadd.f32 %v1294_v36, %v4834_v47  ;;  %v4970_v36 = vor.u32 %v4172_v50, %v3700_v0  ;;  %v4166_v50 = vld [vmem:[#allocation8 + $0x14c] sm:$0xf0]  ;;  %v4164_v0 = vld [vmem:[#allocation8 + $0x144] sm:$0xf] }
 0x234   :  { %v1326_v57 = vpop.f32.mrf.mxu0  ;;  %v1355_v63 = vpop.f32.mrf.mxu1  ;;  %5586 = vst [vmem:[#allocation26_spill] sm:$0xff] %v4934_v28  ;;  %1712 = vmatpush.bf16.msra.mxu3 %v4970_v36  ;;  %1836 = vmatpush.bf16.msrb.mxu1 %v4970_v36 }
 0x235   :  { %v4900_v48 = vadd.f32 %v1326_v57, %v4856_v32  ;;  %v4903_v45 = vadd.f32 %v1355_v63, %v4841_v25 }
 0x237   :  { %5582 = vst [vmem:[#allocation24_spill] sm:$0xff] %v4900_v48 }
 0x238   :  { %5583 = vst [vmem:[#allocation25_spill] sm:$0xff] %v4903_v45  ;;  %v3724_v45 = vld [vmem:[#allocation8 + $0x1b8] sm:$0xf0] }
 0x239   :  { %v1268_v17 = vpop.f32.mrf.mxu2  ;;  %v1297_v13 = vpop.f32.mrf.mxu3 }
 0x23a   :  { %v1269_v33 = vadd.f32 %v1268_v17, %v4868_v46  ;;  %v4938_v35 = vadd.f32 %v1297_v13, %v4834_v47  ;;  %v3684_v17 = vld [vmem:[#allocation8 + $0x170] sm:$0xf0] }
 0x23c   :  { %5587 = vst [vmem:[#allocation27_spill] sm:$0xff] %v4938_v35  ;;  %v1328_v34 = vpop.f32.mrf.mxu0  ;;  %v1357_v41 = vpop.f32.mrf.mxu1  ;;  %v4948_v51 = vsel %vm1418_vm2, %v1266_v39, %v1269_v33  ;;  %v4956_v56 = vsel %vm1418_vm2, %v1269_v33, %v1266_v39  ;;  %v4992_v39 = vor.u32 %v4170_v8, %v3682_v6  ;;  %v4998_v33 = vor.u32 %v4168_v9, %v3684_v17  ;;  %v3668_v17 = vld [vmem:[#allocation8 + $0x150] sm:$0xf0]  ;;  %v3644_v35 = vld [vmem:[#allocation8 + $0x118] sm:$0xf0] }
 0x23d   :  { %5588 = vst [vmem:[#allocation28_spill] sm:$0xff] %v4948_v51  ;;  %v4959_v58 = vadd.f32 %v1328_v34, %v4856_v32  ;;  %v4962_v59 = vadd.f32 %v1357_v41, %v4841_v25  ;;  %v5002_v34 = vadd.f32 %v4843_v26, %v4856_v32  ;;  %v5034_v63 = vor.u32 %v4164_v0, %v3668_v17  ;;  %v3754_v26 = vld [vmem:[#allocation8 + $0x1e8] sm:$0xf] }
 0x23e   :  { %5589 = vst [vmem:[#allocation29_spill] sm:$0xff] %v4956_v56  ;;  %1700 = vmatpush.bf16.msra.mxu2 %v4992_v39  ;;  %1824 = vmatpush.bf16.msrb.mxu0 %v4992_v39  ;;  %v4177_v56 = vld [vmem:[#allocation8 + $0x1ac] sm:$0xf]  ;;  %v5200_v28 = vor.u32 %v4157_v7, %v3644_v35 }
 0x23f   :  { %5590 = vst [vmem:[#allocation30_spill] sm:$0xff] %v4959_v58  ;;  %1713 = vmatpush.bf16.msra.mxu3 %v4998_v33  ;;  %1837 = vmatpush.bf16.msrb.mxu1 %v4998_v33 }
 0x240   :  { %5591 = vst [vmem:[#allocation31_spill] sm:$0xff] %v4962_v59 }
 0x241   :  { %v1270_v14 = vpop.f32.mrf.mxu2  ;;  %v1299_v15 = vpop.f32.mrf.mxu3  ;;  %5593 = vst [vmem:[#allocation33_spill] sm:$0xff] %v5002_v34 }
 0x242   :  { %v1271_v13 = vadd.f32 %v1270_v14, %v4868_v46  ;;  %v4996_v24 = vadd.f32 %v1299_v15, %v4834_v47  ;;  %v5028_v15 = vor.u32 %v4166_v50, %v3666_v43  ;;  %v4162_v43 = vld [vmem:[#allocation8 + $0x12c] sm:$0xf0]  ;;  %v4160_v50 = vld [vmem:[#allocation8 + $0x124] sm:$0xf] }
 0x243   :  { %1714 = vmatpush.bf16.msra.mxu3 %v5034_v63  ;;  %1838 = vmatpush.bf16.msrb.mxu1 %v5034_v63  ;;  %v5064_v19 = vor.u32 %v4160_v50, %v3652_v11  ;;  %v4156_v11 = vld [vmem:[#allocation8 + $0x104] sm:$0xf] }
 0x244   :  { %5592 = vst [vmem:[#allocation32_spill] sm:$0xff] %v4996_v24  ;;  %v1331_v41 = vpop.f32.mrf.mxu0  ;;  %v1360_v42 = vpop.f32.mrf.mxu1  ;;  %v5011_v6 = vsel %vm1418_vm2, %v4877_v53, %v1271_v13  ;;  %v5020_v8 = vsel %vm1418_vm2, %v1271_v13, %v4877_v53  ;;  %1701 = vmatpush.bf16.msra.mxu2 %v5028_v15  ;;  %1825 = vmatpush.bf16.msrb.mxu0 %v5028_v15  ;;  %v4187_v13 = vld [vmem:[#allocation8 + $0x1f4] sm:$0xf0] }
 0x245   :  { %5594 = vst [vmem:[#allocation34_spill] sm:$0xff] %v5020_v8  ;;  %v5023_v9 = vadd.f32 %v1331_v41, %v4856_v32  ;;  %v5026_v14 = vadd.f32 %v1360_v42, %v4841_v25  ;;  %v3650_v42 = vld [vmem:[#allocation8 + $0x120] sm:$0xf]  ;;  %v1261_v41 = vadd.f32 %v4852_v30, %v4868_v46  ;;  %v5098_v8 = vor.u32 %v4156_v11, %v3636_v2  ;;  %v4183_v2 = vld [vmem:[#allocation8 + $0x1d4] sm:$0xf0] }
 0x246   :  { %v5056_v16 = vor.u32 %v4162_v43, %v3650_v42  ;;  %v5074_v42 = vadd.f32 %v4830_v18, %v4856_v32  ;;  %v4181_v11 = vld [vmem:[#allocation8 + $0x1cc] sm:$0xf] }
 0x247   :  { %5595 = vst [vmem:[#allocation35_spill] sm:$0xff] %v5023_v9  ;;  %1715 = vmatpush.bf16.msra.mxu3 %v5064_v19  ;;  %1839 = vmatpush.bf16.msrb.mxu1 %v5064_v19 }
 0x248   :  { %5596 = vst [vmem:[#allocation36_spill] sm:$0xff] %v5026_v14  ;;  %1702 = vmatpush.bf16.msra.mxu2 %v5056_v16  ;;  %1826 = vmatpush.bf16.msrb.mxu0 %v5056_v16 }
 0x249   :  { %v1273_v17 = vpop.f32.mrf.mxu2  ;;  %v1302_v12 = vpop.f32.mrf.mxu3  ;;  %5599 = vst [vmem:[#allocation39_spill] sm:$0xff] %v5074_v42 }
 0x24a   :  { %v1274_v1 = vadd.f32 %v1273_v17, %v4868_v46  ;;  %v5062_v10 = vadd.f32 %v1302_v12, %v4834_v47  ;;  %v3634_v12 = vld [vmem:[#allocation8 + $0x100] sm:$0xf]  ;;  %v4158_v17 = vld [vmem:[#allocation8 + $0x10c] sm:$0xf0] }
 0x24b   :  { %v5092_v57 = vor.u32 %v4158_v17, %v3634_v12  ;;  %1716 = vmatpush.bf16.msra.mxu3 %v5098_v8  ;;  %1840 = vmatpush.bf16.msrb.mxu1 %v5098_v8 }
 0x24c   :  { %5597 = vst [vmem:[#allocation37_spill] sm:$0xff] %v5062_v10  ;;  %v1333_v30 = vpop.f32.mrf.mxu0  ;;  %v1362_v43 = vpop.f32.mrf.mxu1  ;;  %v5079_v50 = vsel %vm1418_vm2, %v1261_v41, %v1274_v1  ;;  %v5084_v31 = vsel %vm1418_vm2, %v1274_v1, %v1261_v41  ;;  %v5100_v1 = vor.u32 %v4187_v13, %v3754_v26  ;;  %v4185_v41 = vld [vmem:[#allocation8 + $0x1ec] sm:$0xf]  ;;  %v3740_v26 = vld [vmem:[#allocation8 + $0x1d8] sm:$0xf0] }
 0x24d   :  { %5600 = vst [vmem:[#allocation40_spill] sm:$0xff] %v5084_v31  ;;  %v5087_v18 = vadd.f32 %v1333_v30, %v4856_v32  ;;  %v5090_v0 = vadd.f32 %v1362_v43, %v4841_v25  ;;  %v3756_v32 = vld [vmem:[#allocation8 + $0x1f8] sm:$0xf0]  ;;  %v3738_v30 = vld [vmem:[#allocation8 + $0x1c8] sm:$0xf]  ;;  %v5104_v43 = vadd.f32 %v4832_v20, %v4841_v25  ;;  %1703 = vmatpush.bf16.msra.mxu2 %v5092_v57 }
 0x24e   :  { %v5111_v17 = vor.u32 %v4185_v41, %v3756_v32  ;;  %1827 = vmatpush.bf16.msrb.mxu0 %v5092_v57  ;;  %v5116_v20 = vor.u32 %v4183_v2, %v3738_v30  ;;  %v5119_v31 = vor.u32 %v4181_v11, %v3740_v26  ;;  %v3722_v41 = vld [vmem:[#allocation8 + $0x1a8] sm:$0xf]  ;;  %v4179_v32 = vld [vmem:[#allocation8 + $0x1b4] sm:$0xf0]  ;;  %v1259_v2 = vadd.f32 %v4836_v21, %v4868_v46 }
 0x24f   :  { %5601 = vst [vmem:[#allocation41_spill] sm:$0xff] %v5087_v18  ;;  %v1424_v12 = vsel %vm4891_vm0, %v5074_v42, %v5087_v18  ;;  %1957 = vmatpush.bf16.msra.mxu1 %v4864_v55  ;;  %v5141_v30 = vor.u32 %v4179_v32, %v3722_v41  ;;  %v4173_v42 = vld [vmem:[#allocation8 + $0x18c] sm:$0xf]  ;;  %v3708_v18 = vld [vmem:[#allocation8 + $0x198] sm:$0xf0] }
 0x250   :  { %5602 = vst [vmem:[#allocation42_spill] sm:$0xff] %v5090_v0  ;;  %v3631_v13 = vmul.f32 -1.442695, %v1424_v12  ;;  %1735 = vmatpush.bf16.msrb.mxu3 %v5111_v17 }
 0x251   :  { %5603 = vst [vmem:[#allocation43_spill] sm:$0xff] %v5104_v43  ;;  %1722 = vmatpush.bf16.msrb.mxu2 %v5100_v1  ;;  %v1275_v25 = vpop.f32.mrf.mxu2  ;;  %v1304_v53 = vpop.f32.mrf.mxu3 }
 0x252   :  { %4335 = vpow2.f32 %v3631_v13  ;;  %v1276_v11 = vadd.f32 %v1275_v25, %v4868_v46  ;;  %v5134_v26 = vadd.f32 %v1304_v53, %v4834_v47  ;;  %1944 = vmatpush.bf16.msra.mxu0 %v4848_v29  ;;  %v5152_v53 = vor.u32 %v4177_v56, %v3724_v45  ;;  %v3706_v13 = vld [vmem:[#allocation8 + $0x188] sm:$0xf]  ;;  %v4175_v25 = vld [vmem:[#allocation8 + $0x194] sm:$0xf0]  ;;  %v4165_v47 = vld [vmem:[#allocation8 + $0x14c] sm:$0xf] }
 0x253   :  { %1958 = vmatpush.bf16.msra.mxu1 %v4905_v4  ;;  %v5157_v41 = vor.u32 %v4175_v25, %v3706_v13  ;;  %v5162_v45 = vor.u32 %v4173_v42, %v3708_v18  ;;  %v4169_v13 = vld [vmem:[#allocation8 + $0x16c] sm:$0xf]  ;;  %v3692_v25 = vld [vmem:[#allocation8 + $0x178] sm:$0xf0]  ;;  %v3674_v18 = vld [vmem:[#allocation8 + $0x148] sm:$0xf] }
 0x254   :  { %5604 = vst [vmem:[#allocation44_spill] sm:$0xff] %v5134_v26  ;;  %v1422_v12 = vsel %vm1418_vm2, %v1259_v2, %v1276_v11  ;;  %v5145_v21 = vsel %vm1418_vm2, %v1276_v11, %v1259_v2  ;;  %1736 = vmatpush.bf16.msrb.mxu3 %v5119_v31  ;;  %v4171_v2 = vld [vmem:[#allocation8 + $0x174] sm:$0xf0]  ;;  %v5173_v42 = vor.u32 %v4169_v13, %v3692_v25 }
 0x255   :  { %1723 = vmatpush.bf16.msrb.mxu2 %v5116_v20  ;;  %5605 = vst [vmem:[#allocation45_spill] sm:$0xff] %v5145_v21  ;;  %v3630_v46 = vmul.f32 -1.442695, %v1422_v12  ;;  %v3690_v12 = vld [vmem:[#allocation8 + $0x168] sm:$0xf] }
 0x256   :  { %1945 = vmatpush.bf16.msra.mxu0 %v4866_v44  ;;  %v4163_v26 = vld [vmem:[#allocation8 + $0x134] sm:$0xf0]  ;;  %v4161_v21 = vld [vmem:[#allocation8 + $0x12c] sm:$0xf] }
 0x257   :  { %4337 = vpow2.f32 %v3630_v46  ;;  %1959 = vmatpush.bf16.msra.mxu1 %v4940_v37  ;;  %v5169_v46 = vor.u32 %v4171_v2, %v3690_v12  ;;  %v5179_v12 = vor.u32 %v4165_v47, %v3676_v23  ;;  %v3658_v2 = vld [vmem:[#allocation8 + $0x128] sm:$0xf]  ;;  %v5187_v48 = vor.u32 %v4161_v21, %v3660_v61  ;;  %v4159_v23 = vld [vmem:[#allocation8 + $0x114] sm:$0xf0] }
 0x258   :  { %v4336_v49 = vpop.eup %4335  ;;  %1737 = vmatpush.bf16.msrb.mxu3 %v5152_v53  ;;  %v5184_v25 = vor.u32 %v4163_v26, %v3658_v2  ;;  %v1425_v26 = vsel %vm4895_vm1, %v5104_v43, %v5090_v0 }
 0x259   :  { %1724 = vmatpush.bf16.msrb.mxu2 %v5141_v30  ;;  %v5159_v32 = vadd.f32 1.0, %v4336_v49  ;;  %v4167_v49 = vld [vmem:[#allocation8 + $0x154] sm:$0xf0] }
 0x25a   :  { %1946 = vmatpush.bf16.msra.mxu0 %v4926_v22 }
 0x25b   :  { %4339 = vrcp.f32 %v5159_v32  ;;  %1960 = vmatpush.bf16.msra.mxu1 %v4970_v36  ;;  %vm1517_vm9 = vweird.f32 %v5159_v32 }
 0x25c   :  { %1738 = vmatpush.bf16.msrb.mxu3 %v5162_v45 }
 0x25d   :  { %1725 = vmatpush.bf16.msrb.mxu2 %v5157_v41  ;;  %v4338_v56 = vpop.eup %4337 }
 0x25e   :  { %v1495_v11 = vadd.f32 1.0, %v4338_v56  ;;  %1947 = vmatpush.bf16.msra.mxu0 %v4964_v62  ;;  %v5177_v56 = vor.u32 %v4167_v49, %v3674_v18  ;;  %v3642_v18 = vld [vmem:[#allocation8 + $0x108] sm:$0xf] }
 0x25f   :  { %1961 = vmatpush.bf16.msra.mxu1 %v4998_v33  ;;  %v5197_v61 = vor.u32 %v4159_v23, %v3642_v18 }
 0x260   :  { %4341 = vrcp.f32 %v1495_v11  ;;  %1739 = vmatpush.bf16.msrb.mxu3 %v5173_v42  ;;  %v1508_v51 = vand.u32 2147483648, %v1495_v11  ;;  %v1506_v43 = vand.u32 2147483647, %v1495_v11  ;;  %vm1502_vm5 = vweird.f32 %v1495_v11 }
 0x261   :  { %1726 = vmatpush.bf16.msrb.mxu2 %v5169_v46  ;;  %v4340_v13 = vpop.eup %4339  ;;  %4343 = vtanh.f32 %v1425_v26 }
 0x262   :  { %1948 = vmatpush.bf16.msra.mxu0 %v4992_v39  ;;  %v1513_v49 = vmul.f32 %v4340_v13, %v5159_v32  ;;  %v1509_v18 = vor.u32 1.1754944e-38, %v1508_v51  ;;  %vm1507_vm7 = vcmp.eq.f32.partialorder %v1506_v43, 8.507059e+37  ;;  %vm1518_vm8 = vweird.f32 %v4340_v13 }
 0x263   :  { %1962 = vmatpush.bf16.msra.mxu1 %v5034_v63  ;;  %v1521_v51 = vand.u32 2147483647, %v5159_v32  ;;  %vm1519_vm10 = vmor %vm1517_vm9, %vm1518_vm8 }
 0x264   :  { %1740 = vmatpush.bf16.msrb.mxu3 %v5179_v12  ;;  %v1514_v59 = vsub.f32 1.0, %v1513_v49 }
 0x265   :  { %1727 = vmatpush.bf16.msrb.mxu2 %v5177_v56  ;;  %vm1522_vm11 = vcmp.eq.f32.partialorder %v1521_v51, 8.507059e+37 }
 0x266   :  { %v4342_v47 = vpop.eup %4341  ;;  %1949 = vmatpush.bf16.msra.mxu0 %v5028_v15  ;;  %v1515_v7 = vmul.f32 %v4340_v13, %v1514_v59 }
 0x267   :  { %v1498_v2 = vmul.f32 %v4342_v47, %v1495_v11  ;;  %1963 = vmatpush.bf16.msra.mxu1 %v5064_v19  ;;  %vm1503_vm4 = vweird.f32 %v4342_v47  ;;  %v4344_v23 = vpop.eup %4343 }
 0x268   :  { %1741 = vmatpush.bf16.msrb.mxu3 %v5187_v48  ;;  %vm1504_vm6 = vmor %vm1502_vm5, %vm1503_vm4 }
 0x269   :  { %1728 = vmatpush.bf16.msrb.mxu2 %v5184_v25  ;;  %v1499_v21 = vsub.f32 1.0, %v1498_v2  ;;  %v1516_v2 = vadd.f32 %v4340_v13, %v1515_v7 }
 0x26a   :  { %1950 = vmatpush.bf16.msra.mxu0 %v5056_v16 }
 0x26b   :  { %v1500_v40 = vmul.f32 %v4342_v47, %v1499_v21  ;;  %1964 = vmatpush.bf16.msra.mxu1 %v5098_v8  ;;  %v1520_v59 = vsel %vm1519_vm10, %v4340_v13, %v1516_v2  ;;  %v1431_v13 = vsel %vm4929_vm3, %v5068_v54, %v5062_v10 }
 0x26c   :  { %1742 = vmatpush.bf16.msrb.mxu3 %v5200_v28 }
 0x26d   :  { %1729 = vmatpush.bf16.msrb.mxu2 %v5197_v61  ;;  %v1501_v0 = vadd.f32 %v4342_v47, %v1500_v40  ;;  %v1523_v40 = vand.u32 2147483648, %v5159_v32 }
 0x26e   :  { %1951 = vmatpush.bf16.msra.mxu0 %v5092_v57 }
 0x26f   :  { %v1505_v35 = vsel %vm1504_vm6, %v4342_v47, %v1501_v0  ;;  %v1524_v11 = vor.u32 1.1754944e-38, %v1523_v40 }
 0x270   :  { %v1510_v49 = vsel %vm1507_vm7, %v1509_v18, %v1505_v35 }
 0x271   :  { %v5208_v26 = vmul.f32 %v4344_v23, %v1510_v49  ;;  %v1525_v43 = vsel %vm1522_vm11, %v1524_v11, %v1520_v59 }
 0x273   :  { %4345 = vtanh.f32 %v5208_v26 }
 0x279   :  { %v4346_v0 = vpop.eup %4345 }
 0x27a   :  { %v1530_v47 = vmul.f32 %v4346_v0, %v1525_v43 }
 0x27c   :  { %v1535_v21 = vpack.c.bf16 %v1530_v47, %v1530_v47 }
 0x27e   :  { %1704 = vmatmul.bf16.vlgmr.msra.gmra.mxu2 %v1535_v21  ;;  %1717 = vmatmul.bf16.vlgmr.msra.gmra.mxu3 %v1535_v21 }
 0x27f   :  { %1846 = vmatpush.bf16.msra.mxu2 %v5100_v1  ;;  %1859 = vmatpush.bf16.msra.mxu3 %v5111_v17 }
 0x283   :  { %1847 = vmatpush.bf16.msra.mxu2 %v5116_v20  ;;  %1860 = vmatpush.bf16.msra.mxu3 %v5119_v31 }
 0x287   :  { %1848 = vmatpush.bf16.msra.mxu2 %v5141_v30  ;;  %1861 = vmatpush.bf16.msra.mxu3 %v5152_v53 }
 0x28b   :  { %1849 = vmatpush.bf16.msra.mxu2 %v5157_v41  ;;  %1862 = vmatpush.bf16.msra.mxu3 %v5162_v45 }
 0x28e   :  { %1730 = vmatmul.bf16.vlgmr.msrb.gmra.mxu2 %v1535_v21  ;;  %1743 = vmatmul.bf16.vlgmr.msrb.gmra.mxu3 %v1535_v21 }
 0x28f   :  { %1850 = vmatpush.bf16.msra.mxu2 %v5169_v46  ;;  %1863 = vmatpush.bf16.msra.mxu3 %v5173_v42 }
 0x293   :  { %1851 = vmatpush.bf16.msra.mxu2 %v5177_v56  ;;  %1864 = vmatpush.bf16.msra.mxu3 %v5179_v12 }
 0x297   :  { %1852 = vmatpush.bf16.msra.mxu2 %v5184_v25  ;;  %1865 = vmatpush.bf16.msra.mxu3 %v5187_v48 }
 0x29b   :  { %1853 = vmatpush.bf16.msra.mxu2 %v5197_v61  ;;  %1866 = vmatpush.bf16.msra.mxu3 %v5200_v28 }
 0x29f   :  { %1970 = vmatpush.bf16.msrb.mxu2 %v5100_v1  ;;  %1983 = vmatpush.bf16.msrb.mxu3 %v5111_v17 }
 0x2a3   :  { %1971 = vmatpush.bf16.msrb.mxu2 %v5116_v20  ;;  %1984 = vmatpush.bf16.msrb.mxu3 %v5119_v31 }
 0x2a7   :  { %1972 = vmatpush.bf16.msrb.mxu2 %v5141_v30  ;;  %1985 = vmatpush.bf16.msrb.mxu3 %v5152_v53 }
 0x2ab   :  { %1973 = vmatpush.bf16.msrb.mxu2 %v5157_v41  ;;  %1986 = vmatpush.bf16.msrb.mxu3 %v5162_v45 }
 0x2af   :  { %1974 = vmatpush.bf16.msrb.mxu2 %v5169_v46  ;;  %1987 = vmatpush.bf16.msrb.mxu3 %v5173_v42 }
 0x2b3   :  { %1975 = vmatpush.bf16.msrb.mxu2 %v5177_v56  ;;  %1988 = vmatpush.bf16.msrb.mxu3 %v5179_v12 }
 0x2b7   :  { %1976 = vmatpush.bf16.msrb.mxu2 %v5184_v25  ;;  %1989 = vmatpush.bf16.msrb.mxu3 %v5187_v48 }
 0x2bb   :  { %1977 = vmatpush.bf16.msrb.mxu2 %v5197_v61  ;;  %1990 = vmatpush.bf16.msrb.mxu3 %v5200_v28 }
 0x301   :  { %v1705_v32 = vpop.f32.mrf.mxu2  ;;  %v1718_v18 = vpop.f32.mrf.mxu3 }
 0x302   :  { %v1748_v7 = vadd.f32 %v1705_v32, %v5079_v50  ;;  %v1749_v35 = vadd.f32 %v1718_v18, %v1431_v13  ;;  %v5606_v50 = vsel %vm4891_vm0, %v5002_v34, %v5023_v9 }
 0x304   :  { %v3760_v23 = vmul.f32 -1.442695, %v1748_v7  ;;  %v3761_v49 = vmul.f32 -1.442695, %v1749_v35  ;;  %v5607_v35 = vsel %vm4895_vm1, %v4846_v52, %v5026_v14 }
 0x306   :  { %4347 = vpow2.f32 %v3760_v23 }
 0x307   :  { %4349 = vpow2.f32 %v3761_v49 }
 0x309   :  { %v1707_v2 = vpop.f32.mrf.mxu2  ;;  %v1720_v40 = vpop.f32.mrf.mxu3 }
 0x30c   :  { %v4348_v51 = vpop.eup %4347 }
 0x30d   :  { %v4350_v59 = vpop.eup %4349  ;;  %v1761_v11 = vadd.f32 1.0, %v4348_v51 }
 0x30e   :  { %v1762_v0 = vadd.f32 1.0, %v4350_v59 }
 0x30f   :  { %4351 = vrcp.f32 %v1761_v11  ;;  %v1775_v34 = vand.u32 2147483648, %v1761_v11  ;;  %vm1769_vm14 = vweird.f32 %v1761_v11 }
 0x310   :  { %4353 = vrcp.f32 %v1762_v0  ;;  %v1788_v10 = vand.u32 2147483647, %v1762_v0  ;;  %vm1784_vm2 = vweird.f32 %v1762_v0 }
 0x311   :  { %v1731_v43 = vpop.f32.mrf.mxu2  ;;  %v1744_v47 = vpop.f32.mrf.mxu3 }
 0x312   :  { %v1750_v21 = vadd.f32 %v1731_v43, %v5606_v50  ;;  %v1751_v23 = vadd.f32 %v1744_v47, %v5607_v35  ;;  %v1790_v50 = vand.u32 2147483648, %v1762_v0  ;;  %v1776_v35 = vor.u32 1.1754944e-38, %v1775_v34 }
 0x313   :  { %vm1789_vm6 = vcmp.eq.f32.partialorder %v1788_v10, 8.507059e+37 }
 0x314   :  { %v3762_v32 = vmul.f32 -1.442695, %v1750_v21  ;;  %v1773_v21 = vand.u32 2147483647, %v1761_v11 }
 0x315   :  { %v4352_v13 = vpop.eup %4351 }
 0x316   :  { %v4354_v18 = vpop.eup %4353  ;;  %v1765_v7 = vmul.f32 %v4352_v13, %v1761_v11  ;;  %4355 = vpow2.f32 %v3762_v32  ;;  %vm1770_vm12 = vweird.f32 %v4352_v13  ;;  %vm1774_vm5 = vcmp.eq.f32.partialorder %v1773_v21, 8.507059e+37 }
 0x317   :  { %v1780_v49 = vmul.f32 %v4354_v18, %v1762_v0  ;;  %4357 = vtanh.f32 %v1751_v23  ;;  %vm1785_vm13 = vweird.f32 %v4354_v18  ;;  %vm1771_vm15 = vmor %vm1769_vm14, %vm1770_vm12 }
 0x318   :  { %v1766_v2 = vsub.f32 1.0, %v1765_v7  ;;  %vm1786_vm4 = vmor %vm1784_vm2, %vm1785_vm13 }
 0x319   :  { %v1781_v40 = vsub.f32 1.0, %v1780_v49  ;;  %v1733_v51 = vpop.f32.mrf.mxu2  ;;  %v1746_v59 = vpop.f32.mrf.mxu3  ;;  %v1791_v49 = vor.u32 1.1754944e-38, %v1790_v50 }
 0x31a   :  { %v1767_v54 = vmul.f32 %v4352_v13, %v1766_v2 }
 0x31b   :  { %v1782_v43 = vmul.f32 %v4354_v18, %v1781_v40 }
 0x31c   :  { %v4356_v9 = vpop.eup %4355  ;;  %v1768_v32 = vadd.f32 %v4352_v13, %v1767_v54 }
 0x31d   :  { %v1763_v5 = vadd.f32 1.0, %v4356_v9  ;;  %v1783_v47 = vadd.f32 %v4354_v18, %v1782_v43  ;;  %v4358_v2 = vpop.eup %4357 }
 0x31e   :  { %v1772_v7 = vsel %vm1771_vm15, %v4352_v13, %v1768_v32 }
 0x31f   :  { %4359 = vrcp.f32 %v1763_v5  ;;  %v1777_v23 = vsel %vm1774_vm5, %v1776_v35, %v1772_v7  ;;  %v1787_v40 = vsel %vm1786_vm4, %v4354_v18, %v1783_v47  ;;  %v1805_v0 = vand.u32 2147483648, %v1763_v5 }
 0x320   :  { %v1792_v51 = vsel %vm1789_vm6, %v1791_v49, %v1787_v40  ;;  %v1811_v59 = vmul.f32 %v4358_v2, %v1777_v23  ;;  %v1803_v13 = vand.u32 2147483647, %v1763_v5  ;;  %vm1799_vm8 = vweird.f32 %v1763_v5 }
 0x321   :  { %v1810_v54 = vmul.f32 %v1792_v51, %v5208_v26  ;;  %v1806_v18 = vor.u32 1.1754944e-38, %v1805_v0  ;;  %v5608_v35 = vsel %vm4929_vm3, %v4880_v60, %v4996_v24 }
 0x322   :  { %vm1804_vm10 = vcmp.eq.f32.partialorder %v1803_v13, 8.507059e+37 }
 0x323   :  { %v5262_v11 = vadd.f32 %v1811_v59, %v1810_v54  ;;  %v5609_v59 = vsel %vm4891_vm0, %v4859_v38, %v4959_v58 }
 0x325   :  { %v4360_v9 = vpop.eup %4359  ;;  %4361 = vtanh.f32 %v5262_v11 }
 0x326   :  { %v1795_v52 = vmul.f32 %v4360_v9, %v1763_v5  ;;  %vm1800_vm7 = vweird.f32 %v4360_v9 }
 0x327   :  { %vm1801_vm9 = vmor %vm1799_vm8, %vm1800_vm7 }
 0x328   :  { %v1796_v43 = vsub.f32 1.0, %v1795_v52 }
 0x32a   :  { %v1797_v34 = vmul.f32 %v4360_v9, %v1796_v43 }
 0x32b   :  { %v4362_v21 = vpop.eup %4361 }
 0x32c   :  { %v1798_v50 = vadd.f32 %v4360_v9, %v1797_v34 }
 0x32e   :  { %v1802_v10 = vsel %vm1801_vm9, %v4360_v9, %v1798_v50 }
 0x32f   :  { %v1807_v32 = vsel %vm1804_vm10, %v1806_v18, %v1802_v10 }
 0x330   :  { %v1814_v26 = vmul.f32 %v4362_v21, %v1807_v32 }
 0x332   :  { %v1819_v47 = vpack.c.bf16 %v1814_v26, %v1814_v26 }
 0x334   :  { %1828 = vmatmul.bf16.vlgmr.msrb.gmra.mxu0 %v1819_v47  ;;  %1841 = vmatmul.bf16.vlgmr.msrb.gmra.mxu1 %v1819_v47 }
 0x335   :  { %1854 = vmatmul.bf16.vlgmr.msra.gmra.mxu2 %v1819_v47  ;;  %1867 = vmatmul.bf16.vlgmr.msra.gmra.mxu3 %v1819_v47 }
 0x336   :  { %2068 = vmatpush.bf16.msrb.mxu0 %v4848_v29  ;;  %2081 = vmatpush.bf16.msrb.mxu1 %v4864_v55 }
 0x337   :  { %2094 = vmatpush.bf16.msra.mxu2 %v5100_v1  ;;  %2107 = vmatpush.bf16.msra.mxu3 %v5111_v17 }
 0x33a   :  { %2069 = vmatpush.bf16.msrb.mxu0 %v4866_v44  ;;  %2082 = vmatpush.bf16.msrb.mxu1 %v4905_v4 }
 0x33b   :  { %2095 = vmatpush.bf16.msra.mxu2 %v5116_v20  ;;  %2108 = vmatpush.bf16.msra.mxu3 %v5119_v31 }
 0x33e   :  { %2070 = vmatpush.bf16.msrb.mxu0 %v4926_v22  ;;  %2083 = vmatpush.bf16.msrb.mxu1 %v4940_v37 }
 0x33f   :  { %2096 = vmatpush.bf16.msra.mxu2 %v5141_v30  ;;  %2109 = vmatpush.bf16.msra.mxu3 %v5152_v53 }
 0x342   :  { %2071 = vmatpush.bf16.msrb.mxu0 %v4964_v62  ;;  %2084 = vmatpush.bf16.msrb.mxu1 %v4970_v36 }
 0x343   :  { %2097 = vmatpush.bf16.msra.mxu2 %v5157_v41  ;;  %2110 = vmatpush.bf16.msra.mxu3 %v5162_v45 }
 0x346   :  { %2072 = vmatpush.bf16.msrb.mxu0 %v4992_v39  ;;  %2085 = vmatpush.bf16.msrb.mxu1 %v4998_v33 }
 0x347   :  { %2098 = vmatpush.bf16.msra.mxu2 %v5169_v46  ;;  %2111 = vmatpush.bf16.msra.mxu3 %v5173_v42 }
 0x34a   :  { %2073 = vmatpush.bf16.msrb.mxu0 %v5028_v15  ;;  %2086 = vmatpush.bf16.msrb.mxu1 %v5034_v63 }
 0x34b   :  { %2099 = vmatpush.bf16.msra.mxu2 %v5177_v56  ;;  %2112 = vmatpush.bf16.msra.mxu3 %v5179_v12 }
 0x34e   :  { %2074 = vmatpush.bf16.msrb.mxu0 %v5056_v16  ;;  %2087 = vmatpush.bf16.msrb.mxu1 %v5064_v19 }
 0x34f   :  { %2100 = vmatpush.bf16.msra.mxu2 %v5184_v25  ;;  %2113 = vmatpush.bf16.msra.mxu3 %v5187_v48 }
 0x352   :  { %2075 = vmatpush.bf16.msrb.mxu0 %v5092_v57  ;;  %2088 = vmatpush.bf16.msrb.mxu1 %v5098_v8 }
 0x353   :  { %2101 = vmatpush.bf16.msra.mxu2 %v5197_v61  ;;  %2114 = vmatpush.bf16.msra.mxu3 %v5200_v28 }
 0x3b1   :  { %v1829_v52 = vpop.f32.mrf.mxu0  ;;  %v1842_v5 = vpop.f32.mrf.mxu1 }
 0x3b2   :  { %v1872_v7 = vadd.f32 %v1829_v52, %v5011_v6  ;;  %v1873_v49 = vadd.f32 %v1842_v5, %v5608_v35  ;;  %v5611_v52 = vld [vmem:[#allocation19_spill] sm:$0xff] }
 0x3b3   :  { %v5612_v5 = vld [vmem:[#allocation31_spill] sm:$0xff] }
 0x3b4   :  { %v3763_v2 = vmul.f32 -1.442695, %v1872_v7  ;;  %v3764_v23 = vmul.f32 -1.442695, %v1873_v49  ;;  %v5613_v7 = vsel %vm4895_vm1, %v5611_v52, %v5612_v5 }
 0x3b6   :  { %4363 = vpow2.f32 %v3763_v2 }
 0x3b7   :  { %4365 = vpow2.f32 %v3764_v23 }
 0x3b8   :  { %v1855_v40 = vpop.f32.mrf.mxu2  ;;  %v1868_v51 = vpop.f32.mrf.mxu3 }
 0x3b9   :  { %v1874_v54 = vadd.f32 %v1855_v40, %v5609_v59  ;;  %v1831_v9 = vpop.f32.mrf.mxu0  ;;  %v1844_v6 = vpop.f32.mrf.mxu1  ;;  %v1875_v35 = vadd.f32 %v1868_v51, %v5613_v7 }
 0x3bb   :  { %v3765_v43 = vmul.f32 -1.442695, %v1874_v54 }
 0x3bc   :  { %v4364_v0 = vpop.eup %4363 }
 0x3bd   :  { %v4366_v34 = vpop.eup %4365  ;;  %v1885_v13 = vadd.f32 1.0, %v4364_v0  ;;  %4367 = vpow2.f32 %v3765_v43 }
 0x3be   :  { %v1886_v50 = vadd.f32 1.0, %v4366_v34 }
 0x3bf   :  { %4369 = vrcp.f32 %v1885_v13  ;;  %v1899_v54 = vand.u32 2147483648, %v1885_v13  ;;  %v1897_v43 = vand.u32 2147483647, %v1885_v13  ;;  %vm1893_vm13 = vweird.f32 %v1885_v13 }
 0x3c0   :  { %4371 = vrcp.f32 %v1886_v50  ;;  %v1857_v18 = vpop.f32.mrf.mxu2  ;;  %v1870_v10 = vpop.f32.mrf.mxu3  ;;  %v1914_v9 = vand.u32 2147483648, %v1886_v50  ;;  %v1912_v34 = vand.u32 2147483647, %v1886_v50  ;;  %vm1908_vm14 = vweird.f32 %v1886_v50 }
 0x3c1   :  { %vm1898_vm4 = vcmp.eq.f32.partialorder %v1897_v43, 8.507059e+37 }
 0x3c2   :  { %vm1913_vm5 = vcmp.eq.f32.partialorder %v1912_v34, 8.507059e+37 }
 0x3c3   :  { %v4368_v21 = vpop.eup %4367 }
 0x3c4   :  { %v1887_v32 = vadd.f32 1.0, %v4368_v21  ;;  %v1900_v21 = vor.u32 1.1754944e-38, %v1899_v54 }
 0x3c5   :  { %v4370_v26 = vpop.eup %4369 }
 0x3c6   :  { %v4372_v49 = vpop.eup %4371  ;;  %v1889_v2 = vmul.f32 %v4370_v26, %v1885_v13  ;;  %4373 = vrcp.f32 %v1887_v32  ;;  %vm1894_vm11 = vweird.f32 %v4370_v26  ;;  %v1929_v54 = vand.u32 2147483648, %v1887_v32 }
 0x3c7   :  { %v1904_v23 = vmul.f32 %v4372_v49, %v1886_v50  ;;  %4375 = vtanh.f32 %v1875_v35  ;;  %vm1909_vm12 = vweird.f32 %v4372_v49  ;;  %vm1895_vm15 = vmor %vm1893_vm13, %vm1894_vm11  ;;  %vm1923_vm7 = vweird.f32 %v1887_v32 }
 0x3c8   :  { %v1890_v40 = vsub.f32 1.0, %v1889_v2  ;;  %vm1910_vm2 = vmor %vm1908_vm14, %vm1909_vm12  ;;  %v1915_v2 = vor.u32 1.1754944e-38, %v1914_v9  ;;  %v1930_v43 = vor.u32 1.1754944e-38, %v1929_v54 }
 0x3c9   :  { %v1905_v59 = vsub.f32 1.0, %v1904_v23 }
 0x3ca   :  { %v1891_v6 = vmul.f32 %v4370_v26, %v1890_v40 }
 0x3cb   :  { %v1906_v0 = vmul.f32 %v4372_v49, %v1905_v59 }
 0x3cc   :  { %v4374_v18 = vpop.eup %4373  ;;  %v1892_v10 = vadd.f32 %v4370_v26, %v1891_v6 }
 0x3cd   :  { %v1919_v51 = vmul.f32 %v4374_v18, %v1887_v32  ;;  %v1907_v7 = vadd.f32 %v4372_v49, %v1906_v0  ;;  %v4376_v35 = vpop.eup %4375  ;;  %vm1924_vm6 = vweird.f32 %v4374_v18 }
 0x3ce   :  { %v1896_v23 = vsel %vm1895_vm15, %v4370_v26, %v1892_v10  ;;  %v1927_v26 = vand.u32 2147483647, %v1887_v32  ;;  %vm1925_vm8 = vmor %vm1923_vm7, %vm1924_vm6 }
 0x3cf   :  { %v1920_v14 = vsub.f32 1.0, %v1919_v51  ;;  %v1901_v40 = vsel %vm1898_vm4, %v1900_v21, %v1896_v23  ;;  %v1911_v52 = vsel %vm1910_vm2, %v4372_v49, %v1907_v7 }
 0x3d0   :  { %v1916_v59 = vsel %vm1913_vm5, %v1915_v2, %v1911_v52  ;;  %v1935_v5 = vmul.f32 %v4376_v35, %v1901_v40  ;;  %vm1928_vm9 = vcmp.eq.f32.partialorder %v1927_v26, 8.507059e+37  ;;  %v5618_v35 = vld [vmem:[#allocation21_spill] sm:$0xff]  ;;  %v5619_v40 = vld [vmem:[#allocation24_spill] sm:$0xff] }
 0x3d1   :  { %v1921_v38 = vmul.f32 %v4374_v18, %v1920_v14  ;;  %v1934_v6 = vmul.f32 %v1916_v59, %v5262_v11  ;;  %v5614_v11 = vld [vmem:[#allocation28_spill] sm:$0xff]  ;;  %v5620_v59 = vsel %vm4891_vm0, %v5618_v35, %v5619_v40 }
 0x3d3   :  { %v5314_v13 = vadd.f32 %v1935_v5, %v1934_v6  ;;  %v1922_v50 = vadd.f32 %v4374_v18, %v1921_v38  ;;  %v5615_v5 = vld [vmem:[#allocation26_spill] sm:$0xff] }
 0x3d5   :  { %4377 = vtanh.f32 %v5314_v13  ;;  %v1926_v9 = vsel %vm1925_vm8, %v4374_v18, %v1922_v50  ;;  %v5616_v18 = vld [vmem:[#allocation27_spill] sm:$0xff] }
 0x3d6   :  { %v1931_v0 = vsel %vm1928_vm9, %v1930_v43, %v1926_v9  ;;  %v5617_v10 = vsel %vm4929_vm3, %v5615_v5, %v5616_v18 }
 0x3db   :  { %v4378_v49 = vpop.eup %4377 }
 0x3dc   :  { %v1938_v52 = vmul.f32 %v4378_v49, %v1931_v0 }
 0x3de   :  { %v1943_v34 = vpack.c.bf16 %v1938_v52, %v1938_v52 }
 0x3e0   :  { %1952 = vmatmul.bf16.vlgmr.msra.gmra.mxu0 %v1943_v34  ;;  %1965 = vmatmul.bf16.vlgmr.msra.gmra.mxu1 %v1943_v34 }
 0x3e1   :  { %1978 = vmatmul.bf16.vlgmr.msrb.gmra.mxu2 %v1943_v34  ;;  %1991 = vmatmul.bf16.vlgmr.msrb.gmra.mxu3 %v1943_v34 }
 0x3e2   :  { %2192 = vmatpush.bf16.msra.mxu0 %v4848_v29  ;;  %2205 = vmatpush.bf16.msra.mxu1 %v4864_v55 }
 0x3e3   :  { %2218 = vmatpush.bf16.msrb.mxu2 %v5100_v1  ;;  %2231 = vmatpush.bf16.msrb.mxu3 %v5111_v17 }
 0x3e6   :  { %2193 = vmatpush.bf16.msra.mxu0 %v4866_v44  ;;  %2206 = vmatpush.bf16.msra.mxu1 %v4905_v4 }
 0x3e7   :  { %2219 = vmatpush.bf16.msrb.mxu2 %v5116_v20  ;;  %2232 = vmatpush.bf16.msrb.mxu3 %v5119_v31 }
 0x3ea   :  { %2194 = vmatpush.bf16.msra.mxu0 %v4926_v22  ;;  %2207 = vmatpush.bf16.msra.mxu1 %v4940_v37 }
 0x3eb   :  { %2220 = vmatpush.bf16.msrb.mxu2 %v5141_v30  ;;  %2233 = vmatpush.bf16.msrb.mxu3 %v5152_v53 }
 0x3ee   :  { %2195 = vmatpush.bf16.msra.mxu0 %v4964_v62  ;;  %2208 = vmatpush.bf16.msra.mxu1 %v4970_v36 }
 0x3ef   :  { %2221 = vmatpush.bf16.msrb.mxu2 %v5157_v41  ;;  %2234 = vmatpush.bf16.msrb.mxu3 %v5162_v45 }
 0x3f2   :  { %2196 = vmatpush.bf16.msra.mxu0 %v4992_v39  ;;  %2209 = vmatpush.bf16.msra.mxu1 %v4998_v33 }
 0x3f3   :  { %2222 = vmatpush.bf16.msrb.mxu2 %v5169_v46  ;;  %2235 = vmatpush.bf16.msrb.mxu3 %v5173_v42 }
 0x3f6   :  { %2197 = vmatpush.bf16.msra.mxu0 %v5028_v15  ;;  %2210 = vmatpush.bf16.msra.mxu1 %v5034_v63 }
 0x3f7   :  { %2223 = vmatpush.bf16.msrb.mxu2 %v5177_v56  ;;  %2236 = vmatpush.bf16.msrb.mxu3 %v5179_v12 }
 0x3fa   :  { %2198 = vmatpush.bf16.msra.mxu0 %v5056_v16  ;;  %2211 = vmatpush.bf16.msra.mxu1 %v5064_v19 }
 0x3fb   :  { %2224 = vmatpush.bf16.msrb.mxu2 %v5184_v25  ;;  %2237 = vmatpush.bf16.msrb.mxu3 %v5187_v48 }
 0x3fe   :  { %2199 = vmatpush.bf16.msra.mxu0 %v5092_v57  ;;  %2212 = vmatpush.bf16.msra.mxu1 %v5098_v8 }
 0x3ff   :  { %2225 = vmatpush.bf16.msrb.mxu2 %v5197_v61  ;;  %2238 = vmatpush.bf16.msrb.mxu3 %v5200_v28 }
 0x45d   :  { %v1953_v38 = vpop.f32.mrf.mxu0  ;;  %v1966_v14 = vpop.f32.mrf.mxu1 }
 0x45e   :  { %v1996_v32 = vadd.f32 %v1953_v38, %v5614_v11  ;;  %v1997_v51 = vadd.f32 %v1966_v14, %v5617_v10  ;;  %v5622_v10 = vld [vmem:[#allocation25_spill] sm:$0xff] }
 0x460   :  { %v3766_v21 = vmul.f32 -1.442695, %v1996_v32  ;;  %v3767_v7 = vmul.f32 -1.442695, %v1997_v51  ;;  %v5621_v32 = vld [vmem:[#allocation22_spill] sm:$0xff] }
 0x461   :  { %v5623_v51 = vsel %vm4895_vm1, %v5621_v32, %v5622_v10 }
 0x462   :  { %4379 = vpow2.f32 %v3766_v21 }
 0x463   :  { %4381 = vpow2.f32 %v3767_v7 }
 0x464   :  { %v1979_v2 = vpop.f32.mrf.mxu2  ;;  %v1992_v23 = vpop.f32.mrf.mxu3 }
 0x465   :  { %v1998_v6 = vadd.f32 %v1979_v2, %v5620_v59  ;;  %v1955_v50 = vpop.f32.mrf.mxu0  ;;  %v1968_v54 = vpop.f32.mrf.mxu1  ;;  %v1999_v21 = vadd.f32 %v1992_v23, %v5623_v51 }
 0x467   :  { %v3768_v26 = vmul.f32 -1.442695, %v1998_v6 }
 0x468   :  { %v4380_v9 = vpop.eup %4379 }
 0x469   :  { %v4382_v43 = vpop.eup %4381  ;;  %v2009_v49 = vadd.f32 1.0, %v4380_v9  ;;  %4383 = vpow2.f32 %v3768_v26 }
 0x46a   :  { %v2010_v0 = vadd.f32 1.0, %v4382_v43 }
 0x46b   :  { %4385 = vrcp.f32 %v2009_v49  ;;  %v2023_v54 = vand.u32 2147483648, %v2009_v49  ;;  %v2021_v43 = vand.u32 2147483647, %v2009_v49  ;;  %vm2017_vm12 = vweird.f32 %v2009_v49 }
 0x46c   :  { %4387 = vrcp.f32 %v2010_v0  ;;  %v1981_v52 = vpop.f32.mrf.mxu2  ;;  %v1994_v34 = vpop.f32.mrf.mxu3  ;;  %v2038_v26 = vand.u32 2147483648, %v2010_v0  ;;  %vm2032_vm13 = vweird.f32 %v2010_v0 }
 0x46d   :  { %v2036_v34 = vand.u32 2147483647, %v2010_v0  ;;  %v2024_v51 = vor.u32 1.1754944e-38, %v2023_v54  ;;  %vm2022_vm2 = vcmp.eq.f32.partialorder %v2021_v43, 8.507059e+37 }
 0x46f   :  { %v4384_v38 = vpop.eup %4383  ;;  %vm2037_vm4 = vcmp.eq.f32.partialorder %v2036_v34, 8.507059e+37 }
 0x470   :  { %v2011_v14 = vadd.f32 1.0, %v4384_v38 }
 0x471   :  { %v4386_v11 = vpop.eup %4385 }
 0x472   :  { %v4388_v7 = vpop.eup %4387  ;;  %v2013_v2 = vmul.f32 %v4386_v11, %v2009_v49  ;;  %4389 = vrcp.f32 %v2011_v14  ;;  %vm2018_vm10 = vweird.f32 %v4386_v11  ;;  %v2053_v54 = vand.u32 2147483648, %v2011_v14 }
 0x473   :  { %v2028_v59 = vmul.f32 %v4388_v7, %v2010_v0  ;;  %4391 = vtanh.f32 %v1999_v21  ;;  %vm2033_vm11 = vweird.f32 %v4388_v7  ;;  %vm2019_vm14 = vmor %vm2017_vm12, %vm2018_vm10  ;;  %vm2047_vm6 = vweird.f32 %v2011_v14 }
 0x474   :  { %v2014_v6 = vsub.f32 1.0, %v2013_v2  ;;  %vm2034_vm15 = vmor %vm2032_vm13, %vm2033_vm11  ;;  %v2039_v2 = vor.u32 1.1754944e-38, %v2038_v26  ;;  %v2054_v26 = vor.u32 1.1754944e-38, %v2053_v54 }
 0x475   :  { %v2029_v50 = vsub.f32 1.0, %v2028_v59 }
 0x476   :  { %v2015_v9 = vmul.f32 %v4386_v11, %v2014_v6 }
 0x477   :  { %v2030_v52 = vmul.f32 %v4388_v7, %v2029_v50 }
 0x478   :  { %v4390_v38 = vpop.eup %4389  ;;  %v2016_v58 = vadd.f32 %v4386_v11, %v2015_v9 }
 0x479   :  { %v2043_v23 = vmul.f32 %v4390_v38, %v2011_v14  ;;  %v2031_v60 = vadd.f32 %v4388_v7, %v2030_v52  ;;  %v4392_v21 = vpop.eup %4391  ;;  %vm2048_vm5 = vweird.f32 %v4390_v38 }
 0x47a   :  { %v2020_v59 = vsel %vm2019_vm14, %v4386_v11, %v2016_v58  ;;  %v2051_v58 = vand.u32 2147483647, %v2011_v14  ;;  %vm2049_vm7 = vmor %vm2047_vm6, %vm2048_vm5 }
 0x47b   :  { %v2044_v24 = vsub.f32 1.0, %v2043_v23  ;;  %v2025_v6 = vsel %vm2022_vm2, %v2024_v51, %v2020_v59  ;;  %v2035_v32 = vsel %vm2034_vm15, %v4388_v7, %v2031_v60 }
 0x47c   :  { %v2040_v50 = vsel %vm2037_vm4, %v2039_v2, %v2035_v32  ;;  %v2059_v10 = vmul.f32 %v4392_v21, %v2025_v6  ;;  %vm2052_vm8 = vcmp.eq.f32.partialorder %v2051_v58, 8.507059e+37  ;;  %v5626_v2 = vsel %vm4891_vm0, %v5619_v40, %v5618_v35  ;;  %v5629_v35 = vld [vmem:[#allocation22_spill] sm:$0xff] }
 0x47d   :  { %v2045_v47 = vmul.f32 %v4390_v38, %v2044_v24  ;;  %v2058_v9 = vmul.f32 %v2040_v50, %v5314_v13  ;;  %v5624_v13 = vld [vmem:[#allocation29_spill] sm:$0xff] }
 0x47f   :  { %v5366_v49 = vadd.f32 %v2059_v10, %v2058_v9  ;;  %v2046_v0 = vadd.f32 %v4390_v38, %v2045_v47  ;;  %v5625_v10 = vsel %vm4929_vm3, %v5616_v18, %v5615_v5 }
 0x481   :  { %4393 = vtanh.f32 %v5366_v49  ;;  %v2050_v11 = vsel %vm2049_vm7, %v4390_v38, %v2046_v0 }
 0x482   :  { %v2055_v7 = vsel %vm2052_vm8, %v2054_v26, %v2050_v11 }
 0x487   :  { %v4394_v60 = vpop.eup %4393 }
 0x488   :  { %v2062_v32 = vmul.f32 %v4394_v60, %v2055_v7 }
 0x48a   :  { %v2067_v43 = vpack.c.bf16 %v2062_v32, %v2062_v32  ;;  %v5628_v32 = vld [vmem:[#allocation25_spill] sm:$0xff] }
 0x48b   :  { %v5630_v40 = vsel %vm4895_vm1, %v5628_v32, %v5629_v35 }
 0x48c   :  { %2076 = vmatmul.bf16.vlgmr.msrb.gmra.mxu0 %v2067_v43  ;;  %2089 = vmatmul.bf16.vlgmr.msrb.gmra.mxu1 %v2067_v43 }
 0x48d   :  { %2102 = vmatmul.bf16.vlgmr.msra.gmra.mxu2 %v2067_v43  ;;  %2115 = vmatmul.bf16.vlgmr.msra.gmra.mxu3 %v2067_v43 }
 0x48e   :  { %2316 = vmatpush.bf16.msrb.mxu0 %v4848_v29  ;;  %2329 = vmatpush.bf16.msrb.mxu1 %v4864_v55 }
 0x48f   :  { %2342 = vmatpush.bf16.msra.mxu2 %v5100_v1  ;;  %2355 = vmatpush.bf16.msra.mxu3 %v5111_v17 }
 0x492   :  { %2317 = vmatpush.bf16.msrb.mxu0 %v4866_v44  ;;  %2330 = vmatpush.bf16.msrb.mxu1 %v4905_v4 }
 0x493   :  { %2343 = vmatpush.bf16.msra.mxu2 %v5116_v20  ;;  %2356 = vmatpush.bf16.msra.mxu3 %v5119_v31 }
 0x496   :  { %2318 = vmatpush.bf16.msrb.mxu0 %v4926_v22  ;;  %2331 = vmatpush.bf16.msrb.mxu1 %v4940_v37 }
 0x497   :  { %2344 = vmatpush.bf16.msra.mxu2 %v5141_v30  ;;  %2357 = vmatpush.bf16.msra.mxu3 %v5152_v53 }
 0x49a   :  { %2319 = vmatpush.bf16.msrb.mxu0 %v4964_v62  ;;  %2332 = vmatpush.bf16.msrb.mxu1 %v4970_v36 }
 0x49b   :  { %2345 = vmatpush.bf16.msra.mxu2 %v5157_v41  ;;  %2358 = vmatpush.bf16.msra.mxu3 %v5162_v45 }
 0x49e   :  { %2320 = vmatpush.bf16.msrb.mxu0 %v4992_v39  ;;  %2333 = vmatpush.bf16.msrb.mxu1 %v4998_v33 }
 0x49f   :  { %2346 = vmatpush.bf16.msra.mxu2 %v5169_v46  ;;  %2359 = vmatpush.bf16.msra.mxu3 %v5173_v42 }
 0x4a2   :  { %2321 = vmatpush.bf16.msrb.mxu0 %v5028_v15  ;;  %2334 = vmatpush.bf16.msrb.mxu1 %v5034_v63 }
 0x4a3   :  { %2347 = vmatpush.bf16.msra.mxu2 %v5177_v56  ;;  %2360 = vmatpush.bf16.msra.mxu3 %v5179_v12 }
 0x4a6   :  { %2322 = vmatpush.bf16.msrb.mxu0 %v5056_v16  ;;  %2335 = vmatpush.bf16.msrb.mxu1 %v5064_v19 }
 0x4a7   :  { %2348 = vmatpush.bf16.msra.mxu2 %v5184_v25  ;;  %2361 = vmatpush.bf16.msra.mxu3 %v5187_v48 }
 0x4aa   :  { %2323 = vmatpush.bf16.msrb.mxu0 %v5092_v57  ;;  %2336 = vmatpush.bf16.msrb.mxu1 %v5098_v8 }
 0x4ab   :  { %2349 = vmatpush.bf16.msra.mxu2 %v5197_v61  ;;  %2362 = vmatpush.bf16.msra.mxu3 %v5200_v28 }
 0x509   :  { %v2077_v24 = vpop.f32.mrf.mxu0  ;;  %v2090_v47 = vpop.f32.mrf.mxu1 }
 0x50a   :  { %v2120_v14 = vadd.f32 %v2077_v24, %v5624_v13  ;;  %v2121_v52 = vadd.f32 %v2090_v47, %v5625_v10 }
 0x50c   :  { %v3769_v34 = vmul.f32 -1.442695, %v2120_v14  ;;  %v3770_v38 = vmul.f32 -1.442695, %v2121_v52 }
 0x50e   :  { %4395 = vpow2.f32 %v3769_v34 }
 0x50f   :  { %4397 = vpow2.f32 %v3770_v38 }
 0x510   :  { %v2103_v23 = vpop.f32.mrf.mxu2  ;;  %v2116_v51 = vpop.f32.mrf.mxu3 }
 0x511   :  { %v2122_v59 = vadd.f32 %v2103_v23, %v5626_v2  ;;  %v2079_v21 = vpop.f32.mrf.mxu0  ;;  %v2092_v6 = vpop.f32.mrf.mxu1  ;;  %v2123_v43 = vadd.f32 %v2116_v51, %v5630_v40 }
 0x513   :  { %v3771_v50 = vmul.f32 -1.442695, %v2122_v59 }
 0x514   :  { %v4396_v9 = vpop.eup %4395 }
 0x515   :  { %v4398_v0 = vpop.eup %4397  ;;  %v2133_v54 = vadd.f32 1.0, %v4396_v9  ;;  %4399 = vpow2.f32 %v3771_v50 }
 0x516   :  { %v2134_v5 = vadd.f32 1.0, %v4398_v0 }
 0x517   :  { %4401 = vrcp.f32 %v2133_v54  ;;  %v2147_v52 = vand.u32 2147483648, %v2133_v54  ;;  %v2145_v23 = vand.u32 2147483647, %v2133_v54  ;;  %vm2141_vm11 = vweird.f32 %v2133_v54 }
 0x518   :  { %4403 = vrcp.f32 %v2134_v5  ;;  %v2105_v18 = vpop.f32.mrf.mxu2  ;;  %v2118_v58 = vpop.f32.mrf.mxu3  ;;  %v2162_v34 = vand.u32 2147483648, %v2134_v5  ;;  %v2160_v59 = vand.u32 2147483647, %v2134_v5  ;;  %vm2156_vm12 = vweird.f32 %v2134_v5 }
 0x519   :  { %v2148_v50 = vor.u32 1.1754944e-38, %v2147_v52  ;;  %vm2146_vm15 = vcmp.eq.f32.partialorder %v2145_v23, 8.507059e+37 }
 0x51a   :  { %v2163_v0 = vor.u32 1.1754944e-38, %v2162_v34  ;;  %vm2161_vm2 = vcmp.eq.f32.partialorder %v2160_v59, 8.507059e+37 }
 0x51b   :  { %v4400_v11 = vpop.eup %4399 }
 0x51c   :  { %v2135_v26 = vadd.f32 1.0, %v4400_v11 }
 0x51d   :  { %v4402_v60 = vpop.eup %4401 }
 0x51e   :  { %v4404_v24 = vpop.eup %4403  ;;  %v2137_v47 = vmul.f32 %v4402_v60, %v2133_v54  ;;  %4405 = vrcp.f32 %v2135_v26  ;;  %vm2142_vm9 = vweird.f32 %v4402_v60  ;;  %vm2171_vm5 = vweird.f32 %v2135_v26 }
 0x51f   :  { %v2152_v13 = vmul.f32 %v4404_v24, %v2134_v5  ;;  %4407 = vtanh.f32 %v2123_v43  ;;  %vm2157_vm10 = vweird.f32 %v4404_v24  ;;  %vm2143_vm13 = vmor %vm2141_vm11, %vm2142_vm9 }
 0x520   :  { %v2138_v14 = vsub.f32 1.0, %v2137_v47  ;;  %vm2158_vm14 = vmor %vm2156_vm12, %vm2157_vm10 }
 0x521   :  { %v2153_v10 = vsub.f32 1.0, %v2152_v13 }
 0x522   :  { %v2139_v38 = vmul.f32 %v4402_v60, %v2138_v14  ;;  %v2177_v14 = vand.u32 2147483648, %v2135_v26 }
 0x523   :  { %v2154_v2 = vmul.f32 %v4404_v24, %v2153_v10 }
 0x524   :  { %v4406_v21 = vpop.eup %4405  ;;  %v2140_v6 = vadd.f32 %v4402_v60, %v2139_v38  ;;  %v2178_v52 = vor.u32 1.1754944e-38, %v2177_v14 }
 0x525   :  { %v2167_v51 = vmul.f32 %v4406_v21, %v2135_v26  ;;  %v2155_v9 = vadd.f32 %v4404_v24, %v2154_v2  ;;  %v4408_v58 = vpop.eup %4407  ;;  %vm2172_vm4 = vweird.f32 %v4406_v21 }
 0x526   :  { %v2144_v18 = vsel %vm2143_vm13, %v4402_v60, %v2140_v6  ;;  %v2175_v60 = vand.u32 2147483647, %v2135_v26  ;;  %vm2173_vm6 = vmor %vm2171_vm5, %vm2172_vm4 }
 0x527   :  { %v2168_v11 = vsub.f32 1.0, %v2167_v51  ;;  %v2149_v32 = vsel %vm2146_vm15, %v2148_v50, %v2144_v18  ;;  %v2159_v35 = vsel %vm2158_vm14, %v4404_v24, %v2155_v9 }
 0x528   :  { %v2164_v40 = vsel %vm2161_vm2, %v2163_v0, %v2159_v35  ;;  %v2183_v43 = vmul.f32 %v4408_v58, %v2149_v32  ;;  %vm2176_vm7 = vcmp.eq.f32.partialorder %v2175_v60, 8.507059e+37 }
 0x529   :  { %v2169_v47 = vmul.f32 %v4406_v21, %v2168_v11  ;;  %v2182_v13 = vmul.f32 %v2164_v40, %v5366_v49 }
 0x52b   :  { %v5418_v54 = vadd.f32 %v2183_v43, %v2182_v13  ;;  %v2170_v5 = vadd.f32 %v4406_v21, %v2169_v47 }
 0x52d   :  { %4409 = vtanh.f32 %v5418_v54  ;;  %v2174_v10 = vsel %vm2173_vm6, %v4406_v21, %v2170_v5 }
 0x52e   :  { %v2179_v34 = vsel %vm2176_vm7, %v2178_v52, %v2174_v10 }
 0x533   :  { %v4410_v24 = vpop.eup %4409 }
 0x534   :  { %v2186_v38 = vmul.f32 %v4410_v24, %v2179_v34 }
 0x536   :  { %v2191_v23 = vpack.c.bf16 %v2186_v38, %v2186_v38 }
 0x538   :  { %2200 = vmatmul.bf16.vlgmr.msra.gmra.mxu0 %v2191_v23  ;;  %2213 = vmatmul.bf16.vlgmr.msra.gmra.mxu1 %v2191_v23 }
 0x539   :  { %2226 = vmatmul.bf16.vlgmr.msrb.gmra.mxu2 %v2191_v23  ;;  %2239 = vmatmul.bf16.vlgmr.msrb.gmra.mxu3 %v2191_v23 }
 0x53a   :  { %2440 = vmatpush.bf16.msra.mxu0 %v4848_v29  ;;  %2453 = vmatpush.bf16.msra.mxu1 %v4864_v55 }
 0x53b   :  { %2466 = vmatpush.bf16.msrb.mxu2 %v5100_v1  ;;  %2479 = vmatpush.bf16.msrb.mxu3 %v5111_v17 }
 0x53e   :  { %2441 = vmatpush.bf16.msra.mxu0 %v4866_v44  ;;  %2454 = vmatpush.bf16.msra.mxu1 %v4905_v4  ;;  %v5631_v44 = vld [vmem:[#allocation34_spill] sm:$0xff] }
 0x53f   :  { %2467 = vmatpush.bf16.msrb.mxu2 %v5116_v20  ;;  %2480 = vmatpush.bf16.msrb.mxu3 %v5119_v31 }
 0x542   :  { %2442 = vmatpush.bf16.msra.mxu0 %v4926_v22  ;;  %2455 = vmatpush.bf16.msra.mxu1 %v4940_v37 }
 0x543   :  { %2468 = vmatpush.bf16.msrb.mxu2 %v5141_v30  ;;  %2481 = vmatpush.bf16.msrb.mxu3 %v5152_v53 }
 0x546   :  { %2443 = vmatpush.bf16.msra.mxu0 %v4964_v62  ;;  %2456 = vmatpush.bf16.msra.mxu1 %v4970_v36 }
 0x547   :  { %2469 = vmatpush.bf16.msrb.mxu2 %v5157_v41  ;;  %2482 = vmatpush.bf16.msrb.mxu3 %v5162_v45 }
 0x54a   :  { %2444 = vmatpush.bf16.msra.mxu0 %v4992_v39  ;;  %2457 = vmatpush.bf16.msra.mxu1 %v4998_v33 }
 0x54b   :  { %2470 = vmatpush.bf16.msrb.mxu2 %v5169_v46  ;;  %2483 = vmatpush.bf16.msrb.mxu3 %v5173_v42 }
 0x54e   :  { %2445 = vmatpush.bf16.msra.mxu0 %v5028_v15  ;;  %2458 = vmatpush.bf16.msra.mxu1 %v5034_v63  ;;  %v5635_v63 = vld [vmem:[#allocation30_spill] sm:$0xff] }
 0x54f   :  { %2471 = vmatpush.bf16.msrb.mxu2 %v5177_v56  ;;  %2484 = vmatpush.bf16.msrb.mxu3 %v5179_v12  ;;  %v5638_v56 = vld [vmem:[#allocation31_spill] sm:$0xff] }
 0x550   :  { %v5639_v12 = vld [vmem:[#allocation19_spill] sm:$0xff] }
 0x552   :  { %2446 = vmatpush.bf16.msra.mxu0 %v5056_v16  ;;  %2459 = vmatpush.bf16.msra.mxu1 %v5064_v19  ;;  %v5632_v16 = vld [vmem:[#allocation32_spill] sm:$0xff] }
 0x553   :  { %2472 = vmatpush.bf16.msrb.mxu2 %v5184_v25  ;;  %2485 = vmatpush.bf16.msrb.mxu3 %v5187_v48  ;;  %v5633_v19 = vld [vmem:[#allocation20_spill] sm:$0xff]  ;;  %v5640_v25 = vsel %vm4895_vm1, %v5638_v56, %v5639_v12 }
 0x554   :  { %v5634_v22 = vsel %vm4929_vm3, %v5632_v16, %v5633_v19 }
 0x556   :  { %2447 = vmatpush.bf16.msra.mxu0 %v5092_v57  ;;  %2460 = vmatpush.bf16.msra.mxu1 %v5098_v8 }
 0x557   :  { %2473 = vmatpush.bf16.msrb.mxu2 %v5197_v61  ;;  %2486 = vmatpush.bf16.msrb.mxu3 %v5200_v28  ;;  %v5636_v28 = vld [vmem:[#allocation18_spill] sm:$0xff] }
 0x558   :  { %v5637_v39 = vsel %vm4891_vm0, %v5635_v63, %v5636_v28  ;;  %v5643_v63 = vld [vmem:[#allocation38_spill] sm:$0xff] }
 0x5b5   :  { %v2201_v29 = vpop.f32.mrf.mxu0  ;;  %v2214_v55 = vpop.f32.mrf.mxu1 }
 0x5b6   :  { %v2244_v4 = vadd.f32 %v2201_v29, %v5631_v44  ;;  %v2245_v37 = vadd.f32 %v2214_v55, %v5634_v22 }
 0x5b8   :  { %v3772_v62 = vmul.f32 -1.442695, %v2244_v4  ;;  %v3773_v48 = vmul.f32 -1.442695, %v2245_v37 }
 0x5ba   :  { %4411 = vpow2.f32 %v3772_v62 }
 0x5bb   :  { %4413 = vpow2.f32 %v3773_v48  ;;  %v5641_v48 = vld [vmem:[#allocation40_spill] sm:$0xff] }
 0x5bc   :  { %v2227_v36 = vpop.f32.mrf.mxu2  ;;  %v2240_v57 = vpop.f32.mrf.mxu3 }
 0x5bd   :  { %v2246_v33 = vadd.f32 %v2227_v36, %v5637_v39  ;;  %v2203_v8 = vpop.f32.mrf.mxu0  ;;  %v2216_v15 = vpop.f32.mrf.mxu1  ;;  %v2247_v61 = vadd.f32 %v2240_v57, %v5640_v25  ;;  %v5642_v57 = vld [vmem:[#allocation37_spill] sm:$0xff] }
 0x5be   :  { %v5644_v28 = vsel %vm4929_vm3, %v5642_v57, %v5643_v63 }
 0x5bf   :  { %v3774_v31 = vmul.f32 -1.442695, %v2246_v33 }
 0x5c0   :  { %v4412_v1 = vpop.eup %4411 }
 0x5c1   :  { %v4414_v17 = vpop.eup %4413  ;;  %v2257_v20 = vadd.f32 1.0, %v4412_v1  ;;  %4415 = vpow2.f32 %v3774_v31  ;;  %v5645_v1 = vld [vmem:[#allocation35_spill] sm:$0xff] }
 0x5c2   :  { %v2258_v30 = vadd.f32 1.0, %v4414_v17  ;;  %v5646_v17 = vld [vmem:[#allocation33_spill] sm:$0xff] }
 0x5c3   :  { %4417 = vrcp.f32 %v2257_v20  ;;  %v2271_v6 = vand.u32 2147483648, %v2257_v20  ;;  %v2269_v9 = vand.u32 2147483647, %v2257_v20  ;;  %vm2265_vm10 = vweird.f32 %v2257_v20 }
 0x5c4   :  { %4419 = vrcp.f32 %v2258_v30  ;;  %v2229_v53 = vpop.f32.mrf.mxu2  ;;  %v2242_v41 = vpop.f32.mrf.mxu3  ;;  %v2286_v51 = vand.u32 2147483648, %v2258_v30  ;;  %v2284_v18 = vand.u32 2147483647, %v2258_v30  ;;  %vm2280_vm11 = vweird.f32 %v2258_v30 }
 0x5c5   :  { %v2272_v35 = vor.u32 1.1754944e-38, %v2271_v6  ;;  %vm2270_vm14 = vcmp.eq.f32.partialorder %v2269_v9, 8.507059e+37 }
 0x5c6   :  { %v2287_v43 = vor.u32 1.1754944e-38, %v2286_v51  ;;  %vm2285_vm15 = vcmp.eq.f32.partialorder %v2284_v18, 8.507059e+37 }
 0x5c7   :  { %v4416_v45 = vpop.eup %4415 }
 0x5c8   :  { %v2259_v46 = vadd.f32 1.0, %v4416_v45 }
 0x5c9   :  { %v4418_v42 = vpop.eup %4417 }
 0x5ca   :  { %v4420_v49 = vpop.eup %4419  ;;  %v2261_v26 = vmul.f32 %v4418_v42, %v2257_v20  ;;  %4421 = vrcp.f32 %v2259_v46  ;;  %vm2266_vm8 = vweird.f32 %v4418_v42  ;;  %v2301_v29 = vand.u32 2147483648, %v2259_v46 }
 0x5cb   :  { %v2276_v2 = vmul.f32 %v4420_v49, %v2258_v30  ;;  %4423 = vtanh.f32 %v2247_v61  ;;  %vm2281_vm9 = vweird.f32 %v4420_v49  ;;  %vm2267_vm12 = vmor %vm2265_vm10, %vm2266_vm8  ;;  %vm2295_vm4 = vweird.f32 %v2259_v46 }
 0x5cc   :  { %v2262_v59 = vsub.f32 1.0, %v2261_v26  ;;  %vm2282_vm13 = vmor %vm2280_vm11, %vm2281_vm9  ;;  %v2299_v55 = vand.u32 2147483647, %v2259_v46  ;;  %v2302_v4 = vor.u32 1.1754944e-38, %v2301_v29  ;;  %v5647_v20 = vsel %vm4891_vm0, %v5645_v1, %v5646_v17  ;;  %v3875_v1 = vld [vmem:[#allocation6 + $0x230] sm:$0xf] }
 0x5cd   :  { %v2277_v21 = vsub.f32 1.0, %v2276_v2  ;;  %v4211_v17 = vld [vmem:[#allocation6 + $0x238] sm:$0xf0] }
 0x5ce   :  { %v2263_v50 = vmul.f32 %v4418_v42, %v2262_v59  ;;  %vm2300_vm6 = vcmp.eq.f32.partialorder %v2299_v55, 8.507059e+37  ;;  %v5648_v59 = vld [vmem:[#allocation36_spill] sm:$0xff] }
 0x5cf   :  { %v2278_v0 = vmul.f32 %v4420_v49, %v2277_v21  ;;  %v5649_v21 = vld [vmem:[#allocation17_spill] sm:$0xff] }
 0x5d0   :  { %v4422_v58 = vpop.eup %4421  ;;  %v2264_v11 = vadd.f32 %v4418_v42, %v2263_v50  ;;  %v5650_v6 = vsel %vm4895_vm1, %v5648_v59, %v5649_v21  ;;  %v3845_v21 = vld [vmem:[#allocation6 + $0x204] sm:$0xf0] }
 0x5d1   :  { %v2291_v32 = vmul.f32 %v4422_v58, %v2259_v46  ;;  %v2279_v40 = vadd.f32 %v4420_v49, %v2278_v0  ;;  %v4424_v13 = vpop.eup %4423  ;;  %vm2296_vm2 = vweird.f32 %v4422_v58 }
 0x5d2   :  { %v2268_v47 = vsel %vm2267_vm12, %v4418_v42, %v2264_v11  ;;  %vm2297_vm5 = vmor %vm2295_vm4, %vm2296_vm2 }
 0x5d3   :  { %v2292_v5 = vsub.f32 1.0, %v2291_v32  ;;  %v2273_v14 = vsel %vm2270_vm14, %v2272_v35, %v2268_v47  ;;  %v2283_v60 = vsel %vm2282_vm13, %v4420_v49, %v2279_v40 }
 0x5d4   :  { %v2288_v10 = vsel %vm2285_vm15, %v2287_v43, %v2283_v60  ;;  %v2307_v52 = vmul.f32 %v4424_v13, %v2273_v14 }
 0x5d5   :  { %v2293_v24 = vmul.f32 %v4422_v58, %v2292_v5  ;;  %v2306_v34 = vmul.f32 %v2288_v10, %v5418_v54 }
 0x5d7   :  { %v5470_v38 = vadd.f32 %v2307_v52, %v2306_v34  ;;  %v2294_v23 = vadd.f32 %v4422_v58, %v2293_v24 }
 0x5d9   :  { %4425 = vtanh.f32 %v5470_v38  ;;  %v2298_v44 = vsel %vm2297_vm5, %v4422_v58, %v2294_v23 }
 0x5da   :  { %v2303_v19 = vsel %vm2300_vm6, %v2302_v4, %v2298_v44 }
 0x5df   :  { %v4426_v16 = vpop.eup %4425 }
 0x5e0   :  { %v2310_v22 = vmul.f32 %v4426_v16, %v2303_v19 }
 0x5e2   :  { %v2315_v37 = vpack.c.bf16 %v2310_v22, %v2310_v22 }
 0x5e4   :  { %2324 = vmatmul.bf16.vlgmr.msrb.gmra.mxu0 %v2315_v37  ;;  %2337 = vmatmul.bf16.vlgmr.msrb.gmra.mxu1 %v2315_v37 }
 0x5e5   :  { %2350 = vmatmul.bf16.vlgmr.msra.gmra.mxu2 %v2315_v37  ;;  %2363 = vmatmul.bf16.vlgmr.msra.gmra.mxu3 %v2315_v37 }
 0x661   :  { %v2325_v54 = vpop.f32.mrf.mxu0  ;;  %v2338_v62 = vpop.f32.mrf.mxu1 }
 0x662   :  { %v2368_v36 = vadd.f32 %v2325_v54, %v5641_v48  ;;  %v2369_v39 = vadd.f32 %v2338_v62, %v5644_v28 }
 0x664   :  { %v3775_v33 = vmul.f32 -1.442695, %v2368_v36  ;;  %v3776_v8 = vmul.f32 -1.442695, %v2369_v39 }
 0x666   :  { %4427 = vpow2.f32 %v3775_v33  ;;  %v4210_v33 = vld [vmem:[#allocation6 + $0x230] sm:$0xf0] }
 0x667   :  { %4429 = vpow2.f32 %v3776_v8  ;;  %v4209_v8 = vld [vmem:[#allocation6 + $0x22c] sm:$0xf] }
 0x668   :  { %v2351_v15 = vpop.f32.mrf.mxu2  ;;  %v2364_v31 = vpop.f32.mrf.mxu3 }
 0x669   :  { %v2370_v30 = vadd.f32 %v2351_v15, %v5647_v20  ;;  %v2327_v53 = vpop.f32.mrf.mxu0  ;;  %v2340_v41 = vpop.f32.mrf.mxu1  ;;  %v2371_v51 = vadd.f32 %v2364_v31, %v5650_v6  ;;  %v3869_v31 = vld [vmem:[#allocation6 + $0x234] sm:$0xf0]  ;;  %v3851_v6 = vld [vmem:[#allocation6 + $0x200] sm:$0xf] }
 0x66a   :  { %v3872_v20 = vor.u32 %v4209_v8, %v3869_v31  ;;  %v3855_v53 = vld [vmem:[#allocation6 + $0x210] sm:$0xf]  ;;  %v4207_v41 = vld [vmem:[#allocation6 + $0x218] sm:$0xf0]  ;;  %v4196_v8 = vld [vmem:[#allocation6 + $0x1c0] sm:$0xf0] }
 0x66b   :  { %v3777_v45 = vmul.f32 -1.442695, %v2370_v30  ;;  %v3876_v30 = vor.u32 %v4211_v17, %v3875_v1  ;;  %v4192_v31 = vld [vmem:[#allocation6 + $0x1a0] sm:$0xf0]  ;;  %v4191_v1 = vld [vmem:[#allocation6 + $0x19c] sm:$0xf] }
 0x66c   :  { %v4428_v46 = vpop.eup %4427  ;;  %2742 = vmatpush.bf16.msrb.mxu1 %v3872_v20  ;;  %v3797_v17 = vld [vmem:[#allocation6 + $0x1a4] sm:$0xf0] }
 0x66d   :  { %v4430_v42 = vpop.eup %4429  ;;  %v2381_v56 = vadd.f32 1.0, %v4428_v46  ;;  %4431 = vpow2.f32 %v3777_v45  ;;  %2755 = vmatpush.bf16.msra.mxu2 %v3876_v30  ;;  %v4206_v45 = vld [vmem:[#allocation6 + $0x214] sm:$0xf]  ;;  %v3856_v46 = vor.u32 %v4207_v41, %v3855_v53  ;;  %v3800_v30 = vor.u32 %v4191_v1, %v3797_v17  ;;  %v3803_v53 = vld [vmem:[#allocation6 + $0x1a0] sm:$0xf] }
 0x66e   :  { %v2382_v12 = vadd.f32 1.0, %v4430_v42  ;;  %v3857_v42 = vld [vmem:[#allocation6 + $0x21c] sm:$0xf0]  ;;  %v4193_v41 = vld [vmem:[#allocation6 + $0x1a8] sm:$0xf0] }
 0x66f   :  { %4433 = vrcp.f32 %v2381_v56  ;;  %v2395_v11 = vand.u32 2147483648, %v2381_v56  ;;  %v2393_v40 = vand.u32 2147483647, %v2381_v56  ;;  %vm2389_vm9 = vweird.f32 %v2381_v56 }
 0x670   :  { %4435 = vrcp.f32 %v2382_v12  ;;  %v2353_v25 = vpop.f32.mrf.mxu2  ;;  %v2366_v61 = vpop.f32.mrf.mxu3  ;;  %v2410_v32 = vand.u32 2147483648, %v2382_v12  ;;  %v2408_v47 = vand.u32 2147483647, %v2382_v12  ;;  %vm2404_vm10 = vweird.f32 %v2382_v12 }
 0x671   :  { %v2396_v60 = vor.u32 1.1754944e-38, %v2395_v11  ;;  %vm2394_vm13 = vcmp.eq.f32.partialorder %v2393_v40, 8.507059e+37  ;;  %v3860_v25 = vor.u32 %v4206_v45, %v3857_v42  ;;  %v4202_v40 = vld [vmem:[#allocation6 + $0x1f0] sm:$0xf0]  ;;  %v3783_v45 = vld [vmem:[#allocation6 + $0x180] sm:$0xf] }
 0x672   :  { %v2411_v52 = vor.u32 1.1754944e-38, %v2410_v32  ;;  %vm2409_vm14 = vcmp.eq.f32.partialorder %v2408_v47, 8.507059e+37  ;;  %v3833_v32 = vld [vmem:[#allocation6 + $0x1ec] sm:$0xf0] }
 0x673   :  { %v4432_v49 = vpop.eup %4431  ;;  %2743 = vmatpush.bf16.msrb.mxu1 %v3860_v25  ;;  %v4188_v25 = vld [vmem:[#allocation6 + $0x184] sm:$0xf] }
 0x674   :  { %v2383_v26 = vadd.f32 1.0, %v4432_v49  ;;  %v3843_v49 = vld [vmem:[#allocation6 + $0x1f8] sm:$0xf] }
 0x675   :  { %v4434_v2 = vpop.eup %4433 }
 0x676   :  { %v4436_v50 = vpop.eup %4435  ;;  %v2385_v9 = vmul.f32 %v4434_v2, %v2381_v56  ;;  %4437 = vrcp.f32 %v2383_v26  ;;  %vm2390_vm7 = vweird.f32 %v4434_v2  ;;  %v2425_v54 = vand.u32 2147483648, %v2383_v26  ;;  %v3863_v56 = vld [vmem:[#allocation6 + $0x218] sm:$0xf] }
 0x677   :  { %v2400_v0 = vmul.f32 %v4436_v50, %v2382_v12  ;;  %4439 = vtanh.f32 %v2371_v51  ;;  %vm2405_vm8 = vweird.f32 %v4436_v50  ;;  %vm2391_vm11 = vmor %vm2389_vm9, %vm2390_vm7  ;;  %vm2419_vm2 = vweird.f32 %v2383_v26  ;;  %v4208_v12 = vld [vmem:[#allocation6 + $0x220] sm:$0xf0]  ;;  %v4205_v51 = vld [vmem:[#allocation6 + $0x208] sm:$0xf0] }
 0x678   :  { %v2386_v18 = vsub.f32 1.0, %v2385_v9  ;;  %vm2406_vm12 = vmor %vm2404_vm10, %vm2405_vm8  ;;  %v2423_v62 = vand.u32 2147483647, %v2383_v26  ;;  %v2426_v36 = vor.u32 1.1754944e-38, %v2425_v54  ;;  %v3864_v61 = vor.u32 %v4208_v12, %v3863_v56  ;;  %v4189_v12 = vld [vmem:[#allocation6 + $0x188] sm:$0xf0] }
 0x679   :  { %v2401_v58 = vsub.f32 1.0, %v2400_v0  ;;  %v3852_v9 = vor.u32 %v4205_v51, %v3851_v6  ;;  %v3831_v0 = vld [vmem:[#allocation6 + $0x1e0] sm:$0xf]  ;;  %v3804_v56 = vor.u32 %v4193_v41, %v3803_v53  ;;  %v3791_v51 = vld [vmem:[#allocation6 + $0x188] sm:$0xf] }
 0x67a   :  { %v2387_v35 = vmul.f32 %v4434_v2, %v2386_v18  ;;  %vm2424_vm5 = vcmp.eq.f32.partialorder %v2423_v62, 8.507059e+37  ;;  %2756 = vmatpush.bf16.msra.mxu2 %v3864_v61  ;;  %v4201_v18 = vld [vmem:[#allocation6 + $0x1e8] sm:$0xf0]  ;;  %v3807_v62 = vld [vmem:[#allocation6 + $0x1b0] sm:$0xf] }
 0x67b   :  { %v2402_v43 = vmul.f32 %v4436_v50, %v2401_v58  ;;  %v4200_v58 = vld [vmem:[#allocation6 + $0x1e4] sm:$0xf]  ;;  %v3832_v11 = vor.u32 %v4201_v18, %v3831_v0  ;;  %v3785_v61 = vld [vmem:[#allocation6 + $0x18c] sm:$0xf0] }
 0x67c   :  { %v4438_v13 = vpop.eup %4437  ;;  %v2388_v5 = vadd.f32 %v4434_v2, %v2387_v35  ;;  %v3839_v35 = vld [vmem:[#allocation6 + $0x1e8] sm:$0xf]  ;;  %v3788_v18 = vor.u32 %v4188_v25, %v3785_v61  ;;  %v4233_v61 = vld [vmem:[#allocation6 + $0x2ec] sm:$0xf] }
 0x67d   :  { %v2415_v14 = vmul.f32 %v4438_v13, %v2383_v26  ;;  %v2403_v10 = vadd.f32 %v4436_v50, %v2402_v43  ;;  %v4440_v34 = vpop.eup %4439  ;;  %vm2420_vm15 = vweird.f32 %v4438_v13  ;;  %v4204_v26 = vld [vmem:[#allocation6 + $0x200] sm:$0xf0]  ;;  %v3836_v43 = vor.u32 %v4200_v58, %v3833_v32  ;;  %v3964_v25 = vld [vmem:[#allocation6 + $0x2e8] sm:$0xf] }
 0x67e   :  { %v2392_v24 = vsel %vm2391_vm11, %v4434_v2, %v2388_v5  ;;  %vm2421_vm4 = vmor %vm2419_vm2, %vm2420_vm15  ;;  %v4203_v2 = vld [vmem:[#allocation6 + $0x1fc] sm:$0xf]  ;;  %v3844_v59 = vor.u32 %v4204_v26, %v3843_v49  ;;  %2757 = vmatpush.bf16.msra.mxu2 %v3852_v9  ;;  %v3840_v47 = vor.u32 %v4202_v40, %v3839_v35  ;;  %v4198_v5 = vld [vmem:[#allocation6 + $0x1d0] sm:$0xf0]  ;;  %v3784_v9 = vor.u32 %v4189_v12, %v3783_v45 }
 0x67f   :  { %v2416_v23 = vsub.f32 1.0, %v2415_v14  ;;  %v2397_v29 = vsel %vm2394_vm13, %v2396_v60, %v2392_v24  ;;  %v2407_v55 = vsel %vm2406_vm12, %v4436_v50, %v2403_v10  ;;  %v3848_v50 = vor.u32 %v4203_v2, %v3845_v21  ;;  %v4197_v14 = vld [vmem:[#allocation6 + $0x1cc] sm:$0xf]  ;;  %v3821_v10 = vld [vmem:[#allocation6 + $0x1d4] sm:$0xf0]  ;;  %v5655_v49 = vld [vmem:[#allocation41_spill] sm:$0xff] }
 0x680   :  { %v2412_v44 = vsel %vm2409_vm14, %v2411_v52, %v2407_v55  ;;  %v2431_v4 = vmul.f32 %v4440_v34, %v2397_v29  ;;  %v3827_v52 = vld [vmem:[#allocation6 + $0x1d0] sm:$0xf]  ;;  %v4199_v24 = vld [vmem:[#allocation6 + $0x1d8] sm:$0xf0]  ;;  %v3824_v29 = vor.u32 %v4197_v14, %v3821_v10  ;;  %v5656_v26 = vld [vmem:[#allocation39_spill] sm:$0xff] }
 0x681   :  { %v2417_v16 = vmul.f32 %v4438_v13, %v2416_v23  ;;  %v2430_v19 = vmul.f32 %v2412_v44, %v5470_v38  ;;  %v3867_v38 = vld [vmem:[#allocation6 + $0x228] sm:$0xf]  ;;  %2744 = vmatpush.bf16.msrb.mxu1 %v3848_v50  ;;  %v3828_v55 = vor.u32 %v4199_v24, %v3827_v52  ;;  %v5651_v44 = vld [vmem:[#allocation45_spill] sm:$0xff]  ;;  %v5657_v2 = vsel %vm4891_vm0, %v5655_v49, %v5656_v26  ;;  %v5658_v14 = vld [vmem:[#allocation42_spill] sm:$0xff] }
 0x682   :  { %v3868_v15 = vor.u32 %v4210_v33, %v3867_v38  ;;  %2758 = vmatpush.bf16.msra.mxu2 %v3840_v47  ;;  %v3815_v33 = vld [vmem:[#allocation6 + $0x1b8] sm:$0xf]  ;;  %v4190_v50 = vld [vmem:[#allocation6 + $0x190] sm:$0xf0] }
 0x683   :  { %v5490_v22 = vadd.f32 %v2431_v4, %v2430_v19  ;;  %v2418_v37 = vadd.f32 %v4438_v13, %v2417_v16  ;;  %v5652_v16 = vld [vmem:[#allocation44_spill] sm:$0xff]  ;;  %v3816_v27 = vor.u32 %v4196_v8, %v3815_v33  ;;  %v3966_v26 = vld [vmem:[#allocation6 + $0x2f4] sm:$0xf0] }
 0x684   :  { %2729 = vmatpush.bf16.msrb.mxu0 %v3868_v15  ;;  %v5653_v19 = vld [vmem:[#allocation16_spill] sm:$0xff]  ;;  %v3795_v15 = vld [vmem:[#allocation6 + $0x198] sm:$0xf] }
 0x685   :  { %4441 = vtanh.f32 %v5490_v22  ;;  %v2422_v48 = vsel %vm2421_vm4, %v4438_v13, %v2418_v37  ;;  %2745 = vmatpush.bf16.msrb.mxu1 %v3836_v43  ;;  %v3819_v13 = vld [vmem:[#allocation6 + $0x1c8] sm:$0xf]  ;;  %v5654_v37 = vsel %vm4929_vm3, %v5652_v16, %v5653_v19  ;;  %v3796_v20 = vor.u32 %v4192_v31, %v3795_v15 }
 0x686   :  { %v2427_v63 = vsel %vm2424_vm5, %v2426_v36, %v2422_v48  ;;  %v3820_v60 = vor.u32 %v4198_v5, %v3819_v13  ;;  %2759 = vmatpush.bf16.msra.mxu2 %v3828_v55  ;;  %v4195_v48 = vld [vmem:[#allocation6 + $0x1b8] sm:$0xf0]  ;;  %v4194_v36 = vld [vmem:[#allocation6 + $0x1b4] sm:$0xf] }
 0x688   :  { %2730 = vmatpush.bf16.msrb.mxu0 %v3856_v46 }
 0x689   :  { %2746 = vmatpush.bf16.msrb.mxu1 %v3824_v29 }
 0x68a   :  { %2760 = vmatpush.bf16.msra.mxu2 %v3816_v27 }
 0x68b   :  { %v4442_v57 = vpop.eup %4441 }
 0x68c   :  { %v2434_v28 = vmul.f32 %v4442_v57, %v2427_v63  ;;  %2731 = vmatpush.bf16.msrb.mxu0 %v3844_v59 }
 0x68e   :  { %v2439_v39 = vpack.c.bf16 %v2434_v28, %v2434_v28  ;;  %v3808_v28 = vor.u32 %v4195_v48, %v3807_v62  ;;  %2761 = vmatpush.bf16.msra.mxu2 %v3804_v56 }
 0x690   :  { %2448 = vmatmul.bf16.vlgmr.msra.gmra.mxu0 %v2439_v39  ;;  %2461 = vmatmul.bf16.vlgmr.msra.gmra.mxu1 %v2439_v39 }
 0x691   :  { %2474 = vmatmul.bf16.vlgmr.msrb.gmra.mxu2 %v2439_v39  ;;  %2487 = vmatmul.bf16.vlgmr.msrb.gmra.mxu3 %v2439_v39  ;;  %v3809_v39 = vld [vmem:[#allocation6 + $0x1bc] sm:$0xf0] }
 0x692   :  { %2732 = vmatpush.bf16.msrb.mxu0 %v3832_v11  ;;  %v3812_v38 = vor.u32 %v4194_v36, %v3809_v39  ;;  %v3792_v11 = vor.u32 %v4190_v50, %v3791_v51  ;;  %v3952_v51 = vld [vmem:[#allocation6 + $0x2d0] sm:$0xf]  ;;  %v4231_v50 = vld [vmem:[#allocation6 + $0x2d8] sm:$0xf0] }
 0x694   :  { %2747 = vmatpush.bf16.msrb.mxu1 %v3812_v38  ;;  %2762 = vmatpush.bf16.msra.mxu2 %v3792_v11  ;;  %v4232_v11 = vld [vmem:[#allocation6 + $0x2e0] sm:$0xf0] }
 0x696   :  { %2733 = vmatpush.bf16.msrb.mxu0 %v3820_v60  ;;  %v5659_v60 = vld [vmem:[#allocation43_spill] sm:$0xff] }
 0x697   :  { %v5660_v10 = vsel %vm4895_vm1, %v5658_v14, %v5659_v60  ;;  %v4229_v14 = vld [vmem:[#allocation6 + $0x2c8] sm:$0xf0] }
 0x698   :  { %2748 = vmatpush.bf16.msrb.mxu1 %v3800_v30 }
 0x69a   :  { %2734 = vmatpush.bf16.msrb.mxu0 %v3808_v28 }
 0x69c   :  { %2749 = vmatpush.bf16.msrb.mxu1 %v3788_v18  ;;  %v3954_v18 = vld [vmem:[#allocation6 + $0x2dc] sm:$0xf0] }
 0x69e   :  { %2735 = vmatpush.bf16.msrb.mxu0 %v3796_v20 }
 0x6a2   :  { %2736 = vmatpush.bf16.msrb.mxu0 %v3784_v9  ;;  %v4230_v9 = vld [vmem:[#allocation6 + $0x2d4] sm:$0xf] }
 0x70d   :  { %v2449_v34 = vpop.f32.mrf.mxu0  ;;  %v2462_v23 = vpop.f32.mrf.mxu1 }
 0x70e   :  { %v2492_v4 = vadd.f32 %v2449_v34, %v5651_v44  ;;  %v2493_v54 = vadd.f32 %v2462_v23, %v5654_v37 }
 0x710   :  { %v3778_v57 = vmul.f32 -1.442695, %v2492_v4  ;;  %v3779_v63 = vmul.f32 -1.442695, %v2493_v54 }
 0x712   :  { %4443 = vpow2.f32 %v3778_v57 }
 0x713   :  { %4445 = vpow2.f32 %v3779_v63 }
 0x714   :  { %v2475_v46 = vpop.f32.mrf.mxu2  ;;  %v2488_v42 = vpop.f32.mrf.mxu3 }
 0x715   :  { %v2494_v59 = vadd.f32 %v2475_v46, %v5657_v2  ;;  %v2451_v21 = vpop.f32.mrf.mxu0  ;;  %v2464_v6 = vpop.f32.mrf.mxu1  ;;  %v2495_v52 = vadd.f32 %v2488_v42, %v5660_v10  ;;  %v3972_v2 = vld [vmem:[#allocation6 + $0x2f0] sm:$0xf] }
 0x716   :  { %v3969_v21 = vor.u32 %v4233_v61, %v3966_v26  ;;  %v3880_v61 = vld [vmem:[#allocation6 + $0x240] sm:$0xf] }
 0x717   :  { %v3780_v0 = vmul.f32 -1.442695, %v2494_v59  ;;  %v4235_v59 = vld [vmem:[#allocation6 + $0x2f8] sm:$0xf0] }
 0x718   :  { %v4444_v58 = vpop.eup %4443  ;;  %v3973_v6 = vor.u32 %v4235_v59, %v3972_v2  ;;  %2975 = vmatpush.bf16.msra.mxu0 %v3969_v21  ;;  %v4212_v2 = vld [vmem:[#allocation6 + $0x244] sm:$0xf]  ;;  %v3882_v59 = vld [vmem:[#allocation6 + $0x24c] sm:$0xf0]  ;;  %v3888_v21 = vld [vmem:[#allocation6 + $0x248] sm:$0xf] }
 0x719   :  { %v4446_v32 = vpop.eup %4445  ;;  %v2505_v35 = vadd.f32 1.0, %v4444_v58  ;;  %4447 = vpow2.f32 %v3780_v0  ;;  %v3953_v0 = vor.u32 %v4231_v50, %v3952_v51  ;;  %v3960_v58 = vld [vmem:[#allocation6 + $0x2d8] sm:$0xf] }
 0x71a   :  { %v2506_v3 = vadd.f32 1.0, %v4446_v32  ;;  %2988 = vmatpush.bf16.msra.mxu1 %v3973_v6  ;;  %v3957_v32 = vor.u32 %v4230_v9, %v3954_v18  ;;  %v4214_v6 = vld [vmem:[#allocation6 + $0x250] sm:$0xf0] }
 0x71b   :  { %4449 = vrcp.f32 %v2505_v35  ;;  %v2519_v44 = vand.u32 2147483648, %v2505_v35  ;;  %v2517_v19 = vand.u32 2147483647, %v2505_v35  ;;  %vm2513_vm6 = vweird.f32 %v2505_v35 }
 0x71c   :  { %4451 = vrcp.f32 %v2506_v3  ;;  %v2477_v40 = vpop.f32.mrf.mxu2  ;;  %v2490_v43 = vpop.f32.mrf.mxu3  ;;  %v2534_v4 = vand.u32 2147483648, %v2506_v3  ;;  %v2532_v54 = vand.u32 2147483647, %v2506_v3  ;;  %vm2528_vm1 = vweird.f32 %v2506_v3  ;;  %2976 = vmatpush.bf16.msra.mxu0 %v3957_v32 }
 0x71d   :  { %v2520_v36 = vor.u32 1.1754944e-38, %v2519_v44  ;;  %vm2518_vm9 = vcmp.eq.f32.partialorder %v2517_v19, 8.507059e+37  ;;  %v4228_v40 = vld [vmem:[#allocation6 + $0x2c0] sm:$0xf0]  ;;  %v4227_v43 = vld [vmem:[#allocation6 + $0x2bc] sm:$0xf] }
 0x71e   :  { %v2535_v63 = vor.u32 1.1754944e-38, %v2534_v4  ;;  %vm2533_vm10 = vcmp.eq.f32.partialorder %v2532_v54, 8.507059e+37  ;;  %v4226_v44 = vld [vmem:[#allocation6 + $0x2b0] sm:$0xf0]  ;;  %v3916_v19 = vld [vmem:[#allocation6 + $0x288] sm:$0xf] }
 0x71f   :  { %v4448_v47 = vpop.eup %4447  ;;  %v4221_v54 = vld [vmem:[#allocation6 + $0x28c] sm:$0xf] }
 0x720   :  { %v2507_v13 = vadd.f32 1.0, %v4448_v47 }
 0x721   :  { %v4450_v5 = vpop.eup %4449 }
 0x722   :  { %v4452_v24 = vpop.eup %4451  ;;  %v2509_v34 = vmul.f32 %v4450_v5, %v2505_v35  ;;  %4453 = vrcp.f32 %v2507_v13  ;;  %vm2514_vm0 = vweird.f32 %v4450_v5  ;;  %v2549_v30 = vand.u32 2147483648, %v2507_v13 }
 0x723   :  { %v2524_v23 = vmul.f32 %v4452_v24, %v2506_v3  ;;  %4455 = vtanh.f32 %v2495_v52  ;;  %vm2529_vm3 = vweird.f32 %v4452_v24  ;;  %vm2515_vm7 = vmor %vm2513_vm6, %vm2514_vm0  ;;  %vm2543_vm12 = vweird.f32 %v2507_v13  ;;  %v3940_v3 = vld [vmem:[#allocation6 + $0x2b8] sm:$0xf]  ;;  %v3928_v52 = vld [vmem:[#allocation6 + $0x2a0] sm:$0xf] }
 0x724   :  { %v2510_v29 = vsub.f32 1.0, %v2509_v34  ;;  %vm2530_vm8 = vmor %vm2528_vm1, %vm2529_vm3  ;;  %v2547_v53 = vand.u32 2147483647, %v2507_v13  ;;  %v2550_v45 = vor.u32 1.1754944e-38, %v2549_v30  ;;  %v3961_v35 = vor.u32 %v4232_v11, %v3960_v58  ;;  %v4224_v34 = vld [vmem:[#allocation6 + $0x2a4] sm:$0xf] }
 0x725   :  { %v2525_v55 = vsub.f32 1.0, %v2524_v23  ;;  %v3941_v47 = vor.u32 %v4228_v40, %v3940_v3  ;;  %v3885_v58 = vor.u32 %v4212_v2, %v3882_v59  ;;  %v3889_v11 = vor.u32 %v4214_v6, %v3888_v21  ;;  %v4248_v2 = vld [vmem:[#allocation6 + $0x364] sm:$0xf]  ;;  %v4027_v21 = vld [vmem:[#allocation6 + $0x36c] sm:$0xf0] }
 0x726   :  { %v2511_v16 = vmul.f32 %v4450_v5, %v2510_v29  ;;  %vm2548_vm14 = vcmp.eq.f32.partialorder %v2547_v53, 8.507059e+37  ;;  %2989 = vmatpush.bf16.msra.mxu1 %v3961_v35  ;;  %v3930_v29 = vld [vmem:[#allocation6 + $0x2ac] sm:$0xf0]  ;;  %v3892_v53 = vld [vmem:[#allocation6 + $0x258] sm:$0xf] }
 0x727   :  { %v2526_v37 = vmul.f32 %v4452_v24, %v2525_v55  ;;  %v3936_v55 = vld [vmem:[#allocation6 + $0x2a8] sm:$0xf]  ;;  %v3933_v4 = vor.u32 %v4224_v34, %v3930_v29 }
 0x728   :  { %v4454_v7 = vpop.eup %4453  ;;  %v2512_v62 = vadd.f32 %v4450_v5, %v2511_v16  ;;  %v3937_v16 = vor.u32 %v4226_v44, %v3936_v55  ;;  %v4033_v6 = vld [vmem:[#allocation6 + $0x368] sm:$0xf] }
 0x729   :  { %v2539_v48 = vmul.f32 %v4454_v7, %v2507_v13  ;;  %v2527_v57 = vadd.f32 %v4452_v24, %v2526_v37  ;;  %v4456_v39 = vpop.eup %4455  ;;  %vm2544_vm11 = vweird.f32 %v4454_v7  ;;  %v3942_v13 = vld [vmem:[#allocation6 + $0x2c4] sm:$0xf0]  ;;  %v4222_v37 = vld [vmem:[#allocation6 + $0x290] sm:$0xf0] }
 0x72a   :  { %v2516_v28 = vsel %vm2515_vm7, %v4450_v5, %v2512_v62  ;;  %vm2545_vm13 = vmor %vm2543_vm12, %vm2544_vm11  ;;  %v3948_v5 = vld [vmem:[#allocation6 + $0x2c0] sm:$0xf]  ;;  %v3945_v60 = vor.u32 %v4227_v43, %v3942_v13  ;;  %v3918_v62 = vld [vmem:[#allocation6 + $0x294] sm:$0xf0] }
 0x72b   :  { %v2540_v38 = vsub.f32 1.0, %v2539_v48  ;;  %v2521_v33 = vsel %vm2518_vm9, %v2520_v36, %v2516_v28  ;;  %v2531_v8 = vsel %vm2530_vm8, %v4452_v24, %v2527_v57  ;;  %v3949_v10 = vor.u32 %v4229_v14, %v3948_v5  ;;  %v4225_v24 = vld [vmem:[#allocation6 + $0x2a8] sm:$0xf0]  ;;  %v3924_v48 = vld [vmem:[#allocation6 + $0x290] sm:$0xf] }
 0x72c   :  { %v2536_v15 = vsel %vm2533_vm10, %v2535_v63, %v2531_v8  ;;  %v2555_v27 = vmul.f32 %v4456_v39, %v2521_v33  ;;  %2977 = vmatpush.bf16.msra.mxu0 %v3945_v60  ;;  %v3929_v23 = vor.u32 %v4225_v24, %v3928_v52  ;;  %v4223_v36 = vld [vmem:[#allocation6 + $0x298] sm:$0xf0]  ;;  %v3921_v57 = vor.u32 %v4221_v54, %v3918_v62  ;;  %v5510_v28 = vld [vmem:[#allocation9 + $0x3] ss:$8 sm:$0xf] }
 0x72d   :  { %v2541_v31 = vmul.f32 %v4454_v7, %v2540_v38  ;;  %v2554_v1 = vmul.f32 %v2536_v15, %v5490_v22  ;;  %v4234_v22 = vld [vmem:[#allocation6 + $0x2f0] sm:$0xf0]  ;;  %2990 = vmatpush.bf16.msra.mxu1 %v3949_v10  ;;  %v3925_v63 = vor.u32 %v4223_v36, %v3924_v48  ;;  %v3904_v33 = vld [vmem:[#allocation6 + $0x270] sm:$0xf]  ;;  %v4219_v8 = vld [vmem:[#allocation6 + $0x278] sm:$0xf0] }
 0x72e   :  { %v3965_v49 = vor.u32 %v4234_v22, %v3964_v25  ;;  %v4218_v15 = vld [vmem:[#allocation6 + $0x274] sm:$0xf]  ;;  %v4217_v22 = vld [vmem:[#allocation6 + $0x268] sm:$0xf0]  ;;  %v2595_v13 = vperm.slane %v5510_v28, 0  ;;  %v2596_v24 = vperm.slane %v5510_v28, 1 }
 0x72f   :  { %v2556_v17 = vadd.f32 %v2555_v27, %v2554_v1  ;;  %v2542_v20 = vadd.f32 %v4454_v7, %v2541_v31  ;;  %v3905_v27 = vor.u32 %v4219_v8, %v3904_v33  ;;  %v3906_v31 = vld [vmem:[#allocation6 + $0x27c] sm:$0xf0]  ;;  %v3912_v1 = vld [vmem:[#allocation6 + $0x278] sm:$0xf]  ;;  %v4061_v62 = vld [vmem:[#allocation6 + $0x3a8] sm:$0xf] }
 0x730   :  { %2962 = vmatpush.bf16.msra.mxu3 %v3965_v49  ;;  %2978 = vmatpush.bf16.msra.mxu0 %v3933_v4  ;;  %v4213_v49 = vld [vmem:[#allocation6 + $0x248] sm:$0xf0]  ;;  %v4258_v48 = vld [vmem:[#allocation6 + $0x3b0] sm:$0xf0]  ;;  %v4259_v33 = vld [vmem:[#allocation6 + $0x3b8] sm:$0xf0] }
 0x731   :  { %4457 = vtanh.f32 %v2556_v17  ;;  %v2546_v41 = vsel %vm2545_vm13, %v4454_v7, %v2542_v20  ;;  %2991 = vmatpush.bf16.msra.mxu1 %v3937_v16  ;;  %v3917_v7 = vor.u32 %v4222_v37, %v3916_v19  ;;  %v4220_v17 = vld [vmem:[#allocation6 + $0x280] sm:$0xf0]  ;;  %v3909_v20 = vor.u32 %v4218_v15, %v3906_v31  ;;  %v4255_v15 = vld [vmem:[#allocation6 + $0x398] sm:$0xf0] }
 0x732   :  { %v2551_v42 = vsel %vm2548_vm14, %v2550_v45, %v2546_v41  ;;  %v3913_v30 = vor.u32 %v4220_v17, %v3912_v1  ;;  %v4216_v41 = vld [vmem:[#allocation6 + $0x260] sm:$0xf0]  ;;  %v4215_v45 = vld [vmem:[#allocation6 + $0x25c] sm:$0xf]  ;;  %v3881_v50 = vor.u32 %v4213_v49, %v3880_v61  ;;  %v4062_v36 = vor.u32 %v4258_v48, %v4061_v62  ;;  %v4051_v1 = vld [vmem:[#allocation6 + $0x39c] sm:$0xf0] }
 0x733   :  { %v4057_v17 = vld [vmem:[#allocation6 + $0x398] sm:$0xf]  ;;  %v4025_v49 = vld [vmem:[#allocation6 + $0x360] sm:$0xf] }
 0x734   :  { %2963 = vmatpush.bf16.msra.mxu3 %v3953_v0  ;;  %2979 = vmatpush.bf16.msra.mxu0 %v3921_v57  ;;  %v4257_v57 = vld [vmem:[#allocation6 + $0x3ac] sm:$0xf] }
 0x735   :  { %2992 = vmatpush.bf16.msra.mxu1 %v3925_v63  ;;  %v4063_v63 = vld [vmem:[#allocation6 + $0x3b4] sm:$0xf0]  ;;  %3195 = vmatpush.bf16.msrb.mxu2 %v4062_v36 }
 0x737   :  { %v4458_v46 = vpop.eup %4457 }
 0x738   :  { %v2558_v56 = vmul.f32 %v4458_v46, %v2551_v42  ;;  %2964 = vmatpush.bf16.msra.mxu3 %v3941_v47  ;;  %v2597_v46 = vperm.slane %v5510_v28, 2  ;;  %v3893_v42 = vor.u32 %v4216_v41, %v3892_v53  ;;  %2980 = vmatpush.bf16.msra.mxu0 %v3909_v20  ;;  %v4069_v28 = vld [vmem:[#allocation6 + $0x3b0] sm:$0xf]  ;;  %v4256_v20 = vld [vmem:[#allocation6 + $0x3a0] sm:$0xf0] }
 0x739   :  { %2993 = vmatpush.bf16.msra.mxu1 %v3913_v30  ;;  %v4070_v8 = vor.u32 %v4259_v33, %v4069_v28  ;;  %v4058_v53 = vor.u32 %v4256_v20, %v4057_v17  ;;  %v4037_v41 = vld [vmem:[#allocation6 + $0x378] sm:$0xf]  ;;  %v4237_v28 = vld [vmem:[#allocation6 + $0x308] sm:$0xf0] }
 0x73a   :  { %v2593_v12 = vpack.c.bf16 %v2558_v56, %v2558_v56  ;;  %v3894_v56 = vld [vmem:[#allocation6 + $0x264] sm:$0xf0] }
 0x73b   :  { %v3897_v25 = vor.u32 %v4215_v45, %v3894_v56  ;;  %v4252_v45 = vld [vmem:[#allocation6 + $0x380] sm:$0xf0]  ;;  %v4039_v56 = vld [vmem:[#allocation6 + $0x384] sm:$0xf0] }
 0x73c   :  { %2737 = vmatmul.bf16.vlgmr.msrb.gmra.mxu0 %v2593_v12  ;;  %2750 = vmatmul.bf16.vlgmr.msrb.gmra.mxu1 %v2593_v12 }
 0x73d   :  { %2763 = vmatmul.bf16.vlgmr.msra.gmra.mxu2 %v2593_v12  ;;  %2965 = vmatpush.bf16.msra.mxu3 %v3929_v23  ;;  %v3900_v12 = vld [vmem:[#allocation6 + $0x260] sm:$0xf] }
 0x73e   :  { %v3901_v26 = vor.u32 %v4217_v22, %v3900_v12  ;;  %2981 = vmatpush.bf16.msra.mxu0 %v3897_v25  ;;  %v4045_v12 = vld [vmem:[#allocation6 + $0x380] sm:$0xf]  ;;  %v4253_v25 = vld [vmem:[#allocation6 + $0x388] sm:$0xf0] }
 0x73f   :  { %v4046_v61 = vor.u32 %v4253_v25, %v4045_v12 }
 0x740   :  { %2994 = vmatpush.bf16.msra.mxu1 %v3901_v26  ;;  %v4249_v26 = vld [vmem:[#allocation6 + $0x368] sm:$0xf0] }
 0x741   :  { %2966 = vmatpush.bf16.msra.mxu3 %v3917_v7  ;;  %v4026_v59 = vor.u32 %v4249_v26, %v4025_v49 }
 0x742   :  { %2982 = vmatpush.bf16.msra.mxu0 %v3885_v58  ;;  %v4245_v58 = vld [vmem:[#allocation6 + $0x34c] sm:$0xf] }
 0x744   :  { %2995 = vmatpush.bf16.msra.mxu1 %v3889_v11 }
 0x745   :  { %2967 = vmatpush.bf16.msra.mxu3 %v3905_v27  ;;  %v4254_v27 = vld [vmem:[#allocation6 + $0x394] sm:$0xf] }
 0x746   :  { %3221 = vmatpush.bf16.msrb.mxu0 %v4070_v8  ;;  %v4054_v30 = vor.u32 %v4254_v27, %v4051_v1  ;;  %v3979_v8 = vld [vmem:[#allocation6 + $0x30c] sm:$0xf0] }
 0x749   :  { %2968 = vmatpush.bf16.msra.mxu3 %v3893_v42  ;;  %v4038_v42 = vor.u32 %v4252_v45, %v4037_v41 }
 0x74a   :  { %3222 = vmatpush.bf16.msrb.mxu0 %v4058_v53 }
 0x74d   :  { %2969 = vmatpush.bf16.msra.mxu3 %v3881_v50  ;;  %v4030_v50 = vor.u32 %v4248_v2, %v4027_v21 }
 0x74e   :  { %3223 = vmatpush.bf16.msrb.mxu0 %v4046_v61 }
 0x7b9   :  { %v2738_v39 = vpop.f32.mrf.mxu0  ;;  %v5512_v38 = vpop.f32.mrf.mxu1 }
 0x7ba   :  { %v2739_v52 = vadd.f32 %v2738_v39, %v2595_v13  ;;  %v2752_v4 = vadd.f32 %v5512_v38, %v2596_v24  ;;  %v4066_v39 = vor.u32 %v4257_v57, %v4063_v63  ;;  %v4049_v38 = vld [vmem:[#allocation6 + $0x390] sm:$0xf]  ;;  %v4244_v24 = vld [vmem:[#allocation6 + $0x340] sm:$0xf0]  ;;  %v3977_v63 = vld [vmem:[#allocation6 + $0x300] sm:$0xf] }
 0x7bb   :  { %v4050_v31 = vor.u32 %v4255_v15, %v4049_v38  ;;  %v4001_v13 = vld [vmem:[#allocation6 + $0x330] sm:$0xf]  ;;  %v3978_v33 = vor.u32 %v4237_v28, %v3977_v63  ;;  %v3985_v38 = vld [vmem:[#allocation6 + $0x308] sm:$0xf]  ;;  %v4238_v15 = vld [vmem:[#allocation6 + $0x310] sm:$0xf0] }
 0x7bc   :  { %v2768_v44 = vmax.f32 %v2739_v52, 0.0  ;;  %3208 = vmatpush.bf16.msrb.mxu3 %v4066_v39  ;;  %v4009_v52 = vld [vmem:[#allocation6 + $0x338] sm:$0xf]  ;;  %v4236_v39 = vld [vmem:[#allocation6 + $0x304] sm:$0xf]  ;;  %v3986_v1 = vor.u32 %v4238_v15, %v3985_v38 }
 0x7bd   :  { %3196 = vmatpush.bf16.msrb.mxu2 %v4050_v31  ;;  %v3982_v31 = vor.u32 %v4236_v39, %v3979_v8 }
 0x7c0   :  { %v2764_v51 = vpop.f32.mrf.mxu2  ;;  %3209 = vmatpush.bf16.msrb.mxu3 %v4054_v30 }
 0x7c1   :  { %v2765_v9 = vadd.f32 %v2764_v51, %v2597_v46  ;;  %v2740_v0 = vpop.f32.mrf.mxu0  ;;  %v2753_v18 = vpop.f32.mrf.mxu1  ;;  %v4251_v46 = vld [vmem:[#allocation6 + $0x37c] sm:$0xf]  ;;  %3197 = vmatpush.bf16.msrb.mxu2 %v4038_v42  ;;  %v4250_v51 = vld [vmem:[#allocation6 + $0x370] sm:$0xf0] }
 0x7c2   :  { %v4042_v22 = vor.u32 %v4251_v46, %v4039_v56  ;;  %v4013_v0 = vld [vmem:[#allocation6 + $0x348] sm:$0xf]  ;;  %v4246_v18 = vld [vmem:[#allocation6 + $0x350] sm:$0xf0] }
 0x7c3   :  { %v3877_v32 = vmul.f32 -1.442695, %v2765_v9  ;;  %v4034_v9 = vor.u32 %v4250_v51, %v4033_v6  ;;  %v4014_v11 = vor.u32 %v4246_v18, %v4013_v0 }
 0x7c4   :  { %3210 = vmatpush.bf16.msrb.mxu3 %v4042_v22 }
 0x7c5   :  { %4459 = vpow2.f32 %v3877_v32  ;;  %3198 = vmatpush.bf16.msrb.mxu2 %v4026_v59  ;;  %3224 = vmatpush.bf16.msrb.mxu0 %v4034_v9  ;;  %v4015_v32 = vld [vmem:[#allocation6 + $0x354] sm:$0xf0] }
 0x7c8   :  { %v2766_v35 = vpop.f32.mrf.mxu2  ;;  %3211 = vmatpush.bf16.msrb.mxu3 %v4030_v50 }
 0x7c9   :  { %v4021_v35 = vld [vmem:[#allocation6 + $0x350] sm:$0xf]  ;;  %3199 = vmatpush.bf16.msrb.mxu2 %v4014_v11 }
 0x7cb   :  { %v4460_v3 = vpop.eup %4459 }
 0x7cc   :  { %v2772_v40 = vadd.f32 1.0, %v4460_v3  ;;  %v4247_v3 = vld [vmem:[#allocation6 + $0x358] sm:$0xf0] }
 0x7ce   :  { %4461 = vrcp.f32 %v2772_v40  ;;  %v2784_v14 = vand.u32 2147483648, %v2772_v40  ;;  %v2782_v10 = vand.u32 2147483647, %v2772_v40  ;;  %vm2778_vm2 = vweird.f32 %v2772_v40 }
 0x7d0   :  { %v2785_v23 = vor.u32 1.1754944e-38, %v2784_v14  ;;  %vm2783_vm5 = vcmp.eq.f32.partialorder %v2782_v10, 8.507059e+37  ;;  %v4242_v14 = vld [vmem:[#allocation6 + $0x334] sm:$0xf]  ;;  %v4003_v10 = vld [vmem:[#allocation6 + $0x33c] sm:$0xf0] }
 0x7d4   :  { %v4462_v43 = vpop.eup %4461 }
 0x7d5   :  { %v2774_v47 = vmul.f32 %v4462_v43, %v2772_v40  ;;  %vm2779_vm15 = vweird.f32 %v4462_v43  ;;  %v4018_v40 = vor.u32 %v4245_v58, %v4015_v32  ;;  %v3058_v32 = vld [vmem:[#allocation9 + $0x5] ss:$8 sm:$0xf] }
 0x7d6   :  { %vm2780_vm4 = vmor %vm2778_vm2, %vm2779_vm15 }
 0x7d7   :  { %v2775_v5 = vsub.f32 1.0, %v2774_v47  ;;  %v5518_v47 = vld [vmem:[#allocation9 + $0x4] ss:$8 sm:$0xf]  ;;  %3212 = vmatpush.bf16.msrb.mxu3 %v4018_v40 }
 0x7d8   :  { %v2828_v56 = vperm.slane %v5518_v47, 0  ;;  %v2829_v49 = vperm.slane %v5518_v47, 1 }
 0x7d9   :  { %v2776_v60 = vmul.f32 %v4462_v43, %v2775_v5  ;;  %v4243_v5 = vld [vmem:[#allocation6 + $0x338] sm:$0xf0] }
 0x7db   :  { %v2777_v34 = vadd.f32 %v4462_v43, %v2776_v60  ;;  %v4002_v60 = vor.u32 %v4243_v5, %v4001_v13 }
 0x7dd   :  { %v2781_v29 = vsel %vm2780_vm4, %v4462_v43, %v2777_v34  ;;  %v4022_v43 = vor.u32 %v4247_v3, %v4021_v35  ;;  %v4006_v34 = vor.u32 %v4242_v14, %v4003_v10  ;;  %3200 = vmatpush.bf16.msrb.mxu2 %v4002_v60  ;;  %v3063_v35 = vperm.slane %v3058_v32, 2 }
 0x7de   :  { %v2786_v55 = vsel %vm2783_vm5, %v2785_v23, %v2781_v29  ;;  %v4010_v23 = vor.u32 %v4244_v24, %v4009_v52  ;;  %v2830_v29 = vperm.slane %v5518_v47, 2 }
 0x7df   :  { %v2789_v16 = vsub.f32 1.0, %v2786_v55  ;;  %v2788_v19 = vmul.f32 %v2786_v55, %v2768_v44  ;;  %3225 = vmatpush.bf16.msrb.mxu0 %v4022_v43  ;;  %3213 = vmatpush.bf16.msrb.mxu3 %v4006_v34  ;;  %v3989_v55 = vld [vmem:[#allocation6 + $0x318] sm:$0xf]  ;;  %v4240_v44 = vld [vmem:[#allocation6 + $0x320] sm:$0xf0] }
 0x7e1   :  { %v2790_v37 = vmul.f32 %v2789_v16, %v2752_v4  ;;  %v4239_v4 = vld [vmem:[#allocation6 + $0x31c] sm:$0xf]  ;;  %v3990_v16 = vor.u32 %v4240_v44, %v3989_v55 }
 0x7e3   :  { %v2791_v54 = vadd.f32 %v2790_v37, %v2788_v19  ;;  %3226 = vmatpush.bf16.msrb.mxu0 %v4010_v23  ;;  %v3991_v19 = vld [vmem:[#allocation6 + $0x324] sm:$0xf0]  ;;  %v3997_v37 = vld [vmem:[#allocation6 + $0x320] sm:$0xf]  ;;  %3201 = vmatpush.bf16.msrb.mxu2 %v3990_v16  ;;  %v3061_v23 = vperm.slane %v3058_v32, 0 }
 0x7e4   :  { %v3994_v62 = vor.u32 %v4239_v4, %v3991_v19 }
 0x7e5   :  { %v2826_v7 = vpack.c.bf16 %v2791_v54, %v2791_v54  ;;  %v4241_v54 = vld [vmem:[#allocation6 + $0x328] sm:$0xf0] }
 0x7e6   :  { %v3998_v48 = vor.u32 %v4241_v54, %v3997_v37  ;;  %3214 = vmatpush.bf16.msrb.mxu3 %v3994_v62  ;;  %v3062_v37 = vperm.slane %v3058_v32, 1 }
 0x7e7   :  { %2970 = vmatmul.bf16.vlgmr.msra.gmra.mxu3 %v2826_v7  ;;  %2983 = vmatmul.bf16.vlgmr.msra.gmra.mxu0 %v2826_v7 }
 0x7e8   :  { %2996 = vmatmul.bf16.vlgmr.msra.gmra.mxu1 %v2826_v7  ;;  %3227 = vmatpush.bf16.msrb.mxu0 %v3998_v48 }
 0x7e9   :  { %3202 = vmatpush.bf16.msrb.mxu2 %v3978_v33 }
 0x7ea   :  { %3215 = vmatpush.bf16.msrb.mxu3 %v3982_v31 }
 0x7ec   :  { %3228 = vmatpush.bf16.msrb.mxu0 %v3986_v1 }
 0x864   :  { %v2984_v7 = vpop.f32.mrf.mxu0 }
 0x865   :  { %v2997_v36 = vpop.f32.mrf.mxu1  ;;  %v2985_v51 = vadd.f32 %v2984_v7, %v2829_v49 }
 0x866   :  { %v2998_v57 = vadd.f32 %v2997_v36, %v2830_v29 }
 0x868   :  { %v3974_v27 = vmul.f32 -1.442695, %v2998_v57 }
 0x86a   :  { %4463 = vpow2.f32 %v3974_v27  ;;  %v2971_v17 = vpop.f32.mrf.mxu3 }
 0x86b   :  { %v2972_v26 = vadd.f32 %v2971_v17, %v2828_v56 }
 0x86c   :  { %v2986_v20 = vpop.f32.mrf.mxu0 }
 0x86d   :  { %v2999_v30 = vpop.f32.mrf.mxu1  ;;  %v3001_v50 = vmax.f32 %v2972_v26, 0.0 }
 0x870   :  { %v4464_v53 = vpop.eup %4463 }
 0x871   :  { %v3005_v41 = vadd.f32 1.0, %v4464_v53 }
 0x872   :  { %v2973_v45 = vpop.f32.mrf.mxu3 }
 0x873   :  { %4465 = vrcp.f32 %v3005_v41  ;;  %v3017_v25 = vand.u32 2147483648, %v3005_v41  ;;  %v3015_v61 = vand.u32 2147483647, %v3005_v41  ;;  %vm3011_vm3 = vweird.f32 %v3005_v41 }
 0x875   :  { %v3018_v59 = vor.u32 1.1754944e-38, %v3017_v25  ;;  %vm3016_vm1 = vcmp.eq.f32.partialorder %v3015_v61, 8.507059e+37 }
 0x879   :  { %v4466_v46 = vpop.eup %4465 }
 0x87a   :  { %v3007_v42 = vmul.f32 %v4466_v46, %v3005_v41  ;;  %vm3012_vm0 = vweird.f32 %v4466_v46 }
 0x87b   :  { %vm3013_vm6 = vmor %vm3011_vm3, %vm3012_vm0 }
 0x87c   :  { %v3008_v12 = vsub.f32 1.0, %v3007_v42 }
 0x87e   :  { %v3009_v22 = vmul.f32 %v4466_v46, %v3008_v12 }
 0x880   :  { %v3010_v2 = vadd.f32 %v4466_v46, %v3009_v22 }
 0x882   :  { %v3014_v21 = vsel %vm3013_vm6, %v4466_v46, %v3010_v2 }
 0x883   :  { %v3019_v6 = vsel %vm3016_vm1, %v3018_v59, %v3014_v21 }
 0x884   :  { %v3022_v9 = vsub.f32 1.0, %v3019_v6  ;;  %v3021_v0 = vmul.f32 %v3019_v6, %v3001_v50 }
 0x886   :  { %v3023_v18 = vmul.f32 %v3022_v9, %v2985_v51 }
 0x888   :  { %v3024_v58 = vadd.f32 %v3023_v18, %v3021_v0 }
 0x88a   :  { %v3059_v11 = vpack.c.bf16 %v3024_v58, %v3024_v58 }
 0x88c   :  { %3203 = vmatmul.bf16.vlgmr.msrb.gmra.mxu2 %v3059_v11  ;;  %3216 = vmatmul.bf16.vlgmr.msrb.gmra.mxu3 %v3059_v11 }
 0x88d   :  { %3229 = vmatmul.bf16.vlgmr.msrb.gmra.mxu0 %v3059_v11 }
 0x90a   :  { %v3230_v3 = vpop.f32.mrf.mxu0 }
 0x90b   :  { %v3231_v40 = vadd.f32 %v3230_v3, %v3063_v35 }
 0x90d   :  { %v4071_v43 = vmul.f32 -1.442695, %v3231_v40 }
 0x90f   :  { %4467 = vpow2.f32 %v4071_v43  ;;  %v3204_v47 = vpop.f32.mrf.mxu2  ;;  %v3217_v13 = vpop.f32.mrf.mxu3 }
 0x910   :  { %v3205_v16 = vadd.f32 %v3204_v47, %v3061_v23  ;;  %v3218_v36 = vadd.f32 %v3217_v13, %v3062_v37 }
 0x912   :  { %v3232_v5 = vpop.f32.mrf.mxu0  ;;  %v3234_v48 = vmax.f32 %v3205_v16, 0.0 }
 0x915   :  { %v4468_v14 = vpop.eup %4467 }
 0x916   :  { %v3238_v60 = vadd.f32 1.0, %v4468_v14 }
 0x917   :  { %v3206_v10 = vpop.f32.mrf.mxu2  ;;  %v3219_v52 = vpop.f32.mrf.mxu3 }
 0x918   :  { %4469 = vrcp.f32 %v3238_v60  ;;  %v3250_v55 = vand.u32 2147483648, %v3238_v60  ;;  %v3248_v4 = vand.u32 2147483647, %v3238_v60  ;;  %vm3244_vm8 = vweird.f32 %v3238_v60 }
 0x91a   :  { %v3251_v54 = vor.u32 1.1754944e-38, %v3250_v55  ;;  %vm3249_vm10 = vcmp.eq.f32.partialorder %v3248_v4, 8.507059e+37 }
 0x91e   :  { %v4470_v24 = vpop.eup %4469 }
 0x91f   :  { %v3240_v34 = vmul.f32 %v4470_v24, %v3238_v60  ;;  %vm3245_vm7 = vweird.f32 %v4470_v24 }
 0x920   :  { %vm3246_vm9 = vmor %vm3244_vm8, %vm3245_vm7 }
 0x921   :  { %v3241_v29 = vsub.f32 1.0, %v3240_v34 }
 0x923   :  { %v3242_v44 = vmul.f32 %v4470_v24, %v3241_v29 }
 0x925   :  { %v3243_v19 = vadd.f32 %v4470_v24, %v3242_v44 }
 0x927   :  { %v3247_v7 = vsel %vm3246_vm9, %v4470_v24, %v3243_v19 }
 0x928   :  { %v3252_v62 = vsel %vm3249_vm10, %v3251_v54, %v3247_v7 }
 0x929   :  { %v3255_v57 = vsub.f32 1.0, %v3252_v62  ;;  %v3254_v63 = vmul.f32 %v3252_v62, %v3234_v48 }
 0x92b   :  { %v3256_v28 = vmul.f32 %v3255_v57, %v3218_v36 }
 0x92d   :  { %v3257_v39 = vadd.f32 %v3256_v28, %v3254_v63 }
 0x92f   :  { %3258 = vst [vmem:[#allocation11] sm:$0xff] %v3257_v39 }
 0x930   :  { %3269 = dma.vmem_to_hbm [thread:$0]  %s3265_s3, 128, %s3267_s15, [#allocation5]  }
 0x931   :  { %4597 = dma.done.wait [#allocation5], 128  }
 0x932   :  { %4598 = vsyncadd [#allocation5], 4294967168 }
 0x933   :  { %3274 = vsyncpa [#allocation4], 1 }
 0x934   :  { %3275 = vsyncpa [#allocation7], 1 }
 0x935   :  { %3276 = vsyncpa [#allocation10], 1 }
 0x936   :  { %3277 = vsyncpa [#allocation5], 1 }

</bundles_post_ra>
